<compile_context>
chip_gen: v5e
topology: v5e:2x2
jax: 0.10.0
libtpu: 0.0.40
codegen_flags: <defaults>
</compile_context>

<pallas_src>
import jax
import jax.numpy as jnp
from jax.experimental import pallas as pl
from jax.experimental.pallas import tpu as pltpu

# ---------------- synthetic encoder config ----------------
HIDDEN = 32
N_HEADS = 4
HEAD_DIM = HIDDEN // N_HEADS
FFN = 4 * HIDDEN
N_LAYERS = 2
VOCAB = 64
MAX_POS = 16
EPS = 1e-5                       # config.layer_norm_eps
PACK = 128                       # lane-dense packed output: [vec(32) | stop(2) | 0-pad]
STOP_PAD = PACK - HIDDEN         # stop head padded from 2 -> 96 output columns


def _layernorm(x, g, b, eps=EPS):
    mu = jnp.mean(x, axis=-1, keepdims=True)
    var = jnp.mean((x - mu) ** 2, axis=-1, keepdims=True)
    return (x - mu) * jax.lax.rsqrt(var + eps) * g + b


# ---------------- single fused Pallas kernel (no grid: one step) ------------
# embeddings -> N_LAYERS transformer layers -> project head (vec) + pooler/stop.

def retriever_kernel(ids_ref, mask_ref,
                     wemb_ref, pos_ref, eg_ref, eb_ref,
                     wq_ref, wk_ref, wv_ref, bq_ref, bk_ref, bv_ref,
                     wo_ref, bo_ref, ln1g_ref, ln1b_ref,
                     w1_ref, b1_ref, w2_ref, b2_ref, ln2g_ref, ln2b_ref,
                     pw_ref, pb_ref, pg_ref, pbeta_ref,
                     poolw_ref, poolb_ref, stopw_ref, stopb_ref,
                     out_ref):
    R, S = ids_ref.shape
    M = R * S
    scale = 1.0 / (HEAD_DIM ** 0.5)

    # ---- embeddings: in-kernel "gather" via one-hot matmul (MXU, no XLA gather)
    ids = ids_ref[...]
    vocab_iota = jax.lax.broadcasted_iota(jnp.int32, (R, S, VOCAB), 2)
    onehot = (ids[:, :, None] == vocab_iota).astype(jnp.float32)         # [R,S,V]
    emb = jnp.dot(onehot.reshape(M, VOCAB), wemb_ref[...],
                  preferred_element_type=jnp.float32).reshape(R, S, HIDDEN)
    # TODO(synk): HF RoBERTa offsets position ids by padding_idx+1 and adds
    # token_type embeddings; synthetic encoder uses plain 0..S-1 positions.
    x = _layernorm(emb + pos_ref[...][None, :, :], eg_ref[...], eb_ref[...])
    x2 = x.reshape(M, HIDDEN)                                            # [M,H] f32

    # additive key-padding bias, hoisted out of both loops
    bias = (1.0 - mask_ref[...])[:, None, :] * (-1e9)                    # [R,1,S]

    for l in range(N_LAYERS):
        xb = x2.astype(jnp.bfloat16)
        attn = jnp.zeros((M, HIDDEN), jnp.float32)
        for h in range(N_HEADS):
            # head-major weight views: no lane slicing / stacking / concat
            q = jnp.dot(xb, wq_ref[l, h], preferred_element_type=jnp.float32) + bq_ref[l, h]
            k = jnp.dot(xb, wk_ref[l, h], preferred_element_type=jnp.float32) + bk_ref[l, h]
            v = jnp.dot(xb, wv_ref[l, h], preferred_element_type=jnp.float32) + bv_ref[l, h]
            qh = q.reshape(R, S, HEAD_DIM)
            kh = k.reshape(R, S, HEAD_DIM)
            vh = v.reshape(R, S, HEAD_DIM)

            s = jnp.einsum('bqd,bkd->bqk',
                           qh.astype(jnp.bfloat16), kh.astype(jnp.bfloat16),
                           preferred_element_type=jnp.float32) * scale + bias
            s = s - jnp.max(s, axis=-1, keepdims=True)
            p = jnp.exp(s)
            p = p * pl.reciprocal(jnp.sum(p, axis=-1, keepdims=True), approx=True)
            ctx = jnp.einsum('bqk,bkd->bqd',
                             p.astype(jnp.bfloat16), vh.astype(jnp.bfloat16),
                             preferred_element_type=jnp.float32)          # [R,S,HD]

            # per-head accumulation replaces concat(heads) @ Wo
            attn = attn + jnp.dot(ctx.reshape(M, HEAD_DIM).astype(jnp.bfloat16),
                                  wo_ref[l, h], preferred_element_type=jnp.float32)

        h1 = _layernorm(x2 + attn + bo_ref[l], ln1g_ref[l], ln1b_ref[l])

        # feed-forward (elementwise math kept in f32; only matmul operands bf16)
        f = jnp.dot(h1.astype(jnp.bfloat16), w1_ref[l],
                    preferred_element_type=jnp.float32) + b1_ref[l]
        # TODO(synk): PyTorch nn.GELU default is the exact erf GELU; tanh approx used here.
        f = jax.nn.gelu(f, approximate=True)
        f = jnp.dot(f.astype(jnp.bfloat16), w2_ref[l],
                    preferred_element_type=jnp.float32) + b2_ref[l]
        x2 = _layernorm(h1 + f, ln2g_ref[l], ln2b_ref[l])

    # ---- epilogue: CLS -> project head (vec), pooler -> stop head
    cls = x2.reshape(R, S, HIDDEN)[:, 0, :]                              # [R,H]
    clsb = cls.astype(jnp.bfloat16)
    vec = _layernorm(
        jnp.dot(clsb, pw_ref[...], preferred_element_type=jnp.float32) + pb_ref[...],
        pg_ref[...], pbeta_ref[...])
    pooled = jnp.tanh(
        jnp.dot(clsb, poolw_ref[...], preferred_element_type=jnp.float32) + poolb_ref[...])
    # TODO(synk): stop_drop (Dropout) is identity in eval mode; training dropout not implemented.
    stop = jnp.dot(pooled.astype(jnp.bfloat16), stopw_ref[...],
                   preferred_element_type=jnp.float32) + stopb_ref[...]   # [R,96] (cols >= 2 are 0)

    # single lane-dense full-width store; wrapper splits vec / stop logits
    out_ref[...] = jnp.concatenate([vec, stop], axis=-1)                  # [R,128]


# ---------------- wrapper: one single-step pallas_call per encoder pass -----

def _fused_encode(prep, ids, mask):
    """Encode R = N*B sequences in ONE pallas_call. ids/mask: [R, S]."""
    R, S = ids.shape
    M = R * S
    args = (ids, mask,
            prep['word_emb'], prep['pos_emb'][:S], prep['emb_ln_g'], prep['emb_ln_b'],
            prep['wq'], prep['wk'], prep['wv'], prep['bq'], prep['bk'], prep['bv'],
            prep['wo'], prep['bo'], prep['ln1_g'], prep['ln1_b'],
            prep['w1'], prep['b1'], prep['w2'], prep['b2'], prep['ln2_g'], prep['ln2_b'],
            prep['proj_w'], prep['proj_b'], prep['proj_ln_g'], prep['proj_ln_b'],
            prep['pool_w'], prep['pool_b'], prep['stop_w'], prep['stop_b'])

    flops = 2 * M * VOCAB * HIDDEN                                   # embedding one-hot matmul
    flops += N_LAYERS * (4 * 2 * M * HIDDEN * HIDDEN                 # qkv + out proj
                         + 2 * 2 * M * S * HIDDEN                    # scores + p@v
                         + 2 * 2 * M * HIDDEN * FFN)                 # ffn
    flops += 2 * R * HIDDEN * (2 * HIDDEN + STOP_PAD)                # project + pooler + stop
    transcendentals = N_LAYERS * (N_HEADS * R * S * S + M * FFN) + R * HIDDEN
    bytes_accessed = sum(int(a.size) * a.dtype.itemsize for a in args) + R * PACK * 4

    vmem = pl.BlockSpec(memory_space=pltpu.MemorySpace.VMEM)
    packed = pl.pallas_call(
        retriever_kernel,
        out_shape=jax.ShapeDtypeStruct((R, PACK), jnp.float32),
        in_specs=[vmem] * len(args),
        out_specs=vmem,
        cost_estimate=pl.CostEstimate(flops=flops,
                                      transcendentals=transcendentals,
                                      bytes_accessed=bytes_accessed),
    )(*args)
    return packed[:, :HIDDEN], packed[:, HIDDEN:HIDDEN + 2]


fused_encode = jax.jit(_fused_encode)


def momentum_retriever_forward(prep_q, prep_k, batch, eval_stop=True):
    """Eval-mode forward of RobertaMomentumRetriever_var."""
    n_hops = len(batch['q_input_ids'])
    n_c = len(batch['c_input_ids'])
    n_neg = len(batch['neg_input_ids'])
    B = batch['q_input_ids'][0].shape[0]

    # all query hops -> one fused call with encoder_q params
    q_ids = jnp.concatenate(list(batch['q_input_ids']), axis=0)
    q_mask = jnp.concatenate(list(batch['q_mask']), axis=0)
    q_vec, q_stop = fused_encode(prep_q, q_ids, q_mask)

    # all contexts + negatives -> one fused call with encoder_k params
    k_ids = jnp.concatenate(list(batch['c_input_ids']) + list(batch['neg_input_ids']), axis=0)
    k_mask = jnp.concatenate(list(batch['c_mask']) + list(batch['neg_mask']), axis=0)
    k_vec, _ = fused_encode(prep_k, k_ids, k_mask)

    q_encoded = [q_vec[i * B:(i + 1) * B] for i in range(n_hops)]
    c_encoded = [k_vec[i * B:(i + 1) * B] for i in range(n_c)]
    n_encoded = [k_vec[(n_c + i) * B:(n_c + i + 1) * B] for i in range(n_neg)]

    vectors = {'q': q_encoded, 'c': c_encoded, 'neg': n_encoded,
               'act_hops': batch['act_hops']}
    if eval_stop:
        # the original module only computes stop logits for hops i >= 1
        vectors['stop_logits'] = [q_stop[i * B:(i + 1) * B] for i in range(1, n_hops)]
    return vectors


# ---------------- parameter init (fused layout, f32) + kernel layout prep ---

def init_params(key):
    keys = jax.random.split(key, 16)
    it = iter(keys)

    def nrm(shape):
        return jax.random.normal(next(it), shape, jnp.float32) * 0.02

    L = N_LAYERS
    return {
        'word_emb': nrm((VOCAB, HIDDEN)),
        'pos_emb': nrm((MAX_POS, HIDDEN)),
        'emb_ln_g': jnp.ones((1, HIDDEN), jnp.float32),
        'emb_ln_b': jnp.zeros((1, HIDDEN), jnp.float32),
        'wqkv': nrm((L, HIDDEN, 3 * HIDDEN)),
        'bqkv': jnp.zeros((L, 1, 3 * HIDDEN), jnp.float32),
        'wo': nrm((L, HIDDEN, HIDDEN)),
        'bo': jnp.zeros((L, 1, HIDDEN), jnp.float32),
        'ln1_g': jnp.ones((L, 1, HIDDEN), jnp.float32),
        'ln1_b': jnp.zeros((L, 1, HIDDEN), jnp.float32),
        'w1': nrm((L, HIDDEN, FFN)),
        'b1': jnp.zeros((L, 1, FFN), jnp.float32),
        'w2': nrm((L, FFN, HIDDEN)),
        'b2': jnp.zeros((L, 1, HIDDEN), jnp.float32),
        'ln2_g': jnp.ones((L, 1, HIDDEN), jnp.float32),
        'ln2_b': jnp.zeros((L, 1, HIDDEN), jnp.float32),
        # self.project = Linear(H, H) + LayerNorm(H)
        'proj_w': nrm((HIDDEN, HIDDEN)),
        'proj_b': jnp.zeros((1, HIDDEN), jnp.float32),
        'proj_ln_g': jnp.ones((1, HIDDEN), jnp.float32),
        'proj_ln_b': jnp.zeros((1, HIDDEN), jnp.float32),
        # encoder pooler + self.stop = Linear(H, 2)
        'pool_w': nrm((HIDDEN, HIDDEN)),
        'pool_b': jnp.zeros((1, HIDDEN), jnp.float32),
        'stop_w': nrm((HIDDEN, 2)),
        'stop_b': jnp.zeros((1, 2), jnp.float32),
    }


def prepare_params(p):
    """Convert fused-layout f32 params into the kernel layout:
    head-major attention weights, bf16 MXU operands, zero-padded stop head."""
    L = N_LAYERS

    def head_cols(base):      # wqkv[:, :, base:base+H] -> [L, NH, H, HD]
        return jnp.transpose(
            p['wqkv'][:, :, base:base + HIDDEN].reshape(L, HIDDEN, N_HEADS, HEAD_DIM),
            (0, 2, 1, 3))

    def head_bias(base):      # bqkv[:, 0, base:base+H] -> [L, NH, 1, HD]
        return p['bqkv'][:, 0, base:base + HIDDEN].reshape(L, N_HEADS, 1, HEAD_DIM)

    stop_w = jnp.zeros((HIDDEN, STOP_PAD), jnp.float32).at[:, :2].set(p['stop_w'])
    stop_b = jnp.zeros((1, STOP_PAD), jnp.float32).at[:, :2].set(p['stop_b'])
    bf = lambda a: a.astype(jnp.bfloat16)

    return {
        'word_emb': p['word_emb'], 'pos_emb': p['pos_emb'],
        'emb_ln_g': p['emb_ln_g'], 'emb_ln_b': p['emb_ln_b'],
        'wq': bf(head_cols(0)), 'wk': bf(head_cols(HIDDEN)), 'wv': bf(head_cols(2 * HIDDEN)),
        'bq': head_bias(0), 'bk': head_bias(HIDDEN), 'bv': head_bias(2 * HIDDEN),
        'wo': bf(p['wo'].reshape(L, N_HEADS, HEAD_DIM, HIDDEN)), 'bo': p['bo'],
        'ln1_g': p['ln1_g'], 'ln1_b': p['ln1_b'],
        'w1': bf(p['w1']), 'b1': p['b1'],
        'w2': bf(p['w2']), 'b2': p['b2'],
        'ln2_g': p['ln2_g'], 'ln2_b': p['ln2_b'],
        'proj_w': bf(p['proj_w']), 'proj_b': p['proj_b'],
        'proj_ln_g': p['proj_ln_g'], 'proj_ln_b': p['proj_ln_b'],
        'pool_w': bf(p['pool_w']), 'pool_b': p['pool_b'],
        'stop_w': bf(stop_w), 'stop_b': stop_b,
    }


# ---------------- pure-JAX f32 reference (for a loose numerical sanity check)

def reference_encode(p, ids, mask):
    R, S = ids.shape
    emb = p['word_emb'][ids] + p['pos_emb'][:S][None]
    x = _layernorm(emb, p['emb_ln_g'], p['emb_ln_b'])
    bias = (1.0 - mask)[:, None, None, :] * (-1e9)
    for l in range(N_LAYERS):
        qkv = x @ p['wqkv'][l] + p['bqkv'][l]
        q, k, v = qkv[..., :HIDDEN], qkv[..., HIDDEN:2 * HIDDEN], qkv[..., 2 * HIDDEN:]

        def sh(t):
            return t.reshape(R, S, N_HEADS, HEAD_DIM).transpose(0, 2, 1, 3)

        qh, kh, vh = sh(q), sh(k), sh(v)
        s = jnp.einsum('rhqd,rhkd->rhqk', qh, kh) / (HEAD_DIM ** 0.5) + bias
        pa = jax.nn.softmax(s, axis=-1)
        ctx = jnp.einsum('rhqk,rhkd->rhqd', pa, vh).transpose(0, 2, 1, 3).reshape(R, S, HIDDEN)
        attn = ctx @ p['wo'][l] + p['bo'][l]
        h1 = _layernorm(x + attn, p['ln1_g'][l], p['ln1_b'][l])
        f = jax.nn.gelu(h1 @ p['w1'][l] + p['b1'][l], approximate=True)
        f = f @ p['w2'][l] + p['b2'][l]
        x = _layernorm(h1 + f, p['ln2_g'][l], p['ln2_b'][l])
    cls = x[:, 0, :]
    vec = _layernorm(cls @ p['proj_w'] + p['proj_b'], p['proj_ln_g'], p['proj_ln_b'])
    pooled = jnp.tanh(cls @ p['pool_w'] + p['pool_b'])
    stop = pooled @ p['stop_w'] + p['stop_b']
    return vec, stop


if __name__ == "__main__":
    root = jax.random.PRNGKey(0)
    pk, dk, qk = jax.random.split(root, 3)

    raw_q = init_params(pk)
    # In __init__ param_k is copied from param_q (init_retriever == ''), so the
    # key encoder shares identical parameter values.
    raw_k = jax.tree_util.tree_map(lambda x: x, raw_q)
    prep_q = prepare_params(raw_q)
    prep_k = prepare_params(raw_k)

    # MoCo queue buffers (registered buffers; unused in the forward pass)
    K_QUEUE = 8
    queue = jax.random.normal(qk, (K_QUEUE, HIDDEN), jnp.float32)
    queue_ptr = jnp.zeros((1,), jnp.int32)

    B, S = 2, 8
    MAX_HOPS = 2
    N_NEG = 2
    ikeys = jax.random.split(dk, 16)

    def make_ids(k):
        return jax.random.randint(k, (B, S), 0, VOCAB, dtype=jnp.int32)

    batch = {
        'q_input_ids': [make_ids(ikeys[i]) for i in range(MAX_HOPS)],
        'q_mask': [jnp.ones((B, S), jnp.float32) for _ in range(MAX_HOPS)],
        'c_input_ids': [make_ids(ikeys[4 + i]) for i in range(MAX_HOPS)],
        'c_mask': [jnp.ones((B, S), jnp.float32) for _ in range(MAX_HOPS)],
        'neg_input_ids': [make_ids(ikeys[8 + i]) for i in range(N_NEG)],
        'neg_mask': [jnp.ones((B, S), jnp.float32) for _ in range(N_NEG)],
        'act_hops': jnp.full((B, 1), MAX_HOPS, jnp.int32),
    }
    # give one query a padded tail to exercise attention masking
    batch['q_mask'][1] = batch['q_mask'][1].at[:, 6:].set(0.0)

    vectors = momentum_retriever_forward(prep_q, prep_k, batch, eval_stop=True)
    jax.tree_util.tree_map(jax.block_until_ready, vectors)

    # structural checks
    assert len(vectors['q']) == MAX_HOPS and vectors['q'][0].shape == (B, HIDDEN)
    assert len(vectors['c']) == MAX_HOPS and vectors['c'][0].shape == (B, HIDDEN)
    assert len(vectors['neg']) == N_NEG and vectors['neg'][0].shape == (B, HIDDEN)
    assert len(vectors['stop_logits']) == MAX_HOPS - 1
    assert vectors['stop_logits'][0].shape == (B, 2)
    assert vectors['act_hops'].shape == (B, 1)

    # numerical sanity check vs. pure-JAX f32 reference (loose tolerance:
    # bf16 MXU operands + approximate-reciprocal softmax in the kernel)
    q_ids_all = jnp.concatenate(list(batch['q_input_ids']), axis=0)
    q_mask_all = jnp.concatenate(list(batch['q_mask']), axis=0)
    ref_vec, ref_stop = reference_encode(raw_q, q_ids_all, q_mask_all)
    got_vec = jnp.concatenate(vectors['q'], axis=0)
    assert jnp.allclose(got_vec, ref_vec, atol=1e-1), \
        float(jnp.max(jnp.abs(got_vec - ref_vec)))
    assert jnp.allclose(vectors['stop_logits'][0], ref_stop[B:2 * B], atol=1e-1), \
        float(jnp.max(jnp.abs(vectors['stop_logits'][0] - ref_stop[B:2 * B])))

    print("KERNEL_OK")
</pallas_src>

<mosaic_0001>
module attributes {stable_mosaic.version = 11 : i64} {
  func.func @retriever_kernel(%arg0: memref<4x8xi32, #tpu.memory_space<vmem>>, %arg1: memref<4x8xf32, #tpu.memory_space<vmem>>, %arg2: memref<64x32xf32, #tpu.memory_space<vmem>>, %arg3: memref<8x32xf32, #tpu.memory_space<vmem>>, %arg4: memref<1x32xf32, #tpu.memory_space<vmem>>, %arg5: memref<1x32xf32, #tpu.memory_space<vmem>>, %arg6: memref<2x4x32x8xbf16, #tpu.memory_space<vmem>>, %arg7: memref<2x4x32x8xbf16, #tpu.memory_space<vmem>>, %arg8: memref<2x4x32x8xbf16, #tpu.memory_space<vmem>>, %arg9: memref<2x4x1x8xf32, #tpu.memory_space<vmem>>, %arg10: memref<2x4x1x8xf32, #tpu.memory_space<vmem>>, %arg11: memref<2x4x1x8xf32, #tpu.memory_space<vmem>>, %arg12: memref<2x4x8x32xbf16, #tpu.memory_space<vmem>>, %arg13: memref<2x1x32xf32, #tpu.memory_space<vmem>>, %arg14: memref<2x1x32xf32, #tpu.memory_space<vmem>>, %arg15: memref<2x1x32xf32, #tpu.memory_space<vmem>>, %arg16: memref<2x32x128xbf16, #tpu.memory_space<vmem>>, %arg17: memref<2x1x128xf32, #tpu.memory_space<vmem>>, %arg18: memref<2x128x32xbf16, #tpu.memory_space<vmem>>, %arg19: memref<2x1x32xf32, #tpu.memory_space<vmem>>, %arg20: memref<2x1x32xf32, #tpu.memory_space<vmem>>, %arg21: memref<2x1x32xf32, #tpu.memory_space<vmem>>, %arg22: memref<32x32xbf16, #tpu.memory_space<vmem>>, %arg23: memref<1x32xf32, #tpu.memory_space<vmem>>, %arg24: memref<1x32xf32, #tpu.memory_space<vmem>>, %arg25: memref<1x32xf32, #tpu.memory_space<vmem>>, %arg26: memref<32x32xbf16, #tpu.memory_space<vmem>>, %arg27: memref<1x32xf32, #tpu.memory_space<vmem>>, %arg28: memref<32x96xbf16, #tpu.memory_space<vmem>>, %arg29: memref<1x96xf32, #tpu.memory_space<vmem>>, %arg30: memref<4x128xf32, #tpu.memory_space<vmem>>) attributes {dimension_semantics = [], scalar_prefetch = 0 : i64, scratch_operands = 0 : i64, tpu.core_type = #tpu.core_type<tc>} {
    %c0 = arith.constant 0 : index
    %c0_0 = arith.constant 0 : index
    %0 = vector.load %arg0[%c0, %c0_0] : memref<4x8xi32, #tpu.memory_space<vmem>>, vector<4x8xi32>
    %1 = tpu.iota {dimensions = array<i32: 2>} : vector<4x8x64xi32>
    %2 = vector.shape_cast %0 : vector<4x8xi32> to vector<4x8x1xi32>
    %3 = vector.broadcast %2 : vector<4x8x1xi32> to vector<4x8x64xi32>
    %4 = arith.cmpi eq, %3, %1 : vector<4x8x64xi32>
    %5 = arith.extui %4 : vector<4x8x64xi1> to vector<4x8x64xi32>
    %6 = arith.sitofp %5 : vector<4x8x64xi32> to vector<4x8x64xf32>
    %7 = vector.shape_cast %6 : vector<4x8x64xf32> to vector<32x64xf32>
    %c0_1 = arith.constant 0 : index
    %c0_2 = arith.constant 0 : index
    %8 = vector.load %arg2[%c0_1, %c0_2] : memref<64x32xf32, #tpu.memory_space<vmem>>, vector<64x32xf32>
    %cst = arith.constant dense<0.000000e+00> : vector<32x32xf32>
    %9 = tpu.matmul %7, %8, %cst {dimension_numbers = #tpu.dot_dimension_numbers<[1], [0], [0], [1], [0, 0, 1, 1], [], []>} : vector<32x64xf32>, vector<64x32xf32>, vector<32x32xf32> -> vector<32x32xf32>
    %10 = vector.shape_cast %9 : vector<32x32xf32> to vector<4x8x32xf32>
    %c0_3 = arith.constant 0 : index
    %c0_4 = arith.constant 0 : index
    %11 = vector.load %arg3[%c0_3, %c0_4] : memref<8x32xf32, #tpu.memory_space<vmem>>, vector<8x32xf32>
    %12 = vector.shape_cast %11 : vector<8x32xf32> to vector<1x8x32xf32>
    %13 = vector.broadcast %12 : vector<1x8x32xf32> to vector<4x8x32xf32>
    %14 = arith.addf %10, %13 : vector<4x8x32xf32>
    %c0_5 = arith.constant 0 : index
    %c0_6 = arith.constant 0 : index
    %15 = vector.load %arg4[%c0_5, %c0_6] : memref<1x32xf32, #tpu.memory_space<vmem>>, vector<1x32xf32>
    %c0_7 = arith.constant 0 : index
    %c0_8 = arith.constant 0 : index
    %16 = vector.load %arg5[%c0_7, %c0_8] : memref<1x32xf32, #tpu.memory_space<vmem>>, vector<1x32xf32>
    %cst_9 = arith.constant dense<0.000000e+00> : vector<4x8xf32>
    %17 = vector.multi_reduction <add>, %14, %cst_9 [2] : vector<4x8x32xf32> to vector<4x8xf32>
    %18 = vector.shape_cast %17 : vector<4x8xf32> to vector<4x8x1xf32>
    %cst_10 = arith.constant 3.200000e+01 : f32
    %19 = vector.broadcast %cst_10 : f32 to vector<4x8x1xf32>
    %20 = arith.divf %18, %19 : vector<4x8x1xf32>
    %21 = vector.broadcast %20 : vector<4x8x1xf32> to vector<4x8x32xf32>
    %22 = arith.subf %14, %21 : vector<4x8x32xf32>
    %23 = arith.mulf %22, %22 : vector<4x8x32xf32>
    %cst_11 = arith.constant dense<0.000000e+00> : vector<4x8xf32>
    %24 = vector.multi_reduction <add>, %23, %cst_11 [2] : vector<4x8x32xf32> to vector<4x8xf32>
    %25 = vector.shape_cast %24 : vector<4x8xf32> to vector<4x8x1xf32>
    %cst_12 = arith.constant 3.200000e+01 : f32
    %26 = vector.broadcast %cst_12 : f32 to vector<4x8x1xf32>
    %27 = arith.divf %25, %26 : vector<4x8x1xf32>
    %28 = vector.broadcast %20 : vector<4x8x1xf32> to vector<4x8x32xf32>
    %29 = arith.subf %14, %28 : vector<4x8x32xf32>
    %cst_13 = arith.constant 9.99999974E-6 : f32
    %30 = vector.broadcast %cst_13 : f32 to vector<4x8x1xf32>
    %31 = arith.addf %27, %30 : vector<4x8x1xf32>
    %32 = math.rsqrt %31 : vector<4x8x1xf32>
    %33 = vector.broadcast %32 : vector<4x8x1xf32> to vector<4x8x32xf32>
    %34 = arith.mulf %29, %33 : vector<4x8x32xf32>
    %35 = vector.shape_cast %15 : vector<1x32xf32> to vector<1x1x32xf32>
    %36 = vector.broadcast %35 : vector<1x1x32xf32> to vector<4x8x32xf32>
    %37 = arith.mulf %34, %36 : vector<4x8x32xf32>
    %38 = vector.shape_cast %16 : vector<1x32xf32> to vector<1x1x32xf32>
    %39 = vector.broadcast %38 : vector<1x1x32xf32> to vector<4x8x32xf32>
    %40 = arith.addf %37, %39 : vector<4x8x32xf32>
    %41 = vector.shape_cast %40 : vector<4x8x32xf32> to vector<32x32xf32>
    %c0_14 = arith.constant 0 : index
    %c0_15 = arith.constant 0 : index
    %42 = vector.load %arg1[%c0_14, %c0_15] : memref<4x8xf32, #tpu.memory_space<vmem>>, vector<4x8xf32>
    %cst_16 = arith.constant 1.000000e+00 : f32
    %43 = vector.broadcast %cst_16 : f32 to vector<4x8xf32>
    %44 = arith.subf %43, %42 : vector<4x8xf32>
    %45 = vector.shape_cast %44 : vector<4x8xf32> to vector<4x1x8xf32>
    %cst_17 = arith.constant -1.000000e+09 : f32
    %46 = vector.broadcast %cst_17 : f32 to vector<4x1x8xf32>
    %47 = arith.mulf %45, %46 : vector<4x1x8xf32>
    %48 = arith.truncf %41 : vector<32x32xf32> to vector<32x32xbf16>
    %cst_18 = arith.constant 0.000000e+00 : f32
    %49 = vector.broadcast %cst_18 : f32 to vector<32x32xf32>
    %c0_19 = arith.constant 0 : index
    %c0_20 = arith.constant 0 : index
    %c0_21 = arith.constant 0 : index
    %c0_22 = arith.constant 0 : index
    %50 = vector.load %arg6[%c0_19, %c0_20, %c0_21, %c0_22] : memref<2x4x32x8xbf16, #tpu.memory_space<vmem>>, vector<1x1x32x8xbf16>
    %51 = vector.shape_cast %50 : vector<1x1x32x8xbf16> to vector<32x8xbf16>
    %cst_23 = arith.constant dense<0.000000e+00> : vector<32x8xf32>
    %52 = tpu.matmul %48, %51, %cst_23 {dimension_numbers = #tpu.dot_dimension_numbers<[1], [0], [0], [1], [0, 0, 1, 1], [], []>} : vector<32x32xbf16>, vector<32x8xbf16>, vector<32x8xf32> -> vector<32x8xf32>
    %c0_24 = arith.constant 0 : index
    %c0_25 = arith.constant 0 : index
    %c0_26 = arith.constant 0 : index
    %c0_27 = arith.constant 0 : index
    %53 = vector.load %arg9[%c0_24, %c0_25, %c0_26, %c0_27] : memref<2x4x1x8xf32, #tpu.memory_space<vmem>>, vector<1x1x1x8xf32>
    %54 = vector.shape_cast %53 : vector<1x1x1x8xf32> to vector<1x8xf32>
    %55 = vector.broadcast %54 : vector<1x8xf32> to vector<32x8xf32>
    %56 = arith.addf %52, %55 : vector<32x8xf32>
    %c0_28 = arith.constant 0 : index
    %c0_29 = arith.constant 0 : index
    %c0_30 = arith.constant 0 : index
    %c0_31 = arith.constant 0 : index
    %57 = vector.load %arg7[%c0_28, %c0_29, %c0_30, %c0_31] : memref<2x4x32x8xbf16, #tpu.memory_space<vmem>>, vector<1x1x32x8xbf16>
    %58 = vector.shape_cast %57 : vector<1x1x32x8xbf16> to vector<32x8xbf16>
    %cst_32 = arith.constant dense<0.000000e+00> : vector<32x8xf32>
    %59 = tpu.matmul %48, %58, %cst_32 {dimension_numbers = #tpu.dot_dimension_numbers<[1], [0], [0], [1], [0, 0, 1, 1], [], []>} : vector<32x32xbf16>, vector<32x8xbf16>, vector<32x8xf32> -> vector<32x8xf32>
    %c0_33 = arith.constant 0 : index
    %c0_34 = arith.constant 0 : index
    %c0_35 = arith.constant 0 : index
    %c0_36 = arith.constant 0 : index
    %60 = vector.load %arg10[%c0_33, %c0_34, %c0_35, %c0_36] : memref<2x4x1x8xf32, #tpu.memory_space<vmem>>, vector<1x1x1x8xf32>
    %61 = vector.shape_cast %60 : vector<1x1x1x8xf32> to vector<1x8xf32>
    %62 = vector.broadcast %61 : vector<1x8xf32> to vector<32x8xf32>
    %63 = arith.addf %59, %62 : vector<32x8xf32>
    %c0_37 = arith.constant 0 : index
    %c0_38 = arith.constant 0 : index
    %c0_39 = arith.constant 0 : index
    %c0_40 = arith.constant 0 : index
    %64 = vector.load %arg8[%c0_37, %c0_38, %c0_39, %c0_40] : memref<2x4x32x8xbf16, #tpu.memory_space<vmem>>, vector<1x1x32x8xbf16>
    %65 = vector.shape_cast %64 : vector<1x1x32x8xbf16> to vector<32x8xbf16>
    %cst_41 = arith.constant dense<0.000000e+00> : vector<32x8xf32>
    %66 = tpu.matmul %48, %65, %cst_41 {dimension_numbers = #tpu.dot_dimension_numbers<[1], [0], [0], [1], [0, 0, 1, 1], [], []>} : vector<32x32xbf16>, vector<32x8xbf16>, vector<32x8xf32> -> vector<32x8xf32>
    %c0_42 = arith.constant 0 : index
    %c0_43 = arith.constant 0 : index
    %c0_44 = arith.constant 0 : index
    %c0_45 = arith.constant 0 : index
    %67 = vector.load %arg11[%c0_42, %c0_43, %c0_44, %c0_45] : memref<2x4x1x8xf32, #tpu.memory_space<vmem>>, vector<1x1x1x8xf32>
    %68 = vector.shape_cast %67 : vector<1x1x1x8xf32> to vector<1x8xf32>
    %69 = vector.broadcast %68 : vector<1x8xf32> to vector<32x8xf32>
    %70 = arith.addf %66, %69 : vector<32x8xf32>
    %71 = vector.shape_cast %56 : vector<32x8xf32> to vector<4x8x8xf32>
    %72 = vector.shape_cast %63 : vector<32x8xf32> to vector<4x8x8xf32>
    %73 = vector.shape_cast %70 : vector<32x8xf32> to vector<4x8x8xf32>
    %74 = arith.truncf %71 : vector<4x8x8xf32> to vector<4x8x8xbf16>
    %75 = arith.truncf %72 : vector<4x8x8xf32> to vector<4x8x8xbf16>
    "tpu.trace_start"() <{level = 10 : i32, message = "bqd,bkd->bqk"}> : () -> ()
    %cst_46 = arith.constant dense<0.000000e+00> : vector<4x8x8xf32>
    %76 = tpu.matmul %74, %75, %cst_46 {dimension_numbers = #tpu.dot_dimension_numbers<[2], [2], [1], [1], [0, 0, 0, 1, 1, 1], [0], [0]>} : vector<4x8x8xbf16>, vector<4x8x8xbf16>, vector<4x8x8xf32> -> vector<4x8x8xf32>
    "tpu.trace_stop"() : () -> ()
    %cst_47 = arith.constant 0.353553385 : f32
    %77 = vector.broadcast %cst_47 : f32 to vector<4x8x8xf32>
    %78 = arith.mulf %76, %77 : vector<4x8x8xf32>
    %79 = vector.broadcast %47 : vector<4x1x8xf32> to vector<4x8x8xf32>
    %80 = arith.addf %78, %79 : vector<4x8x8xf32>
    %cst_48 = arith.constant dense<0xFF800000> : vector<4x8xf32>
    %81 = vector.multi_reduction <maximumf>, %80, %cst_48 [2] : vector<4x8x8xf32> to vector<4x8xf32>
    %82 = vector.shape_cast %81 : vector<4x8xf32> to vector<4x8x1xf32>
    %83 = vector.broadcast %82 : vector<4x8x1xf32> to vector<4x8x8xf32>
    %84 = arith.subf %80, %83 : vector<4x8x8xf32>
    %85 = math.exp %84 : vector<4x8x8xf32>
    %cst_49 = arith.constant dense<0.000000e+00> : vector<4x8xf32>
    %86 = vector.multi_reduction <add>, %85, %cst_49 [2] : vector<4x8x8xf32> to vector<4x8xf32>
    %87 = vector.shape_cast %86 : vector<4x8xf32> to vector<4x8x1xf32>
    %88 = tpu.reciprocal %87 {approx = true} : vector<4x8x1xf32> -> vector<4x8x1xf32>
    %89 = vector.broadcast %88 : vector<4x8x1xf32> to vector<4x8x8xf32>
    %90 = arith.mulf %85, %89 : vector<4x8x8xf32>
    %91 = arith.truncf %90 : vector<4x8x8xf32> to vector<4x8x8xbf16>
    %92 = arith.truncf %73 : vector<4x8x8xf32> to vector<4x8x8xbf16>
    "tpu.trace_start"() <{level = 10 : i32, message = "bqk,bkd->bqd"}> : () -> ()
    %cst_50 = arith.constant dense<0.000000e+00> : vector<4x8x8xf32>
    %93 = tpu.matmul %91, %92, %cst_50 {dimension_numbers = #tpu.dot_dimension_numbers<[2], [1], [1], [2], [0, 0, 0, 1, 1, 2], [0], [0]>} : vector<4x8x8xbf16>, vector<4x8x8xbf16>, vector<4x8x8xf32> -> vector<4x8x8xf32>
    "tpu.trace_stop"() : () -> ()
    %94 = vector.shape_cast %93 : vector<4x8x8xf32> to vector<32x8xf32>
    %95 = arith.truncf %94 : vector<32x8xf32> to vector<32x8xbf16>
    %c0_51 = arith.constant 0 : index
    %c0_52 = arith.constant 0 : index
    %c0_53 = arith.constant 0 : index
    %c0_54 = arith.constant 0 : index
    %96 = vector.load %arg12[%c0_51, %c0_52, %c0_53, %c0_54] : memref<2x4x8x32xbf16, #tpu.memory_space<vmem>>, vector<1x1x8x32xbf16>
    %97 = vector.shape_cast %96 : vector<1x1x8x32xbf16> to vector<8x32xbf16>
    %cst_55 = arith.constant dense<0.000000e+00> : vector<32x32xf32>
    %98 = tpu.matmul %95, %97, %cst_55 {dimension_numbers = #tpu.dot_dimension_numbers<[1], [0], [0], [1], [0, 0, 1, 1], [], []>} : vector<32x8xbf16>, vector<8x32xbf16>, vector<32x32xf32> -> vector<32x32xf32>
    %99 = arith.addf %49, %98 : vector<32x32xf32>
    %c0_56 = arith.constant 0 : index
    %c1 = arith.constant 1 : index
    %c0_57 = arith.constant 0 : index
    %c0_58 = arith.constant 0 : index
    %100 = vector.load %arg6[%c0_56, %c1, %c0_57, %c0_58] : memref<2x4x32x8xbf16, #tpu.memory_space<vmem>>, vector<1x1x32x8xbf16>
    %101 = vector.shape_cast %100 : vector<1x1x32x8xbf16> to vector<32x8xbf16>
    %cst_59 = arith.constant dense<0.000000e+00> : vector<32x8xf32>
    %102 = tpu.matmul %48, %101, %cst_59 {dimension_numbers = #tpu.dot_dimension_numbers<[1], [0], [0], [1], [0, 0, 1, 1], [], []>} : vector<32x32xbf16>, vector<32x8xbf16>, vector<32x8xf32> -> vector<32x8xf32>
    %c0_60 = arith.constant 0 : index
    %c1_61 = arith.constant 1 : index
    %c0_62 = arith.constant 0 : index
    %c0_63 = arith.constant 0 : index
    %103 = vector.load %arg9[%c0_60, %c1_61, %c0_62, %c0_63] : memref<2x4x1x8xf32, #tpu.memory_space<vmem>>, vector<1x1x1x8xf32>
    %104 = vector.shape_cast %103 : vector<1x1x1x8xf32> to vector<1x8xf32>
    %105 = vector.broadcast %104 : vector<1x8xf32> to vector<32x8xf32>
    %106 = arith.addf %102, %105 : vector<32x8xf32>
    %c0_64 = arith.constant 0 : index
    %c1_65 = arith.constant 1 : index
    %c0_66 = arith.constant 0 : index
    %c0_67 = arith.constant 0 : index
    %107 = vector.load %arg7[%c0_64, %c1_65, %c0_66, %c0_67] : memref<2x4x32x8xbf16, #tpu.memory_space<vmem>>, vector<1x1x32x8xbf16>
    %108 = vector.shape_cast %107 : vector<1x1x32x8xbf16> to vector<32x8xbf16>
    %cst_68 = arith.constant dense<0.000000e+00> : vector<32x8xf32>
    %109 = tpu.matmul %48, %108, %cst_68 {dimension_numbers = #tpu.dot_dimension_numbers<[1], [0], [0], [1], [0, 0, 1, 1], [], []>} : vector<32x32xbf16>, vector<32x8xbf16>, vector<32x8xf32> -> vector<32x8xf32>
    %c0_69 = arith.constant 0 : index
    %c1_70 = arith.constant 1 : index
    %c0_71 = arith.constant 0 : index
    %c0_72 = arith.constant 0 : index
    %110 = vector.load %arg10[%c0_69, %c1_70, %c0_71, %c0_72] : memref<2x4x1x8xf32, #tpu.memory_space<vmem>>, vector<1x1x1x8xf32>
    %111 = vector.shape_cast %110 : vector<1x1x1x8xf32> to vector<1x8xf32>
    %112 = vector.broadcast %111 : vector<1x8xf32> to vector<32x8xf32>
    %113 = arith.addf %109, %112 : vector<32x8xf32>
    %c0_73 = arith.constant 0 : index
    %c1_74 = arith.constant 1 : index
    %c0_75 = arith.constant 0 : index
    %c0_76 = arith.constant 0 : index
    %114 = vector.load %arg8[%c0_73, %c1_74, %c0_75, %c0_76] : memref<2x4x32x8xbf16, #tpu.memory_space<vmem>>, vector<1x1x32x8xbf16>
    %115 = vector.shape_cast %114 : vector<1x1x32x8xbf16> to vector<32x8xbf16>
    %cst_77 = arith.constant dense<0.000000e+00> : vector<32x8xf32>
    %116 = tpu.matmul %48, %115, %cst_77 {dimension_numbers = #tpu.dot_dimension_numbers<[1], [0], [0], [1], [0, 0, 1, 1], [], []>} : vector<32x32xbf16>, vector<32x8xbf16>, vector<32x8xf32> -> vector<32x8xf32>
    %c0_78 = arith.constant 0 : index
    %c1_79 = arith.constant 1 : index
    %c0_80 = arith.constant 0 : index
    %c0_81 = arith.constant 0 : index
    %117 = vector.load %arg11[%c0_78, %c1_79, %c0_80, %c0_81] : memref<2x4x1x8xf32, #tpu.memory_space<vmem>>, vector<1x1x1x8xf32>
    %118 = vector.shape_cast %117 : vector<1x1x1x8xf32> to vector<1x8xf32>
    %119 = vector.broadcast %118 : vector<1x8xf32> to vector<32x8xf32>
    %120 = arith.addf %116, %119 : vector<32x8xf32>
    %121 = vector.shape_cast %106 : vector<32x8xf32> to vector<4x8x8xf32>
    %122 = vector.shape_cast %113 : vector<32x8xf32> to vector<4x8x8xf32>
    %123 = vector.shape_cast %120 : vector<32x8xf32> to vector<4x8x8xf32>
    %124 = arith.truncf %121 : vector<4x8x8xf32> to vector<4x8x8xbf16>
    %125 = arith.truncf %122 : vector<4x8x8xf32> to vector<4x8x8xbf16>
    "tpu.trace_start"() <{level = 10 : i32, message = "bqd,bkd->bqk"}> : () -> ()
    %cst_82 = arith.constant dense<0.000000e+00> : vector<4x8x8xf32>
    %126 = tpu.matmul %124, %125, %cst_82 {dimension_numbers = #tpu.dot_dimension_numbers<[2], [2], [1], [1], [0, 0, 0, 1, 1, 1], [0], [0]>} : vector<4x8x8xbf16>, vector<4x8x8xbf16>, vector<4x8x8xf32> -> vector<4x8x8xf32>
    "tpu.trace_stop"() : () -> ()
    %cst_83 = arith.constant 0.353553385 : f32
    %127 = vector.broadcast %cst_83 : f32 to vector<4x8x8xf32>
    %128 = arith.mulf %126, %127 : vector<4x8x8xf32>
    %129 = vector.broadcast %47 : vector<4x1x8xf32> to vector<4x8x8xf32>
    %130 = arith.addf %128, %129 : vector<4x8x8xf32>
    %cst_84 = arith.constant dense<0xFF800000> : vector<4x8xf32>
    %131 = vector.multi_reduction <maximumf>, %130, %cst_84 [2] : vector<4x8x8xf32> to vector<4x8xf32>
    %132 = vector.shape_cast %131 : vector<4x8xf32> to vector<4x8x1xf32>
    %133 = vector.broadcast %132 : vector<4x8x1xf32> to vector<4x8x8xf32>
    %134 = arith.subf %130, %133 : vector<4x8x8xf32>
    %135 = math.exp %134 : vector<4x8x8xf32>
    %cst_85 = arith.constant dense<0.000000e+00> : vector<4x8xf32>
    %136 = vector.multi_reduction <add>, %135, %cst_85 [2] : vector<4x8x8xf32> to vector<4x8xf32>
    %137 = vector.shape_cast %136 : vector<4x8xf32> to vector<4x8x1xf32>
    %138 = tpu.reciprocal %137 {approx = true} : vector<4x8x1xf32> -> vector<4x8x1xf32>
    %139 = vector.broadcast %138 : vector<4x8x1xf32> to vector<4x8x8xf32>
    %140 = arith.mulf %135, %139 : vector<4x8x8xf32>
    %141 = arith.truncf %140 : vector<4x8x8xf32> to vector<4x8x8xbf16>
    %142 = arith.truncf %123 : vector<4x8x8xf32> to vector<4x8x8xbf16>
    "tpu.trace_start"() <{level = 10 : i32, message = "bqk,bkd->bqd"}> : () -> ()
    %cst_86 = arith.constant dense<0.000000e+00> : vector<4x8x8xf32>
    %143 = tpu.matmul %141, %142, %cst_86 {dimension_numbers = #tpu.dot_dimension_numbers<[2], [1], [1], [2], [0, 0, 0, 1, 1, 2], [0], [0]>} : vector<4x8x8xbf16>, vector<4x8x8xbf16>, vector<4x8x8xf32> -> vector<4x8x8xf32>
    "tpu.trace_stop"() : () -> ()
    %144 = vector.shape_cast %143 : vector<4x8x8xf32> to vector<32x8xf32>
    %145 = arith.truncf %144 : vector<32x8xf32> to vector<32x8xbf16>
    %c0_87 = arith.constant 0 : index
    %c1_88 = arith.constant 1 : index
    %c0_89 = arith.constant 0 : index
    %c0_90 = arith.constant 0 : index
    %146 = vector.load %arg12[%c0_87, %c1_88, %c0_89, %c0_90] : memref<2x4x8x32xbf16, #tpu.memory_space<vmem>>, vector<1x1x8x32xbf16>
    %147 = vector.shape_cast %146 : vector<1x1x8x32xbf16> to vector<8x32xbf16>
    %cst_91 = arith.constant dense<0.000000e+00> : vector<32x32xf32>
    %148 = tpu.matmul %145, %147, %cst_91 {dimension_numbers = #tpu.dot_dimension_numbers<[1], [0], [0], [1], [0, 0, 1, 1], [], []>} : vector<32x8xbf16>, vector<8x32xbf16>, vector<32x32xf32> -> vector<32x32xf32>
    %149 = arith.addf %99, %148 : vector<32x32xf32>
    %c0_92 = arith.constant 0 : index
    %c2 = arith.constant 2 : index
    %c0_93 = arith.constant 0 : index
    %c0_94 = arith.constant 0 : index
    %150 = vector.load %arg6[%c0_92, %c2, %c0_93, %c0_94] : memref<2x4x32x8xbf16, #tpu.memory_space<vmem>>, vector<1x1x32x8xbf16>
    %151 = vector.shape_cast %150 : vector<1x1x32x8xbf16> to vector<32x8xbf16>
    %cst_95 = arith.constant dense<0.000000e+00> : vector<32x8xf32>
    %152 = tpu.matmul %48, %151, %cst_95 {dimension_numbers = #tpu.dot_dimension_numbers<[1], [0], [0], [1], [0, 0, 1, 1], [], []>} : vector<32x32xbf16>, vector<32x8xbf16>, vector<32x8xf32> -> vector<32x8xf32>
    %c0_96 = arith.constant 0 : index
    %c2_97 = arith.constant 2 : index
    %c0_98 = arith.constant 0 : index
    %c0_99 = arith.constant 0 : index
    %153 = vector.load %arg9[%c0_96, %c2_97, %c0_98, %c0_99] : memref<2x4x1x8xf32, #tpu.memory_space<vmem>>, vector<1x1x1x8xf32>
    %154 = vector.shape_cast %153 : vector<1x1x1x8xf32> to vector<1x8xf32>
    %155 = vector.broadcast %154 : vector<1x8xf32> to vector<32x8xf32>
    %156 = arith.addf %152, %155 : vector<32x8xf32>
    %c0_100 = arith.constant 0 : index
    %c2_101 = arith.constant 2 : index
    %c0_102 = arith.constant 0 : index
    %c0_103 = arith.constant 0 : index
    %157 = vector.load %arg7[%c0_100, %c2_101, %c0_102, %c0_103] : memref<2x4x32x8xbf16, #tpu.memory_space<vmem>>, vector<1x1x32x8xbf16>
    %158 = vector.shape_cast %157 : vector<1x1x32x8xbf16> to vector<32x8xbf16>
    %cst_104 = arith.constant dense<0.000000e+00> : vector<32x8xf32>
    %159 = tpu.matmul %48, %158, %cst_104 {dimension_numbers = #tpu.dot_dimension_numbers<[1], [0], [0], [1], [0, 0, 1, 1], [], []>} : vector<32x32xbf16>, vector<32x8xbf16>, vector<32x8xf32> -> vector<32x8xf32>
    %c0_105 = arith.constant 0 : index
    %c2_106 = arith.constant 2 : index
    %c0_107 = arith.constant 0 : index
    %c0_108 = arith.constant 0 : index
    %160 = vector.load %arg10[%c0_105, %c2_106, %c0_107, %c0_108] : memref<2x4x1x8xf32, #tpu.memory_space<vmem>>, vector<1x1x1x8xf32>
    %161 = vector.shape_cast %160 : vector<1x1x1x8xf32> to vector<1x8xf32>
    %162 = vector.broadcast %161 : vector<1x8xf32> to vector<32x8xf32>
    %163 = arith.addf %159, %162 : vector<32x8xf32>
    %c0_109 = arith.constant 0 : index
    %c2_110 = arith.constant 2 : index
    %c0_111 = arith.constant 0 : index
    %c0_112 = arith.constant 0 : index
    %164 = vector.load %arg8[%c0_109, %c2_110, %c0_111, %c0_112] : memref<2x4x32x8xbf16, #tpu.memory_space<vmem>>, vector<1x1x32x8xbf16>
    %165 = vector.shape_cast %164 : vector<1x1x32x8xbf16> to vector<32x8xbf16>
    %cst_113 = arith.constant dense<0.000000e+00> : vector<32x8xf32>
    %166 = tpu.matmul %48, %165, %cst_113 {dimension_numbers = #tpu.dot_dimension_numbers<[1], [0], [0], [1], [0, 0, 1, 1], [], []>} : vector<32x32xbf16>, vector<32x8xbf16>, vector<32x8xf32> -> vector<32x8xf32>
    %c0_114 = arith.constant 0 : index
    %c2_115 = arith.constant 2 : index
    %c0_116 = arith.constant 0 : index
    %c0_117 = arith.constant 0 : index
    %167 = vector.load %arg11[%c0_114, %c2_115, %c0_116, %c0_117] : memref<2x4x1x8xf32, #tpu.memory_space<vmem>>, vector<1x1x1x8xf32>
    %168 = vector.shape_cast %167 : vector<1x1x1x8xf32> to vector<1x8xf32>
    %169 = vector.broadcast %168 : vector<1x8xf32> to vector<32x8xf32>
    %170 = arith.addf %166, %169 : vector<32x8xf32>
    %171 = vector.shape_cast %156 : vector<32x8xf32> to vector<4x8x8xf32>
    %172 = vector.shape_cast %163 : vector<32x8xf32> to vector<4x8x8xf32>
    %173 = vector.shape_cast %170 : vector<32x8xf32> to vector<4x8x8xf32>
    %174 = arith.truncf %171 : vector<4x8x8xf32> to vector<4x8x8xbf16>
    %175 = arith.truncf %172 : vector<4x8x8xf32> to vector<4x8x8xbf16>
    "tpu.trace_start"() <{level = 10 : i32, message = "bqd,bkd->bqk"}> : () -> ()
    %cst_118 = arith.constant dense<0.000000e+00> : vector<4x8x8xf32>
    %176 = tpu.matmul %174, %175, %cst_118 {dimension_numbers = #tpu.dot_dimension_numbers<[2], [2], [1], [1], [0, 0, 0, 1, 1, 1], [0], [0]>} : vector<4x8x8xbf16>, vector<4x8x8xbf16>, vector<4x8x8xf32> -> vector<4x8x8xf32>
    "tpu.trace_stop"() : () -> ()
    %cst_119 = arith.constant 0.353553385 : f32
    %177 = vector.broadcast %cst_119 : f32 to vector<4x8x8xf32>
    %178 = arith.mulf %176, %177 : vector<4x8x8xf32>
    %179 = vector.broadcast %47 : vector<4x1x8xf32> to vector<4x8x8xf32>
    %180 = arith.addf %178, %179 : vector<4x8x8xf32>
    %cst_120 = arith.constant dense<0xFF800000> : vector<4x8xf32>
    %181 = vector.multi_reduction <maximumf>, %180, %cst_120 [2] : vector<4x8x8xf32> to vector<4x8xf32>
    %182 = vector.shape_cast %181 : vector<4x8xf32> to vector<4x8x1xf32>
    %183 = vector.broadcast %182 : vector<4x8x1xf32> to vector<4x8x8xf32>
    %184 = arith.subf %180, %183 : vector<4x8x8xf32>
    %185 = math.exp %184 : vector<4x8x8xf32>
    %cst_121 = arith.constant dense<0.000000e+00> : vector<4x8xf32>
    %186 = vector.multi_reduction <add>, %185, %cst_121 [2] : vector<4x8x8xf32> to vector<4x8xf32>
    %187 = vector.shape_cast %186 : vector<4x8xf32> to vector<4x8x1xf32>
    %188 = tpu.reciprocal %187 {approx = true} : vector<4x8x1xf32> -> vector<4x8x1xf32>
    %189 = vector.broadcast %188 : vector<4x8x1xf32> to vector<4x8x8xf32>
    %190 = arith.mulf %185, %189 : vector<4x8x8xf32>
    %191 = arith.truncf %190 : vector<4x8x8xf32> to vector<4x8x8xbf16>
    %192 = arith.truncf %173 : vector<4x8x8xf32> to vector<4x8x8xbf16>
    "tpu.trace_start"() <{level = 10 : i32, message = "bqk,bkd->bqd"}> : () -> ()
    %cst_122 = arith.constant dense<0.000000e+00> : vector<4x8x8xf32>
    %193 = tpu.matmul %191, %192, %cst_122 {dimension_numbers = #tpu.dot_dimension_numbers<[2], [1], [1], [2], [0, 0, 0, 1, 1, 2], [0], [0]>} : vector<4x8x8xbf16>, vector<4x8x8xbf16>, vector<4x8x8xf32> -> vector<4x8x8xf32>
    "tpu.trace_stop"() : () -> ()
    %194 = vector.shape_cast %193 : vector<4x8x8xf32> to vector<32x8xf32>
    %195 = arith.truncf %194 : vector<32x8xf32> to vector<32x8xbf16>
    %c0_123 = arith.constant 0 : index
    %c2_124 = arith.constant 2 : index
    %c0_125 = arith.constant 0 : index
    %c0_126 = arith.constant 0 : index
    %196 = vector.load %arg12[%c0_123, %c2_124, %c0_125, %c0_126] : memref<2x4x8x32xbf16, #tpu.memory_space<vmem>>, vector<1x1x8x32xbf16>
    %197 = vector.shape_cast %196 : vector<1x1x8x32xbf16> to vector<8x32xbf16>
    %cst_127 = arith.constant dense<0.000000e+00> : vector<32x32xf32>
    %198 = tpu.matmul %195, %197, %cst_127 {dimension_numbers = #tpu.dot_dimension_numbers<[1], [0], [0], [1], [0, 0, 1, 1], [], []>} : vector<32x8xbf16>, vector<8x32xbf16>, vector<32x32xf32> -> vector<32x32xf32>
    %199 = arith.addf %149, %198 : vector<32x32xf32>
    %c0_128 = arith.constant 0 : index
    %c3 = arith.constant 3 : index
    %c0_129 = arith.constant 0 : index
    %c0_130 = arith.constant 0 : index
    %200 = vector.load %arg6[%c0_128, %c3, %c0_129, %c0_130] : memref<2x4x32x8xbf16, #tpu.memory_space<vmem>>, vector<1x1x32x8xbf16>
    %201 = vector.shape_cast %200 : vector<1x1x32x8xbf16> to vector<32x8xbf16>
    %cst_131 = arith.constant dense<0.000000e+00> : vector<32x8xf32>
    %202 = tpu.matmul %48, %201, %cst_131 {dimension_numbers = #tpu.dot_dimension_numbers<[1], [0], [0], [1], [0, 0, 1, 1], [], []>} : vector<32x32xbf16>, vector<32x8xbf16>, vector<32x8xf32> -> vector<32x8xf32>
    %c0_132 = arith.constant 0 : index
    %c3_133 = arith.constant 3 : index
    %c0_134 = arith.constant 0 : index
    %c0_135 = arith.constant 0 : index
    %203 = vector.load %arg9[%c0_132, %c3_133, %c0_134, %c0_135] : memref<2x4x1x8xf32, #tpu.memory_space<vmem>>, vector<1x1x1x8xf32>
    %204 = vector.shape_cast %203 : vector<1x1x1x8xf32> to vector<1x8xf32>
    %205 = vector.broadcast %204 : vector<1x8xf32> to vector<32x8xf32>
    %206 = arith.addf %202, %205 : vector<32x8xf32>
    %c0_136 = arith.constant 0 : index
    %c3_137 = arith.constant 3 : index
    %c0_138 = arith.constant 0 : index
    %c0_139 = arith.constant 0 : index
    %207 = vector.load %arg7[%c0_136, %c3_137, %c0_138, %c0_139] : memref<2x4x32x8xbf16, #tpu.memory_space<vmem>>, vector<1x1x32x8xbf16>
    %208 = vector.shape_cast %207 : vector<1x1x32x8xbf16> to vector<32x8xbf16>
    %cst_140 = arith.constant dense<0.000000e+00> : vector<32x8xf32>
    %209 = tpu.matmul %48, %208, %cst_140 {dimension_numbers = #tpu.dot_dimension_numbers<[1], [0], [0], [1], [0, 0, 1, 1], [], []>} : vector<32x32xbf16>, vector<32x8xbf16>, vector<32x8xf32> -> vector<32x8xf32>
    %c0_141 = arith.constant 0 : index
    %c3_142 = arith.constant 3 : index
    %c0_143 = arith.constant 0 : index
    %c0_144 = arith.constant 0 : index
    %210 = vector.load %arg10[%c0_141, %c3_142, %c0_143, %c0_144] : memref<2x4x1x8xf32, #tpu.memory_space<vmem>>, vector<1x1x1x8xf32>
    %211 = vector.shape_cast %210 : vector<1x1x1x8xf32> to vector<1x8xf32>
    %212 = vector.broadcast %211 : vector<1x8xf32> to vector<32x8xf32>
    %213 = arith.addf %209, %212 : vector<32x8xf32>
    %c0_145 = arith.constant 0 : index
    %c3_146 = arith.constant 3 : index
    %c0_147 = arith.constant 0 : index
    %c0_148 = arith.constant 0 : index
    %214 = vector.load %arg8[%c0_145, %c3_146, %c0_147, %c0_148] : memref<2x4x32x8xbf16, #tpu.memory_space<vmem>>, vector<1x1x32x8xbf16>
    %215 = vector.shape_cast %214 : vector<1x1x32x8xbf16> to vector<32x8xbf16>
    %cst_149 = arith.constant dense<0.000000e+00> : vector<32x8xf32>
    %216 = tpu.matmul %48, %215, %cst_149 {dimension_numbers = #tpu.dot_dimension_numbers<[1], [0], [0], [1], [0, 0, 1, 1], [], []>} : vector<32x32xbf16>, vector<32x8xbf16>, vector<32x8xf32> -> vector<32x8xf32>
    %c0_150 = arith.constant 0 : index
    %c3_151 = arith.constant 3 : index
    %c0_152 = arith.constant 0 : index
    %c0_153 = arith.constant 0 : index
    %217 = vector.load %arg11[%c0_150, %c3_151, %c0_152, %c0_153] : memref<2x4x1x8xf32, #tpu.memory_space<vmem>>, vector<1x1x1x8xf32>
    %218 = vector.shape_cast %217 : vector<1x1x1x8xf32> to vector<1x8xf32>
    %219 = vector.broadcast %218 : vector<1x8xf32> to vector<32x8xf32>
    %220 = arith.addf %216, %219 : vector<32x8xf32>
    %221 = vector.shape_cast %206 : vector<32x8xf32> to vector<4x8x8xf32>
    %222 = vector.shape_cast %213 : vector<32x8xf32> to vector<4x8x8xf32>
    %223 = vector.shape_cast %220 : vector<32x8xf32> to vector<4x8x8xf32>
    %224 = arith.truncf %221 : vector<4x8x8xf32> to vector<4x8x8xbf16>
    %225 = arith.truncf %222 : vector<4x8x8xf32> to vector<4x8x8xbf16>
    "tpu.trace_start"() <{level = 10 : i32, message = "bqd,bkd->bqk"}> : () -> ()
    %cst_154 = arith.constant dense<0.000000e+00> : vector<4x8x8xf32>
    %226 = tpu.matmul %224, %225, %cst_154 {dimension_numbers = #tpu.dot_dimension_numbers<[2], [2], [1], [1], [0, 0, 0, 1, 1, 1], [0], [0]>} : vector<4x8x8xbf16>, vector<4x8x8xbf16>, vector<4x8x8xf32> -> vector<4x8x8xf32>
    "tpu.trace_stop"() : () -> ()
    %cst_155 = arith.constant 0.353553385 : f32
    %227 = vector.broadcast %cst_155 : f32 to vector<4x8x8xf32>
    %228 = arith.mulf %226, %227 : vector<4x8x8xf32>
    %229 = vector.broadcast %47 : vector<4x1x8xf32> to vector<4x8x8xf32>
    %230 = arith.addf %228, %229 : vector<4x8x8xf32>
    %cst_156 = arith.constant dense<0xFF800000> : vector<4x8xf32>
    %231 = vector.multi_reduction <maximumf>, %230, %cst_156 [2] : vector<4x8x8xf32> to vector<4x8xf32>
    %232 = vector.shape_cast %231 : vector<4x8xf32> to vector<4x8x1xf32>
    %233 = vector.broadcast %232 : vector<4x8x1xf32> to vector<4x8x8xf32>
    %234 = arith.subf %230, %233 : vector<4x8x8xf32>
    %235 = math.exp %234 : vector<4x8x8xf32>
    %cst_157 = arith.constant dense<0.000000e+00> : vector<4x8xf32>
    %236 = vector.multi_reduction <add>, %235, %cst_157 [2] : vector<4x8x8xf32> to vector<4x8xf32>
    %237 = vector.shape_cast %236 : vector<4x8xf32> to vector<4x8x1xf32>
    %238 = tpu.reciprocal %237 {approx = true} : vector<4x8x1xf32> -> vector<4x8x1xf32>
    %239 = vector.broadcast %238 : vector<4x8x1xf32> to vector<4x8x8xf32>
    %240 = arith.mulf %235, %239 : vector<4x8x8xf32>
    %241 = arith.truncf %240 : vector<4x8x8xf32> to vector<4x8x8xbf16>
    %242 = arith.truncf %223 : vector<4x8x8xf32> to vector<4x8x8xbf16>
    "tpu.trace_start"() <{level = 10 : i32, message = "bqk,bkd->bqd"}> : () -> ()
    %cst_158 = arith.constant dense<0.000000e+00> : vector<4x8x8xf32>
    %243 = tpu.matmul %241, %242, %cst_158 {dimension_numbers = #tpu.dot_dimension_numbers<[2], [1], [1], [2], [0, 0, 0, 1, 1, 2], [0], [0]>} : vector<4x8x8xbf16>, vector<4x8x8xbf16>, vector<4x8x8xf32> -> vector<4x8x8xf32>
    "tpu.trace_stop"() : () -> ()
    %244 = vector.shape_cast %243 : vector<4x8x8xf32> to vector<32x8xf32>
    %245 = arith.truncf %244 : vector<32x8xf32> to vector<32x8xbf16>
    %c0_159 = arith.constant 0 : index
    %c3_160 = arith.constant 3 : index
    %c0_161 = arith.constant 0 : index
    %c0_162 = arith.constant 0 : index
    %246 = vector.load %arg12[%c0_159, %c3_160, %c0_161, %c0_162] : memref<2x4x8x32xbf16, #tpu.memory_space<vmem>>, vector<1x1x8x32xbf16>
    %247 = vector.shape_cast %246 : vector<1x1x8x32xbf16> to vector<8x32xbf16>
    %cst_163 = arith.constant dense<0.000000e+00> : vector<32x32xf32>
    %248 = tpu.matmul %245, %247, %cst_163 {dimension_numbers = #tpu.dot_dimension_numbers<[1], [0], [0], [1], [0, 0, 1, 1], [], []>} : vector<32x8xbf16>, vector<8x32xbf16>, vector<32x32xf32> -> vector<32x32xf32>
    %249 = arith.addf %199, %248 : vector<32x32xf32>
    %250 = arith.addf %41, %249 : vector<32x32xf32>
    %c0_164 = arith.constant 0 : index
    %c0_165 = arith.constant 0 : index
    %c0_166 = arith.constant 0 : index
    %251 = vector.load %arg13[%c0_164, %c0_165, %c0_166] : memref<2x1x32xf32, #tpu.memory_space<vmem>>, vector<1x1x32xf32>
    %252 = vector.shape_cast %251 : vector<1x1x32xf32> to vector<1x32xf32>
    %253 = vector.broadcast %252 : vector<1x32xf32> to vector<32x32xf32>
    %254 = arith.addf %250, %253 : vector<32x32xf32>
    %c0_167 = arith.constant 0 : index
    %c0_168 = arith.constant 0 : index
    %c0_169 = arith.constant 0 : index
    %255 = vector.load %arg14[%c0_167, %c0_168, %c0_169] : memref<2x1x32xf32, #tpu.memory_space<vmem>>, vector<1x1x32xf32>
    %256 = vector.shape_cast %255 : vector<1x1x32xf32> to vector<1x32xf32>
    %c0_170 = arith.constant 0 : index
    %c0_171 = arith.constant 0 : index
    %c0_172 = arith.constant 0 : index
    %257 = vector.load %arg15[%c0_170, %c0_171, %c0_172] : memref<2x1x32xf32, #tpu.memory_space<vmem>>, vector<1x1x32xf32>
    %258 = vector.shape_cast %257 : vector<1x1x32xf32> to vector<1x32xf32>
    %cst_173 = arith.constant dense<0.000000e+00> : vector<32xf32>
    %259 = vector.multi_reduction <add>, %254, %cst_173 [1] : vector<32x32xf32> to vector<32xf32>
    %260 = vector.shape_cast %259 : vector<32xf32> to vector<32x1xf32>
    %cst_174 = arith.constant 3.200000e+01 : f32
    %261 = vector.broadcast %cst_174 : f32 to vector<32x1xf32>
    %262 = arith.divf %260, %261 : vector<32x1xf32>
    %263 = vector.broadcast %262 : vector<32x1xf32> to vector<32x32xf32>
    %264 = arith.subf %254, %263 : vector<32x32xf32>
    %265 = arith.mulf %264, %264 : vector<32x32xf32>
    %cst_175 = arith.constant dense<0.000000e+00> : vector<32xf32>
    %266 = vector.multi_reduction <add>, %265, %cst_175 [1] : vector<32x32xf32> to vector<32xf32>
    %267 = vector.shape_cast %266 : vector<32xf32> to vector<32x1xf32>
    %cst_176 = arith.constant 3.200000e+01 : f32
    %268 = vector.broadcast %cst_176 : f32 to vector<32x1xf32>
    %269 = arith.divf %267, %268 : vector<32x1xf32>
    %270 = vector.broadcast %262 : vector<32x1xf32> to vector<32x32xf32>
    %271 = arith.subf %254, %270 : vector<32x32xf32>
    %cst_177 = arith.constant 9.99999974E-6 : f32
    %272 = vector.broadcast %cst_177 : f32 to vector<32x1xf32>
    %273 = arith.addf %269, %272 : vector<32x1xf32>
    %274 = math.rsqrt %273 : vector<32x1xf32>
    %275 = vector.broadcast %274 : vector<32x1xf32> to vector<32x32xf32>
    %276 = arith.mulf %271, %275 : vector<32x32xf32>
    %277 = vector.broadcast %256 : vector<1x32xf32> to vector<32x32xf32>
    %278 = arith.mulf %276, %277 : vector<32x32xf32>
    %279 = vector.broadcast %258 : vector<1x32xf32> to vector<32x32xf32>
    %280 = arith.addf %278, %279 : vector<32x32xf32>
    %281 = arith.truncf %280 : vector<32x32xf32> to vector<32x32xbf16>
    %c0_178 = arith.constant 0 : index
    %c0_179 = arith.constant 0 : index
    %c0_180 = arith.constant 0 : index
    %282 = vector.load %arg16[%c0_178, %c0_179, %c0_180] : memref<2x32x128xbf16, #tpu.memory_space<vmem>>, vector<1x32x128xbf16>
    %283 = vector.shape_cast %282 : vector<1x32x128xbf16> to vector<32x128xbf16>
    %cst_181 = arith.constant dense<0.000000e+00> : vector<32x128xf32>
    %284 = tpu.matmul %281, %283, %cst_181 {dimension_numbers = #tpu.dot_dimension_numbers<[1], [0], [0], [1], [0, 0, 1, 1], [], []>} : vector<32x32xbf16>, vector<32x128xbf16>, vector<32x128xf32> -> vector<32x128xf32>
    %c0_182 = arith.constant 0 : index
    %c0_183 = arith.constant 0 : index
    %c0_184 = arith.constant 0 : index
    %285 = vector.load %arg17[%c0_182, %c0_183, %c0_184] : memref<2x1x128xf32, #tpu.memory_space<vmem>>, vector<1x1x128xf32>
    %286 = vector.shape_cast %285 : vector<1x1x128xf32> to vector<1x128xf32>
    %287 = vector.broadcast %286 : vector<1x128xf32> to vector<32x128xf32>
    %288 = arith.addf %284, %287 : vector<32x128xf32>
    %289 = arith.mulf %288, %288 : vector<32x128xf32>
    %290 = arith.mulf %288, %289 : vector<32x128xf32>
    %cst_185 = arith.constant 4.471500e-02 : f32
    %291 = vector.broadcast %cst_185 : f32 to vector<32x128xf32>
    %292 = arith.mulf %291, %290 : vector<32x128xf32>
    %293 = arith.addf %288, %292 : vector<32x128xf32>
    %cst_186 = arith.constant 0.797884583 : f32
    %294 = vector.broadcast %cst_186 : f32 to vector<32x128xf32>
    %295 = arith.mulf %294, %293 : vector<32x128xf32>
    %296 = math.tanh %295 : vector<32x128xf32>
    %cst_187 = arith.constant 1.000000e+00 : f32
    %297 = vector.broadcast %cst_187 : f32 to vector<32x128xf32>
    %298 = arith.addf %297, %296 : vector<32x128xf32>
    %cst_188 = arith.constant 5.000000e-01 : f32
    %299 = vector.broadcast %cst_188 : f32 to vector<32x128xf32>
    %300 = arith.mulf %299, %298 : vector<32x128xf32>
    %301 = arith.mulf %288, %300 : vector<32x128xf32>
    %302 = arith.truncf %301 : vector<32x128xf32> to vector<32x128xbf16>
    %c0_189 = arith.constant 0 : index
    %c0_190 = arith.constant 0 : index
    %c0_191 = arith.constant 0 : index
    %303 = vector.load %arg18[%c0_189, %c0_190, %c0_191] : memref<2x128x32xbf16, #tpu.memory_space<vmem>>, vector<1x128x32xbf16>
    %304 = vector.shape_cast %303 : vector<1x128x32xbf16> to vector<128x32xbf16>
    %cst_192 = arith.constant dense<0.000000e+00> : vector<32x32xf32>
    %305 = tpu.matmul %302, %304, %cst_192 {dimension_numbers = #tpu.dot_dimension_numbers<[1], [0], [0], [1], [0, 0, 1, 1], [], []>} : vector<32x128xbf16>, vector<128x32xbf16>, vector<32x32xf32> -> vector<32x32xf32>
    %c0_193 = arith.constant 0 : index
    %c0_194 = arith.constant 0 : index
    %c0_195 = arith.constant 0 : index
    %306 = vector.load %arg19[%c0_193, %c0_194, %c0_195] : memref<2x1x32xf32, #tpu.memory_space<vmem>>, vector<1x1x32xf32>
    %307 = vector.shape_cast %306 : vector<1x1x32xf32> to vector<1x32xf32>
    %308 = vector.broadcast %307 : vector<1x32xf32> to vector<32x32xf32>
    %309 = arith.addf %305, %308 : vector<32x32xf32>
    %310 = arith.addf %280, %309 : vector<32x32xf32>
    %c0_196 = arith.constant 0 : index
    %c0_197 = arith.constant 0 : index
    %c0_198 = arith.constant 0 : index
    %311 = vector.load %arg20[%c0_196, %c0_197, %c0_198] : memref<2x1x32xf32, #tpu.memory_space<vmem>>, vector<1x1x32xf32>
    %312 = vector.shape_cast %311 : vector<1x1x32xf32> to vector<1x32xf32>
    %c0_199 = arith.constant 0 : index
    %c0_200 = arith.constant 0 : index
    %c0_201 = arith.constant 0 : index
    %313 = vector.load %arg21[%c0_199, %c0_200, %c0_201] : memref<2x1x32xf32, #tpu.memory_space<vmem>>, vector<1x1x32xf32>
    %314 = vector.shape_cast %313 : vector<1x1x32xf32> to vector<1x32xf32>
    %cst_202 = arith.constant dense<0.000000e+00> : vector<32xf32>
    %315 = vector.multi_reduction <add>, %310, %cst_202 [1] : vector<32x32xf32> to vector<32xf32>
    %316 = vector.shape_cast %315 : vector<32xf32> to vector<32x1xf32>
    %cst_203 = arith.constant 3.200000e+01 : f32
    %317 = vector.broadcast %cst_203 : f32 to vector<32x1xf32>
    %318 = arith.divf %316, %317 : vector<32x1xf32>
    %319 = vector.broadcast %318 : vector<32x1xf32> to vector<32x32xf32>
    %320 = arith.subf %310, %319 : vector<32x32xf32>
    %321 = arith.mulf %320, %320 : vector<32x32xf32>
    %cst_204 = arith.constant dense<0.000000e+00> : vector<32xf32>
    %322 = vector.multi_reduction <add>, %321, %cst_204 [1] : vector<32x32xf32> to vector<32xf32>
    %323 = vector.shape_cast %322 : vector<32xf32> to vector<32x1xf32>
    %cst_205 = arith.constant 3.200000e+01 : f32
    %324 = vector.broadcast %cst_205 : f32 to vector<32x1xf32>
    %325 = arith.divf %323, %324 : vector<32x1xf32>
    %326 = vector.broadcast %318 : vector<32x1xf32> to vector<32x32xf32>
    %327 = arith.subf %310, %326 : vector<32x32xf32>
    %cst_206 = arith.constant 9.99999974E-6 : f32
    %328 = vector.broadcast %cst_206 : f32 to vector<32x1xf32>
    %329 = arith.addf %325, %328 : vector<32x1xf32>
    %330 = math.rsqrt %329 : vector<32x1xf32>
    %331 = vector.broadcast %330 : vector<32x1xf32> to vector<32x32xf32>
    %332 = arith.mulf %327, %331 : vector<32x32xf32>
    %333 = vector.broadcast %312 : vector<1x32xf32> to vector<32x32xf32>
    %334 = arith.mulf %332, %333 : vector<32x32xf32>
    %335 = vector.broadcast %314 : vector<1x32xf32> to vector<32x32xf32>
    %336 = arith.addf %334, %335 : vector<32x32xf32>
    %337 = arith.truncf %336 : vector<32x32xf32> to vector<32x32xbf16>
    %cst_207 = arith.constant 0.000000e+00 : f32
    %338 = vector.broadcast %cst_207 : f32 to vector<32x32xf32>
    %c1_208 = arith.constant 1 : index
    %c0_209 = arith.constant 0 : index
    %c0_210 = arith.constant 0 : index
    %c0_211 = arith.constant 0 : index
    %339 = vector.load %arg6[%c1_208, %c0_209, %c0_210, %c0_211] : memref<2x4x32x8xbf16, #tpu.memory_space<vmem>>, vector<1x1x32x8xbf16>
    %340 = vector.shape_cast %339 : vector<1x1x32x8xbf16> to vector<32x8xbf16>
    %cst_212 = arith.constant dense<0.000000e+00> : vector<32x8xf32>
    %341 = tpu.matmul %337, %340, %cst_212 {dimension_numbers = #tpu.dot_dimension_numbers<[1], [0], [0], [1], [0, 0, 1, 1], [], []>} : vector<32x32xbf16>, vector<32x8xbf16>, vector<32x8xf32> -> vector<32x8xf32>
    %c1_213 = arith.constant 1 : index
    %c0_214 = arith.constant 0 : index
    %c0_215 = arith.constant 0 : index
    %c0_216 = arith.constant 0 : index
    %342 = vector.load %arg9[%c1_213, %c0_214, %c0_215, %c0_216] : memref<2x4x1x8xf32, #tpu.memory_space<vmem>>, vector<1x1x1x8xf32>
    %343 = vector.shape_cast %342 : vector<1x1x1x8xf32> to vector<1x8xf32>
    %344 = vector.broadcast %343 : vector<1x8xf32> to vector<32x8xf32>
    %345 = arith.addf %341, %344 : vector<32x8xf32>
    %c1_217 = arith.constant 1 : index
    %c0_218 = arith.constant 0 : index
    %c0_219 = arith.constant 0 : index
    %c0_220 = arith.constant 0 : index
    %346 = vector.load %arg7[%c1_217, %c0_218, %c0_219, %c0_220] : memref<2x4x32x8xbf16, #tpu.memory_space<vmem>>, vector<1x1x32x8xbf16>
    %347 = vector.shape_cast %346 : vector<1x1x32x8xbf16> to vector<32x8xbf16>
    %cst_221 = arith.constant dense<0.000000e+00> : vector<32x8xf32>
    %348 = tpu.matmul %337, %347, %cst_221 {dimension_numbers = #tpu.dot_dimension_numbers<[1], [0], [0], [1], [0, 0, 1, 1], [], []>} : vector<32x32xbf16>, vector<32x8xbf16>, vector<32x8xf32> -> vector<32x8xf32>
    %c1_222 = arith.constant 1 : index
    %c0_223 = arith.constant 0 : index
    %c0_224 = arith.constant 0 : index
    %c0_225 = arith.constant 0 : index
    %349 = vector.load %arg10[%c1_222, %c0_223, %c0_224, %c0_225] : memref<2x4x1x8xf32, #tpu.memory_space<vmem>>, vector<1x1x1x8xf32>
    %350 = vector.shape_cast %349 : vector<1x1x1x8xf32> to vector<1x8xf32>
    %351 = vector.broadcast %350 : vector<1x8xf32> to vector<32x8xf32>
    %352 = arith.addf %348, %351 : vector<32x8xf32>
    %c1_226 = arith.constant 1 : index
    %c0_227 = arith.constant 0 : index
    %c0_228 = arith.constant 0 : index
    %c0_229 = arith.constant 0 : index
    %353 = vector.load %arg8[%c1_226, %c0_227, %c0_228, %c0_229] : memref<2x4x32x8xbf16, #tpu.memory_space<vmem>>, vector<1x1x32x8xbf16>
    %354 = vector.shape_cast %353 : vector<1x1x32x8xbf16> to vector<32x8xbf16>
    %cst_230 = arith.constant dense<0.000000e+00> : vector<32x8xf32>
    %355 = tpu.matmul %337, %354, %cst_230 {dimension_numbers = #tpu.dot_dimension_numbers<[1], [0], [0], [1], [0, 0, 1, 1], [], []>} : vector<32x32xbf16>, vector<32x8xbf16>, vector<32x8xf32> -> vector<32x8xf32>
    %c1_231 = arith.constant 1 : index
    %c0_232 = arith.constant 0 : index
    %c0_233 = arith.constant 0 : index
    %c0_234 = arith.constant 0 : index
    %356 = vector.load %arg11[%c1_231, %c0_232, %c0_233, %c0_234] : memref<2x4x1x8xf32, #tpu.memory_space<vmem>>, vector<1x1x1x8xf32>
    %357 = vector.shape_cast %356 : vector<1x1x1x8xf32> to vector<1x8xf32>
    %358 = vector.broadcast %357 : vector<1x8xf32> to vector<32x8xf32>
    %359 = arith.addf %355, %358 : vector<32x8xf32>
    %360 = vector.shape_cast %345 : vector<32x8xf32> to vector<4x8x8xf32>
    %361 = vector.shape_cast %352 : vector<32x8xf32> to vector<4x8x8xf32>
    %362 = vector.shape_cast %359 : vector<32x8xf32> to vector<4x8x8xf32>
    %363 = arith.truncf %360 : vector<4x8x8xf32> to vector<4x8x8xbf16>
    %364 = arith.truncf %361 : vector<4x8x8xf32> to vector<4x8x8xbf16>
    "tpu.trace_start"() <{level = 10 : i32, message = "bqd,bkd->bqk"}> : () -> ()
    %cst_235 = arith.constant dense<0.000000e+00> : vector<4x8x8xf32>
    %365 = tpu.matmul %363, %364, %cst_235 {dimension_numbers = #tpu.dot_dimension_numbers<[2], [2], [1], [1], [0, 0, 0, 1, 1, 1], [0], [0]>} : vector<4x8x8xbf16>, vector<4x8x8xbf16>, vector<4x8x8xf32> -> vector<4x8x8xf32>
    "tpu.trace_stop"() : () -> ()
    %cst_236 = arith.constant 0.353553385 : f32
    %366 = vector.broadcast %cst_236 : f32 to vector<4x8x8xf32>
    %367 = arith.mulf %365, %366 : vector<4x8x8xf32>
    %368 = vector.broadcast %47 : vector<4x1x8xf32> to vector<4x8x8xf32>
    %369 = arith.addf %367, %368 : vector<4x8x8xf32>
    %cst_237 = arith.constant dense<0xFF800000> : vector<4x8xf32>
    %370 = vector.multi_reduction <maximumf>, %369, %cst_237 [2] : vector<4x8x8xf32> to vector<4x8xf32>
    %371 = vector.shape_cast %370 : vector<4x8xf32> to vector<4x8x1xf32>
    %372 = vector.broadcast %371 : vector<4x8x1xf32> to vector<4x8x8xf32>
    %373 = arith.subf %369, %372 : vector<4x8x8xf32>
    %374 = math.exp %373 : vector<4x8x8xf32>
    %cst_238 = arith.constant dense<0.000000e+00> : vector<4x8xf32>
    %375 = vector.multi_reduction <add>, %374, %cst_238 [2] : vector<4x8x8xf32> to vector<4x8xf32>
    %376 = vector.shape_cast %375 : vector<4x8xf32> to vector<4x8x1xf32>
    %377 = tpu.reciprocal %376 {approx = true} : vector<4x8x1xf32> -> vector<4x8x1xf32>
    %378 = vector.broadcast %377 : vector<4x8x1xf32> to vector<4x8x8xf32>
    %379 = arith.mulf %374, %378 : vector<4x8x8xf32>
    %380 = arith.truncf %379 : vector<4x8x8xf32> to vector<4x8x8xbf16>
    %381 = arith.truncf %362 : vector<4x8x8xf32> to vector<4x8x8xbf16>
    "tpu.trace_start"() <{level = 10 : i32, message = "bqk,bkd->bqd"}> : () -> ()
    %cst_239 = arith.constant dense<0.000000e+00> : vector<4x8x8xf32>
    %382 = tpu.matmul %380, %381, %cst_239 {dimension_numbers = #tpu.dot_dimension_numbers<[2], [1], [1], [2], [0, 0, 0, 1, 1, 2], [0], [0]>} : vector<4x8x8xbf16>, vector<4x8x8xbf16>, vector<4x8x8xf32> -> vector<4x8x8xf32>
    "tpu.trace_stop"() : () -> ()
    %383 = vector.shape_cast %382 : vector<4x8x8xf32> to vector<32x8xf32>
    %384 = arith.truncf %383 : vector<32x8xf32> to vector<32x8xbf16>
    %c1_240 = arith.constant 1 : index
    %c0_241 = arith.constant 0 : index
    %c0_242 = arith.constant 0 : index
    %c0_243 = arith.constant 0 : index
    %385 = vector.load %arg12[%c1_240, %c0_241, %c0_242, %c0_243] : memref<2x4x8x32xbf16, #tpu.memory_space<vmem>>, vector<1x1x8x32xbf16>
    %386 = vector.shape_cast %385 : vector<1x1x8x32xbf16> to vector<8x32xbf16>
    %cst_244 = arith.constant dense<0.000000e+00> : vector<32x32xf32>
    %387 = tpu.matmul %384, %386, %cst_244 {dimension_numbers = #tpu.dot_dimension_numbers<[1], [0], [0], [1], [0, 0, 1, 1], [], []>} : vector<32x8xbf16>, vector<8x32xbf16>, vector<32x32xf32> -> vector<32x32xf32>
    %388 = arith.addf %338, %387 : vector<32x32xf32>
    %c1_245 = arith.constant 1 : index
    %c1_246 = arith.constant 1 : index
    %c0_247 = arith.constant 0 : index
    %c0_248 = arith.constant 0 : index
    %389 = vector.load %arg6[%c1_245, %c1_246, %c0_247, %c0_248] : memref<2x4x32x8xbf16, #tpu.memory_space<vmem>>, vector<1x1x32x8xbf16>
    %390 = vector.shape_cast %389 : vector<1x1x32x8xbf16> to vector<32x8xbf16>
    %cst_249 = arith.constant dense<0.000000e+00> : vector<32x8xf32>
    %391 = tpu.matmul %337, %390, %cst_249 {dimension_numbers = #tpu.dot_dimension_numbers<[1], [0], [0], [1], [0, 0, 1, 1], [], []>} : vector<32x32xbf16>, vector<32x8xbf16>, vector<32x8xf32> -> vector<32x8xf32>
    %c1_250 = arith.constant 1 : index
    %c1_251 = arith.constant 1 : index
    %c0_252 = arith.constant 0 : index
    %c0_253 = arith.constant 0 : index
    %392 = vector.load %arg9[%c1_250, %c1_251, %c0_252, %c0_253] : memref<2x4x1x8xf32, #tpu.memory_space<vmem>>, vector<1x1x1x8xf32>
    %393 = vector.shape_cast %392 : vector<1x1x1x8xf32> to vector<1x8xf32>
    %394 = vector.broadcast %393 : vector<1x8xf32> to vector<32x8xf32>
    %395 = arith.addf %391, %394 : vector<32x8xf32>
    %c1_254 = arith.constant 1 : index
    %c1_255 = arith.constant 1 : index
    %c0_256 = arith.constant 0 : index
    %c0_257 = arith.constant 0 : index
    %396 = vector.load %arg7[%c1_254, %c1_255, %c0_256, %c0_257] : memref<2x4x32x8xbf16, #tpu.memory_space<vmem>>, vector<1x1x32x8xbf16>
    %397 = vector.shape_cast %396 : vector<1x1x32x8xbf16> to vector<32x8xbf16>
    %cst_258 = arith.constant dense<0.000000e+00> : vector<32x8xf32>
    %398 = tpu.matmul %337, %397, %cst_258 {dimension_numbers = #tpu.dot_dimension_numbers<[1], [0], [0], [1], [0, 0, 1, 1], [], []>} : vector<32x32xbf16>, vector<32x8xbf16>, vector<32x8xf32> -> vector<32x8xf32>
    %c1_259 = arith.constant 1 : index
    %c1_260 = arith.constant 1 : index
    %c0_261 = arith.constant 0 : index
    %c0_262 = arith.constant 0 : index
    %399 = vector.load %arg10[%c1_259, %c1_260, %c0_261, %c0_262] : memref<2x4x1x8xf32, #tpu.memory_space<vmem>>, vector<1x1x1x8xf32>
    %400 = vector.shape_cast %399 : vector<1x1x1x8xf32> to vector<1x8xf32>
    %401 = vector.broadcast %400 : vector<1x8xf32> to vector<32x8xf32>
    %402 = arith.addf %398, %401 : vector<32x8xf32>
    %c1_263 = arith.constant 1 : index
    %c1_264 = arith.constant 1 : index
    %c0_265 = arith.constant 0 : index
    %c0_266 = arith.constant 0 : index
    %403 = vector.load %arg8[%c1_263, %c1_264, %c0_265, %c0_266] : memref<2x4x32x8xbf16, #tpu.memory_space<vmem>>, vector<1x1x32x8xbf16>
    %404 = vector.shape_cast %403 : vector<1x1x32x8xbf16> to vector<32x8xbf16>
    %cst_267 = arith.constant dense<0.000000e+00> : vector<32x8xf32>
    %405 = tpu.matmul %337, %404, %cst_267 {dimension_numbers = #tpu.dot_dimension_numbers<[1], [0], [0], [1], [0, 0, 1, 1], [], []>} : vector<32x32xbf16>, vector<32x8xbf16>, vector<32x8xf32> -> vector<32x8xf32>
    %c1_268 = arith.constant 1 : index
    %c1_269 = arith.constant 1 : index
    %c0_270 = arith.constant 0 : index
    %c0_271 = arith.constant 0 : index
    %406 = vector.load %arg11[%c1_268, %c1_269, %c0_270, %c0_271] : memref<2x4x1x8xf32, #tpu.memory_space<vmem>>, vector<1x1x1x8xf32>
    %407 = vector.shape_cast %406 : vector<1x1x1x8xf32> to vector<1x8xf32>
    %408 = vector.broadcast %407 : vector<1x8xf32> to vector<32x8xf32>
    %409 = arith.addf %405, %408 : vector<32x8xf32>
    %410 = vector.shape_cast %395 : vector<32x8xf32> to vector<4x8x8xf32>
    %411 = vector.shape_cast %402 : vector<32x8xf32> to vector<4x8x8xf32>
    %412 = vector.shape_cast %409 : vector<32x8xf32> to vector<4x8x8xf32>
    %413 = arith.truncf %410 : vector<4x8x8xf32> to vector<4x8x8xbf16>
    %414 = arith.truncf %411 : vector<4x8x8xf32> to vector<4x8x8xbf16>
    "tpu.trace_start"() <{level = 10 : i32, message = "bqd,bkd->bqk"}> : () -> ()
    %cst_272 = arith.constant dense<0.000000e+00> : vector<4x8x8xf32>
    %415 = tpu.matmul %413, %414, %cst_272 {dimension_numbers = #tpu.dot_dimension_numbers<[2], [2], [1], [1], [0, 0, 0, 1, 1, 1], [0], [0]>} : vector<4x8x8xbf16>, vector<4x8x8xbf16>, vector<4x8x8xf32> -> vector<4x8x8xf32>
    "tpu.trace_stop"() : () -> ()
    %cst_273 = arith.constant 0.353553385 : f32
    %416 = vector.broadcast %cst_273 : f32 to vector<4x8x8xf32>
    %417 = arith.mulf %415, %416 : vector<4x8x8xf32>
    %418 = vector.broadcast %47 : vector<4x1x8xf32> to vector<4x8x8xf32>
    %419 = arith.addf %417, %418 : vector<4x8x8xf32>
    %cst_274 = arith.constant dense<0xFF800000> : vector<4x8xf32>
    %420 = vector.multi_reduction <maximumf>, %419, %cst_274 [2] : vector<4x8x8xf32> to vector<4x8xf32>
    %421 = vector.shape_cast %420 : vector<4x8xf32> to vector<4x8x1xf32>
    %422 = vector.broadcast %421 : vector<4x8x1xf32> to vector<4x8x8xf32>
    %423 = arith.subf %419, %422 : vector<4x8x8xf32>
    %424 = math.exp %423 : vector<4x8x8xf32>
    %cst_275 = arith.constant dense<0.000000e+00> : vector<4x8xf32>
    %425 = vector.multi_reduction <add>, %424, %cst_275 [2] : vector<4x8x8xf32> to vector<4x8xf32>
    %426 = vector.shape_cast %425 : vector<4x8xf32> to vector<4x8x1xf32>
    %427 = tpu.reciprocal %426 {approx = true} : vector<4x8x1xf32> -> vector<4x8x1xf32>
    %428 = vector.broadcast %427 : vector<4x8x1xf32> to vector<4x8x8xf32>
    %429 = arith.mulf %424, %428 : vector<4x8x8xf32>
    %430 = arith.truncf %429 : vector<4x8x8xf32> to vector<4x8x8xbf16>
    %431 = arith.truncf %412 : vector<4x8x8xf32> to vector<4x8x8xbf16>
    "tpu.trace_start"() <{level = 10 : i32, message = "bqk,bkd->bqd"}> : () -> ()
    %cst_276 = arith.constant dense<0.000000e+00> : vector<4x8x8xf32>
    %432 = tpu.matmul %430, %431, %cst_276 {dimension_numbers = #tpu.dot_dimension_numbers<[2], [1], [1], [2], [0, 0, 0, 1, 1, 2], [0], [0]>} : vector<4x8x8xbf16>, vector<4x8x8xbf16>, vector<4x8x8xf32> -> vector<4x8x8xf32>
    "tpu.trace_stop"() : () -> ()
    %433 = vector.shape_cast %432 : vector<4x8x8xf32> to vector<32x8xf32>
    %434 = arith.truncf %433 : vector<32x8xf32> to vector<32x8xbf16>
    %c1_277 = arith.constant 1 : index
    %c1_278 = arith.constant 1 : index
    %c0_279 = arith.constant 0 : index
    %c0_280 = arith.constant 0 : index
    %435 = vector.load %arg12[%c1_277, %c1_278, %c0_279, %c0_280] : memref<2x4x8x32xbf16, #tpu.memory_space<vmem>>, vector<1x1x8x32xbf16>
    %436 = vector.shape_cast %435 : vector<1x1x8x32xbf16> to vector<8x32xbf16>
    %cst_281 = arith.constant dense<0.000000e+00> : vector<32x32xf32>
    %437 = tpu.matmul %434, %436, %cst_281 {dimension_numbers = #tpu.dot_dimension_numbers<[1], [0], [0], [1], [0, 0, 1, 1], [], []>} : vector<32x8xbf16>, vector<8x32xbf16>, vector<32x32xf32> -> vector<32x32xf32>
    %438 = arith.addf %388, %437 : vector<32x32xf32>
    %c1_282 = arith.constant 1 : index
    %c2_283 = arith.constant 2 : index
    %c0_284 = arith.constant 0 : index
    %c0_285 = arith.constant 0 : index
    %439 = vector.load %arg6[%c1_282, %c2_283, %c0_284, %c0_285] : memref<2x4x32x8xbf16, #tpu.memory_space<vmem>>, vector<1x1x32x8xbf16>
    %440 = vector.shape_cast %439 : vector<1x1x32x8xbf16> to vector<32x8xbf16>
    %cst_286 = arith.constant dense<0.000000e+00> : vector<32x8xf32>
    %441 = tpu.matmul %337, %440, %cst_286 {dimension_numbers = #tpu.dot_dimension_numbers<[1], [0], [0], [1], [0, 0, 1, 1], [], []>} : vector<32x32xbf16>, vector<32x8xbf16>, vector<32x8xf32> -> vector<32x8xf32>
    %c1_287 = arith.constant 1 : index
    %c2_288 = arith.constant 2 : index
    %c0_289 = arith.constant 0 : index
    %c0_290 = arith.constant 0 : index
    %442 = vector.load %arg9[%c1_287, %c2_288, %c0_289, %c0_290] : memref<2x4x1x8xf32, #tpu.memory_space<vmem>>, vector<1x1x1x8xf32>
    %443 = vector.shape_cast %442 : vector<1x1x1x8xf32> to vector<1x8xf32>
    %444 = vector.broadcast %443 : vector<1x8xf32> to vector<32x8xf32>
    %445 = arith.addf %441, %444 : vector<32x8xf32>
    %c1_291 = arith.constant 1 : index
    %c2_292 = arith.constant 2 : index
    %c0_293 = arith.constant 0 : index
    %c0_294 = arith.constant 0 : index
    %446 = vector.load %arg7[%c1_291, %c2_292, %c0_293, %c0_294] : memref<2x4x32x8xbf16, #tpu.memory_space<vmem>>, vector<1x1x32x8xbf16>
    %447 = vector.shape_cast %446 : vector<1x1x32x8xbf16> to vector<32x8xbf16>
    %cst_295 = arith.constant dense<0.000000e+00> : vector<32x8xf32>
    %448 = tpu.matmul %337, %447, %cst_295 {dimension_numbers = #tpu.dot_dimension_numbers<[1], [0], [0], [1], [0, 0, 1, 1], [], []>} : vector<32x32xbf16>, vector<32x8xbf16>, vector<32x8xf32> -> vector<32x8xf32>
    %c1_296 = arith.constant 1 : index
    %c2_297 = arith.constant 2 : index
    %c0_298 = arith.constant 0 : index
    %c0_299 = arith.constant 0 : index
    %449 = vector.load %arg10[%c1_296, %c2_297, %c0_298, %c0_299] : memref<2x4x1x8xf32, #tpu.memory_space<vmem>>, vector<1x1x1x8xf32>
    %450 = vector.shape_cast %449 : vector<1x1x1x8xf32> to vector<1x8xf32>
    %451 = vector.broadcast %450 : vector<1x8xf32> to vector<32x8xf32>
    %452 = arith.addf %448, %451 : vector<32x8xf32>
    %c1_300 = arith.constant 1 : index
    %c2_301 = arith.constant 2 : index
    %c0_302 = arith.constant 0 : index
    %c0_303 = arith.constant 0 : index
    %453 = vector.load %arg8[%c1_300, %c2_301, %c0_302, %c0_303] : memref<2x4x32x8xbf16, #tpu.memory_space<vmem>>, vector<1x1x32x8xbf16>
    %454 = vector.shape_cast %453 : vector<1x1x32x8xbf16> to vector<32x8xbf16>
    %cst_304 = arith.constant dense<0.000000e+00> : vector<32x8xf32>
    %455 = tpu.matmul %337, %454, %cst_304 {dimension_numbers = #tpu.dot_dimension_numbers<[1], [0], [0], [1], [0, 0, 1, 1], [], []>} : vector<32x32xbf16>, vector<32x8xbf16>, vector<32x8xf32> -> vector<32x8xf32>
    %c1_305 = arith.constant 1 : index
    %c2_306 = arith.constant 2 : index
    %c0_307 = arith.constant 0 : index
    %c0_308 = arith.constant 0 : index
    %456 = vector.load %arg11[%c1_305, %c2_306, %c0_307, %c0_308] : memref<2x4x1x8xf32, #tpu.memory_space<vmem>>, vector<1x1x1x8xf32>
    %457 = vector.shape_cast %456 : vector<1x1x1x8xf32> to vector<1x8xf32>
    %458 = vector.broadcast %457 : vector<1x8xf32> to vector<32x8xf32>
    %459 = arith.addf %455, %458 : vector<32x8xf32>
    %460 = vector.shape_cast %445 : vector<32x8xf32> to vector<4x8x8xf32>
    %461 = vector.shape_cast %452 : vector<32x8xf32> to vector<4x8x8xf32>
    %462 = vector.shape_cast %459 : vector<32x8xf32> to vector<4x8x8xf32>
    %463 = arith.truncf %460 : vector<4x8x8xf32> to vector<4x8x8xbf16>
    %464 = arith.truncf %461 : vector<4x8x8xf32> to vector<4x8x8xbf16>
    "tpu.trace_start"() <{level = 10 : i32, message = "bqd,bkd->bqk"}> : () -> ()
    %cst_309 = arith.constant dense<0.000000e+00> : vector<4x8x8xf32>
    %465 = tpu.matmul %463, %464, %cst_309 {dimension_numbers = #tpu.dot_dimension_numbers<[2], [2], [1], [1], [0, 0, 0, 1, 1, 1], [0], [0]>} : vector<4x8x8xbf16>, vector<4x8x8xbf16>, vector<4x8x8xf32> -> vector<4x8x8xf32>
    "tpu.trace_stop"() : () -> ()
    %cst_310 = arith.constant 0.353553385 : f32
    %466 = vector.broadcast %cst_310 : f32 to vector<4x8x8xf32>
    %467 = arith.mulf %465, %466 : vector<4x8x8xf32>
    %468 = vector.broadcast %47 : vector<4x1x8xf32> to vector<4x8x8xf32>
    %469 = arith.addf %467, %468 : vector<4x8x8xf32>
    %cst_311 = arith.constant dense<0xFF800000> : vector<4x8xf32>
    %470 = vector.multi_reduction <maximumf>, %469, %cst_311 [2] : vector<4x8x8xf32> to vector<4x8xf32>
    %471 = vector.shape_cast %470 : vector<4x8xf32> to vector<4x8x1xf32>
    %472 = vector.broadcast %471 : vector<4x8x1xf32> to vector<4x8x8xf32>
    %473 = arith.subf %469, %472 : vector<4x8x8xf32>
    %474 = math.exp %473 : vector<4x8x8xf32>
    %cst_312 = arith.constant dense<0.000000e+00> : vector<4x8xf32>
    %475 = vector.multi_reduction <add>, %474, %cst_312 [2] : vector<4x8x8xf32> to vector<4x8xf32>
    %476 = vector.shape_cast %475 : vector<4x8xf32> to vector<4x8x1xf32>
    %477 = tpu.reciprocal %476 {approx = true} : vector<4x8x1xf32> -> vector<4x8x1xf32>
    %478 = vector.broadcast %477 : vector<4x8x1xf32> to vector<4x8x8xf32>
    %479 = arith.mulf %474, %478 : vector<4x8x8xf32>
    %480 = arith.truncf %479 : vector<4x8x8xf32> to vector<4x8x8xbf16>
    %481 = arith.truncf %462 : vector<4x8x8xf32> to vector<4x8x8xbf16>
    "tpu.trace_start"() <{level = 10 : i32, message = "bqk,bkd->bqd"}> : () -> ()
    %cst_313 = arith.constant dense<0.000000e+00> : vector<4x8x8xf32>
    %482 = tpu.matmul %480, %481, %cst_313 {dimension_numbers = #tpu.dot_dimension_numbers<[2], [1], [1], [2], [0, 0, 0, 1, 1, 2], [0], [0]>} : vector<4x8x8xbf16>, vector<4x8x8xbf16>, vector<4x8x8xf32> -> vector<4x8x8xf32>
    "tpu.trace_stop"() : () -> ()
    %483 = vector.shape_cast %482 : vector<4x8x8xf32> to vector<32x8xf32>
    %484 = arith.truncf %483 : vector<32x8xf32> to vector<32x8xbf16>
    %c1_314 = arith.constant 1 : index
    %c2_315 = arith.constant 2 : index
    %c0_316 = arith.constant 0 : index
    %c0_317 = arith.constant 0 : index
    %485 = vector.load %arg12[%c1_314, %c2_315, %c0_316, %c0_317] : memref<2x4x8x32xbf16, #tpu.memory_space<vmem>>, vector<1x1x8x32xbf16>
    %486 = vector.shape_cast %485 : vector<1x1x8x32xbf16> to vector<8x32xbf16>
    %cst_318 = arith.constant dense<0.000000e+00> : vector<32x32xf32>
    %487 = tpu.matmul %484, %486, %cst_318 {dimension_numbers = #tpu.dot_dimension_numbers<[1], [0], [0], [1], [0, 0, 1, 1], [], []>} : vector<32x8xbf16>, vector<8x32xbf16>, vector<32x32xf32> -> vector<32x32xf32>
    %488 = arith.addf %438, %487 : vector<32x32xf32>
    %c1_319 = arith.constant 1 : index
    %c3_320 = arith.constant 3 : index
    %c0_321 = arith.constant 0 : index
    %c0_322 = arith.constant 0 : index
    %489 = vector.load %arg6[%c1_319, %c3_320, %c0_321, %c0_322] : memref<2x4x32x8xbf16, #tpu.memory_space<vmem>>, vector<1x1x32x8xbf16>
    %490 = vector.shape_cast %489 : vector<1x1x32x8xbf16> to vector<32x8xbf16>
    %cst_323 = arith.constant dense<0.000000e+00> : vector<32x8xf32>
    %491 = tpu.matmul %337, %490, %cst_323 {dimension_numbers = #tpu.dot_dimension_numbers<[1], [0], [0], [1], [0, 0, 1, 1], [], []>} : vector<32x32xbf16>, vector<32x8xbf16>, vector<32x8xf32> -> vector<32x8xf32>
    %c1_324 = arith.constant 1 : index
    %c3_325 = arith.constant 3 : index
    %c0_326 = arith.constant 0 : index
    %c0_327 = arith.constant 0 : index
    %492 = vector.load %arg9[%c1_324, %c3_325, %c0_326, %c0_327] : memref<2x4x1x8xf32, #tpu.memory_space<vmem>>, vector<1x1x1x8xf32>
    %493 = vector.shape_cast %492 : vector<1x1x1x8xf32> to vector<1x8xf32>
    %494 = vector.broadcast %493 : vector<1x8xf32> to vector<32x8xf32>
    %495 = arith.addf %491, %494 : vector<32x8xf32>
    %c1_328 = arith.constant 1 : index
    %c3_329 = arith.constant 3 : index
    %c0_330 = arith.constant 0 : index
    %c0_331 = arith.constant 0 : index
    %496 = vector.load %arg7[%c1_328, %c3_329, %c0_330, %c0_331] : memref<2x4x32x8xbf16, #tpu.memory_space<vmem>>, vector<1x1x32x8xbf16>
    %497 = vector.shape_cast %496 : vector<1x1x32x8xbf16> to vector<32x8xbf16>
    %cst_332 = arith.constant dense<0.000000e+00> : vector<32x8xf32>
    %498 = tpu.matmul %337, %497, %cst_332 {dimension_numbers = #tpu.dot_dimension_numbers<[1], [0], [0], [1], [0, 0, 1, 1], [], []>} : vector<32x32xbf16>, vector<32x8xbf16>, vector<32x8xf32> -> vector<32x8xf32>
    %c1_333 = arith.constant 1 : index
    %c3_334 = arith.constant 3 : index
    %c0_335 = arith.constant 0 : index
    %c0_336 = arith.constant 0 : index
    %499 = vector.load %arg10[%c1_333, %c3_334, %c0_335, %c0_336] : memref<2x4x1x8xf32, #tpu.memory_space<vmem>>, vector<1x1x1x8xf32>
    %500 = vector.shape_cast %499 : vector<1x1x1x8xf32> to vector<1x8xf32>
    %501 = vector.broadcast %500 : vector<1x8xf32> to vector<32x8xf32>
    %502 = arith.addf %498, %501 : vector<32x8xf32>
    %c1_337 = arith.constant 1 : index
    %c3_338 = arith.constant 3 : index
    %c0_339 = arith.constant 0 : index
    %c0_340 = arith.constant 0 : index
    %503 = vector.load %arg8[%c1_337, %c3_338, %c0_339, %c0_340] : memref<2x4x32x8xbf16, #tpu.memory_space<vmem>>, vector<1x1x32x8xbf16>
    %504 = vector.shape_cast %503 : vector<1x1x32x8xbf16> to vector<32x8xbf16>
    %cst_341 = arith.constant dense<0.000000e+00> : vector<32x8xf32>
    %505 = tpu.matmul %337, %504, %cst_341 {dimension_numbers = #tpu.dot_dimension_numbers<[1], [0], [0], [1], [0, 0, 1, 1], [], []>} : vector<32x32xbf16>, vector<32x8xbf16>, vector<32x8xf32> -> vector<32x8xf32>
    %c1_342 = arith.constant 1 : index
    %c3_343 = arith.constant 3 : index
    %c0_344 = arith.constant 0 : index
    %c0_345 = arith.constant 0 : index
    %506 = vector.load %arg11[%c1_342, %c3_343, %c0_344, %c0_345] : memref<2x4x1x8xf32, #tpu.memory_space<vmem>>, vector<1x1x1x8xf32>
    %507 = vector.shape_cast %506 : vector<1x1x1x8xf32> to vector<1x8xf32>
    %508 = vector.broadcast %507 : vector<1x8xf32> to vector<32x8xf32>
    %509 = arith.addf %505, %508 : vector<32x8xf32>
    %510 = vector.shape_cast %495 : vector<32x8xf32> to vector<4x8x8xf32>
    %511 = vector.shape_cast %502 : vector<32x8xf32> to vector<4x8x8xf32>
    %512 = vector.shape_cast %509 : vector<32x8xf32> to vector<4x8x8xf32>
    %513 = arith.truncf %510 : vector<4x8x8xf32> to vector<4x8x8xbf16>
    %514 = arith.truncf %511 : vector<4x8x8xf32> to vector<4x8x8xbf16>
    "tpu.trace_start"() <{level = 10 : i32, message = "bqd,bkd->bqk"}> : () -> ()
    %cst_346 = arith.constant dense<0.000000e+00> : vector<4x8x8xf32>
    %515 = tpu.matmul %513, %514, %cst_346 {dimension_numbers = #tpu.dot_dimension_numbers<[2], [2], [1], [1], [0, 0, 0, 1, 1, 1], [0], [0]>} : vector<4x8x8xbf16>, vector<4x8x8xbf16>, vector<4x8x8xf32> -> vector<4x8x8xf32>
    "tpu.trace_stop"() : () -> ()
    %cst_347 = arith.constant 0.353553385 : f32
    %516 = vector.broadcast %cst_347 : f32 to vector<4x8x8xf32>
    %517 = arith.mulf %515, %516 : vector<4x8x8xf32>
    %518 = vector.broadcast %47 : vector<4x1x8xf32> to vector<4x8x8xf32>
    %519 = arith.addf %517, %518 : vector<4x8x8xf32>
    %cst_348 = arith.constant dense<0xFF800000> : vector<4x8xf32>
    %520 = vector.multi_reduction <maximumf>, %519, %cst_348 [2] : vector<4x8x8xf32> to vector<4x8xf32>
    %521 = vector.shape_cast %520 : vector<4x8xf32> to vector<4x8x1xf32>
    %522 = vector.broadcast %521 : vector<4x8x1xf32> to vector<4x8x8xf32>
    %523 = arith.subf %519, %522 : vector<4x8x8xf32>
    %524 = math.exp %523 : vector<4x8x8xf32>
    %cst_349 = arith.constant dense<0.000000e+00> : vector<4x8xf32>
    %525 = vector.multi_reduction <add>, %524, %cst_349 [2] : vector<4x8x8xf32> to vector<4x8xf32>
    %526 = vector.shape_cast %525 : vector<4x8xf32> to vector<4x8x1xf32>
    %527 = tpu.reciprocal %526 {approx = true} : vector<4x8x1xf32> -> vector<4x8x1xf32>
    %528 = vector.broadcast %527 : vector<4x8x1xf32> to vector<4x8x8xf32>
    %529 = arith.mulf %524, %528 : vector<4x8x8xf32>
    %530 = arith.truncf %529 : vector<4x8x8xf32> to vector<4x8x8xbf16>
    %531 = arith.truncf %512 : vector<4x8x8xf32> to vector<4x8x8xbf16>
    "tpu.trace_start"() <{level = 10 : i32, message = "bqk,bkd->bqd"}> : () -> ()
    %cst_350 = arith.constant dense<0.000000e+00> : vector<4x8x8xf32>
    %532 = tpu.matmul %530, %531, %cst_350 {dimension_numbers = #tpu.dot_dimension_numbers<[2], [1], [1], [2], [0, 0, 0, 1, 1, 2], [0], [0]>} : vector<4x8x8xbf16>, vector<4x8x8xbf16>, vector<4x8x8xf32> -> vector<4x8x8xf32>
    "tpu.trace_stop"() : () -> ()
    %533 = vector.shape_cast %532 : vector<4x8x8xf32> to vector<32x8xf32>
    %534 = arith.truncf %533 : vector<32x8xf32> to vector<32x8xbf16>
    %c1_351 = arith.constant 1 : index
    %c3_352 = arith.constant 3 : index
    %c0_353 = arith.constant 0 : index
    %c0_354 = arith.constant 0 : index
    %535 = vector.load %arg12[%c1_351, %c3_352, %c0_353, %c0_354] : memref<2x4x8x32xbf16, #tpu.memory_space<vmem>>, vector<1x1x8x32xbf16>
    %536 = vector.shape_cast %535 : vector<1x1x8x32xbf16> to vector<8x32xbf16>
    %cst_355 = arith.constant dense<0.000000e+00> : vector<32x32xf32>
    %537 = tpu.matmul %534, %536, %cst_355 {dimension_numbers = #tpu.dot_dimension_numbers<[1], [0], [0], [1], [0, 0, 1, 1], [], []>} : vector<32x8xbf16>, vector<8x32xbf16>, vector<32x32xf32> -> vector<32x32xf32>
    %538 = arith.addf %488, %537 : vector<32x32xf32>
    %539 = arith.addf %336, %538 : vector<32x32xf32>
    %c1_356 = arith.constant 1 : index
    %c0_357 = arith.constant 0 : index
    %c0_358 = arith.constant 0 : index
    %540 = vector.load %arg13[%c1_356, %c0_357, %c0_358] : memref<2x1x32xf32, #tpu.memory_space<vmem>>, vector<1x1x32xf32>
    %541 = vector.shape_cast %540 : vector<1x1x32xf32> to vector<1x32xf32>
    %542 = vector.broadcast %541 : vector<1x32xf32> to vector<32x32xf32>
    %543 = arith.addf %539, %542 : vector<32x32xf32>
    %c1_359 = arith.constant 1 : index
    %c0_360 = arith.constant 0 : index
    %c0_361 = arith.constant 0 : index
    %544 = vector.load %arg14[%c1_359, %c0_360, %c0_361] : memref<2x1x32xf32, #tpu.memory_space<vmem>>, vector<1x1x32xf32>
    %545 = vector.shape_cast %544 : vector<1x1x32xf32> to vector<1x32xf32>
    %c1_362 = arith.constant 1 : index
    %c0_363 = arith.constant 0 : index
    %c0_364 = arith.constant 0 : index
    %546 = vector.load %arg15[%c1_362, %c0_363, %c0_364] : memref<2x1x32xf32, #tpu.memory_space<vmem>>, vector<1x1x32xf32>
    %547 = vector.shape_cast %546 : vector<1x1x32xf32> to vector<1x32xf32>
    %cst_365 = arith.constant dense<0.000000e+00> : vector<32xf32>
    %548 = vector.multi_reduction <add>, %543, %cst_365 [1] : vector<32x32xf32> to vector<32xf32>
    %549 = vector.shape_cast %548 : vector<32xf32> to vector<32x1xf32>
    %cst_366 = arith.constant 3.200000e+01 : f32
    %550 = vector.broadcast %cst_366 : f32 to vector<32x1xf32>
    %551 = arith.divf %549, %550 : vector<32x1xf32>
    %552 = vector.broadcast %551 : vector<32x1xf32> to vector<32x32xf32>
    %553 = arith.subf %543, %552 : vector<32x32xf32>
    %554 = arith.mulf %553, %553 : vector<32x32xf32>
    %cst_367 = arith.constant dense<0.000000e+00> : vector<32xf32>
    %555 = vector.multi_reduction <add>, %554, %cst_367 [1] : vector<32x32xf32> to vector<32xf32>
    %556 = vector.shape_cast %555 : vector<32xf32> to vector<32x1xf32>
    %cst_368 = arith.constant 3.200000e+01 : f32
    %557 = vector.broadcast %cst_368 : f32 to vector<32x1xf32>
    %558 = arith.divf %556, %557 : vector<32x1xf32>
    %559 = vector.broadcast %551 : vector<32x1xf32> to vector<32x32xf32>
    %560 = arith.subf %543, %559 : vector<32x32xf32>
    %cst_369 = arith.constant 9.99999974E-6 : f32
    %561 = vector.broadcast %cst_369 : f32 to vector<32x1xf32>
    %562 = arith.addf %558, %561 : vector<32x1xf32>
    %563 = math.rsqrt %562 : vector<32x1xf32>
    %564 = vector.broadcast %563 : vector<32x1xf32> to vector<32x32xf32>
    %565 = arith.mulf %560, %564 : vector<32x32xf32>
    %566 = vector.broadcast %545 : vector<1x32xf32> to vector<32x32xf32>
    %567 = arith.mulf %565, %566 : vector<32x32xf32>
    %568 = vector.broadcast %547 : vector<1x32xf32> to vector<32x32xf32>
    %569 = arith.addf %567, %568 : vector<32x32xf32>
    %570 = arith.truncf %569 : vector<32x32xf32> to vector<32x32xbf16>
    %c1_370 = arith.constant 1 : index
    %c0_371 = arith.constant 0 : index
    %c0_372 = arith.constant 0 : index
    %571 = vector.load %arg16[%c1_370, %c0_371, %c0_372] : memref<2x32x128xbf16, #tpu.memory_space<vmem>>, vector<1x32x128xbf16>
    %572 = vector.shape_cast %571 : vector<1x32x128xbf16> to vector<32x128xbf16>
    %cst_373 = arith.constant dense<0.000000e+00> : vector<32x128xf32>
    %573 = tpu.matmul %570, %572, %cst_373 {dimension_numbers = #tpu.dot_dimension_numbers<[1], [0], [0], [1], [0, 0, 1, 1], [], []>} : vector<32x32xbf16>, vector<32x128xbf16>, vector<32x128xf32> -> vector<32x128xf32>
    %c1_374 = arith.constant 1 : index
    %c0_375 = arith.constant 0 : index
    %c0_376 = arith.constant 0 : index
    %574 = vector.load %arg17[%c1_374, %c0_375, %c0_376] : memref<2x1x128xf32, #tpu.memory_space<vmem>>, vector<1x1x128xf32>
    %575 = vector.shape_cast %574 : vector<1x1x128xf32> to vector<1x128xf32>
    %576 = vector.broadcast %575 : vector<1x128xf32> to vector<32x128xf32>
    %577 = arith.addf %573, %576 : vector<32x128xf32>
    %578 = arith.mulf %577, %577 : vector<32x128xf32>
    %579 = arith.mulf %577, %578 : vector<32x128xf32>
    %cst_377 = arith.constant 4.471500e-02 : f32
    %580 = vector.broadcast %cst_377 : f32 to vector<32x128xf32>
    %581 = arith.mulf %580, %579 : vector<32x128xf32>
    %582 = arith.addf %577, %581 : vector<32x128xf32>
    %cst_378 = arith.constant 0.797884583 : f32
    %583 = vector.broadcast %cst_378 : f32 to vector<32x128xf32>
    %584 = arith.mulf %583, %582 : vector<32x128xf32>
    %585 = math.tanh %584 : vector<32x128xf32>
    %cst_379 = arith.constant 1.000000e+00 : f32
    %586 = vector.broadcast %cst_379 : f32 to vector<32x128xf32>
    %587 = arith.addf %586, %585 : vector<32x128xf32>
    %cst_380 = arith.constant 5.000000e-01 : f32
    %588 = vector.broadcast %cst_380 : f32 to vector<32x128xf32>
    %589 = arith.mulf %588, %587 : vector<32x128xf32>
    %590 = arith.mulf %577, %589 : vector<32x128xf32>
    %591 = arith.truncf %590 : vector<32x128xf32> to vector<32x128xbf16>
    %c1_381 = arith.constant 1 : index
    %c0_382 = arith.constant 0 : index
    %c0_383 = arith.constant 0 : index
    %592 = vector.load %arg18[%c1_381, %c0_382, %c0_383] : memref<2x128x32xbf16, #tpu.memory_space<vmem>>, vector<1x128x32xbf16>
    %593 = vector.shape_cast %592 : vector<1x128x32xbf16> to vector<128x32xbf16>
    %cst_384 = arith.constant dense<0.000000e+00> : vector<32x32xf32>
    %594 = tpu.matmul %591, %593, %cst_384 {dimension_numbers = #tpu.dot_dimension_numbers<[1], [0], [0], [1], [0, 0, 1, 1], [], []>} : vector<32x128xbf16>, vector<128x32xbf16>, vector<32x32xf32> -> vector<32x32xf32>
    %c1_385 = arith.constant 1 : index
    %c0_386 = arith.constant 0 : index
    %c0_387 = arith.constant 0 : index
    %595 = vector.load %arg19[%c1_385, %c0_386, %c0_387] : memref<2x1x32xf32, #tpu.memory_space<vmem>>, vector<1x1x32xf32>
    %596 = vector.shape_cast %595 : vector<1x1x32xf32> to vector<1x32xf32>
    %597 = vector.broadcast %596 : vector<1x32xf32> to vector<32x32xf32>
    %598 = arith.addf %594, %597 : vector<32x32xf32>
    %599 = arith.addf %569, %598 : vector<32x32xf32>
    %c1_388 = arith.constant 1 : index
    %c0_389 = arith.constant 0 : index
    %c0_390 = arith.constant 0 : index
    %600 = vector.load %arg20[%c1_388, %c0_389, %c0_390] : memref<2x1x32xf32, #tpu.memory_space<vmem>>, vector<1x1x32xf32>
    %601 = vector.shape_cast %600 : vector<1x1x32xf32> to vector<1x32xf32>
    %c1_391 = arith.constant 1 : index
    %c0_392 = arith.constant 0 : index
    %c0_393 = arith.constant 0 : index
    %602 = vector.load %arg21[%c1_391, %c0_392, %c0_393] : memref<2x1x32xf32, #tpu.memory_space<vmem>>, vector<1x1x32xf32>
    %603 = vector.shape_cast %602 : vector<1x1x32xf32> to vector<1x32xf32>
    %cst_394 = arith.constant dense<0.000000e+00> : vector<32xf32>
    %604 = vector.multi_reduction <add>, %599, %cst_394 [1] : vector<32x32xf32> to vector<32xf32>
    %605 = vector.shape_cast %604 : vector<32xf32> to vector<32x1xf32>
    %cst_395 = arith.constant 3.200000e+01 : f32
    %606 = vector.broadcast %cst_395 : f32 to vector<32x1xf32>
    %607 = arith.divf %605, %606 : vector<32x1xf32>
    %608 = vector.broadcast %607 : vector<32x1xf32> to vector<32x32xf32>
    %609 = arith.subf %599, %608 : vector<32x32xf32>
    %610 = arith.mulf %609, %609 : vector<32x32xf32>
    %cst_396 = arith.constant dense<0.000000e+00> : vector<32xf32>
    %611 = vector.multi_reduction <add>, %610, %cst_396 [1] : vector<32x32xf32> to vector<32xf32>
    %612 = vector.shape_cast %611 : vector<32xf32> to vector<32x1xf32>
    %cst_397 = arith.constant 3.200000e+01 : f32
    %613 = vector.broadcast %cst_397 : f32 to vector<32x1xf32>
    %614 = arith.divf %612, %613 : vector<32x1xf32>
    %615 = vector.broadcast %607 : vector<32x1xf32> to vector<32x32xf32>
    %616 = arith.subf %599, %615 : vector<32x32xf32>
    %cst_398 = arith.constant 9.99999974E-6 : f32
    %617 = vector.broadcast %cst_398 : f32 to vector<32x1xf32>
    %618 = arith.addf %614, %617 : vector<32x1xf32>
    %619 = math.rsqrt %618 : vector<32x1xf32>
    %620 = vector.broadcast %619 : vector<32x1xf32> to vector<32x32xf32>
    %621 = arith.mulf %616, %620 : vector<32x32xf32>
    %622 = vector.broadcast %601 : vector<1x32xf32> to vector<32x32xf32>
    %623 = arith.mulf %621, %622 : vector<32x32xf32>
    %624 = vector.broadcast %603 : vector<1x32xf32> to vector<32x32xf32>
    %625 = arith.addf %623, %624 : vector<32x32xf32>
    %626 = vector.shape_cast %625 : vector<32x32xf32> to vector<4x8x32xf32>
    %627 = vector.extract_strided_slice %626 {offsets = [0, 0, 0], sizes = [4, 1, 32], strides = [1, 1, 1]} : vector<4x8x32xf32> to vector<4x1x32xf32>
    %628 = vector.shape_cast %627 : vector<4x1x32xf32> to vector<4x32xf32>
    %629 = arith.truncf %628 : vector<4x32xf32> to vector<4x32xbf16>
    %c0_399 = arith.constant 0 : index
    %c0_400 = arith.constant 0 : index
    %630 = vector.load %arg22[%c0_399, %c0_400] : memref<32x32xbf16, #tpu.memory_space<vmem>>, vector<32x32xbf16>
    %cst_401 = arith.constant dense<0.000000e+00> : vector<4x32xf32>
    %631 = tpu.matmul %629, %630, %cst_401 {dimension_numbers = #tpu.dot_dimension_numbers<[1], [0], [0], [1], [0, 0, 1, 1], [], []>} : vector<4x32xbf16>, vector<32x32xbf16>, vector<4x32xf32> -> vector<4x32xf32>
    %c0_402 = arith.constant 0 : index
    %c0_403 = arith.constant 0 : index
    %632 = vector.load %arg23[%c0_402, %c0_403] : memref<1x32xf32, #tpu.memory_space<vmem>>, vector<1x32xf32>
    %633 = vector.broadcast %632 : vector<1x32xf32> to vector<4x32xf32>
    %634 = arith.addf %631, %633 : vector<4x32xf32>
    %c0_404 = arith.constant 0 : index
    %c0_405 = arith.constant 0 : index
    %635 = vector.load %arg24[%c0_404, %c0_405] : memref<1x32xf32, #tpu.memory_space<vmem>>, vector<1x32xf32>
    %c0_406 = arith.constant 0 : index
    %c0_407 = arith.constant 0 : index
    %636 = vector.load %arg25[%c0_406, %c0_407] : memref<1x32xf32, #tpu.memory_space<vmem>>, vector<1x32xf32>
    %cst_408 = arith.constant dense<0.000000e+00> : vector<4xf32>
    %637 = vector.multi_reduction <add>, %634, %cst_408 [1] : vector<4x32xf32> to vector<4xf32>
    %638 = vector.shape_cast %637 : vector<4xf32> to vector<4x1xf32>
    %cst_409 = arith.constant 3.200000e+01 : f32
    %639 = vector.broadcast %cst_409 : f32 to vector<4x1xf32>
    %640 = arith.divf %638, %639 : vector<4x1xf32>
    %641 = vector.broadcast %640 : vector<4x1xf32> to vector<4x32xf32>
    %642 = arith.subf %634, %641 : vector<4x32xf32>
    %643 = arith.mulf %642, %642 : vector<4x32xf32>
    %cst_410 = arith.constant dense<0.000000e+00> : vector<4xf32>
    %644 = vector.multi_reduction <add>, %643, %cst_410 [1] : vector<4x32xf32> to vector<4xf32>
    %645 = vector.shape_cast %644 : vector<4xf32> to vector<4x1xf32>
    %cst_411 = arith.constant 3.200000e+01 : f32
    %646 = vector.broadcast %cst_411 : f32 to vector<4x1xf32>
    %647 = arith.divf %645, %646 : vector<4x1xf32>
    %648 = vector.broadcast %640 : vector<4x1xf32> to vector<4x32xf32>
    %649 = arith.subf %634, %648 : vector<4x32xf32>
    %cst_412 = arith.constant 9.99999974E-6 : f32
    %650 = vector.broadcast %cst_412 : f32 to vector<4x1xf32>
    %651 = arith.addf %647, %650 : vector<4x1xf32>
    %652 = math.rsqrt %651 : vector<4x1xf32>
    %653 = vector.broadcast %652 : vector<4x1xf32> to vector<4x32xf32>
    %654 = arith.mulf %649, %653 : vector<4x32xf32>
    %655 = vector.broadcast %635 : vector<1x32xf32> to vector<4x32xf32>
    %656 = arith.mulf %654, %655 : vector<4x32xf32>
    %657 = vector.broadcast %636 : vector<1x32xf32> to vector<4x32xf32>
    %658 = arith.addf %656, %657 : vector<4x32xf32>
    %c0_413 = arith.constant 0 : index
    %c0_414 = arith.constant 0 : index
    %659 = vector.load %arg26[%c0_413, %c0_414] : memref<32x32xbf16, #tpu.memory_space<vmem>>, vector<32x32xbf16>
    %cst_415 = arith.constant dense<0.000000e+00> : vector<4x32xf32>
    %660 = tpu.matmul %629, %659, %cst_415 {dimension_numbers = #tpu.dot_dimension_numbers<[1], [0], [0], [1], [0, 0, 1, 1], [], []>} : vector<4x32xbf16>, vector<32x32xbf16>, vector<4x32xf32> -> vector<4x32xf32>
    %c0_416 = arith.constant 0 : index
    %c0_417 = arith.constant 0 : index
    %661 = vector.load %arg27[%c0_416, %c0_417] : memref<1x32xf32, #tpu.memory_space<vmem>>, vector<1x32xf32>
    %662 = vector.broadcast %661 : vector<1x32xf32> to vector<4x32xf32>
    %663 = arith.addf %660, %662 : vector<4x32xf32>
    %664 = math.tanh %663 : vector<4x32xf32>
    %665 = arith.truncf %664 : vector<4x32xf32> to vector<4x32xbf16>
    %c0_418 = arith.constant 0 : index
    %c0_419 = arith.constant 0 : index
    %666 = vector.load %arg28[%c0_418, %c0_419] : memref<32x96xbf16, #tpu.memory_space<vmem>>, vector<32x96xbf16>
    %cst_420 = arith.constant dense<0.000000e+00> : vector<4x96xf32>
    %667 = tpu.matmul %665, %666, %cst_420 {dimension_numbers = #tpu.dot_dimension_numbers<[1], [0], [0], [1], [0, 0, 1, 1], [], []>} : vector<4x32xbf16>, vector<32x96xbf16>, vector<4x96xf32> -> vector<4x96xf32>
    %c0_421 = arith.constant 0 : index
    %c0_422 = arith.constant 0 : index
    %668 = vector.load %arg29[%c0_421, %c0_422] : memref<1x96xf32, #tpu.memory_space<vmem>>, vector<1x96xf32>
    %669 = vector.broadcast %668 : vector<1x96xf32> to vector<4x96xf32>
    %670 = arith.addf %667, %669 : vector<4x96xf32>
    %671 = tpu.concatenate %658, %670 in 1 : vector<4x32xf32>, vector<4x96xf32> -> vector<4x128xf32>
    %c0_423 = arith.constant 0 : index
    %c0_424 = arith.constant 0 : index
    %672 = vector.load %arg30[%c0_423, %c0_424] : memref<4x128xf32, #tpu.memory_space<vmem>>, vector<4x128xf32>
    tpu.vector_store %arg30[%c0_423, %c0_424], %671 {strides = array<i32>} : memref<4x128xf32, #tpu.memory_space<vmem>>, vector<4x128xf32>,
    return
  }
}

</mosaic_0001>

<bundles_post_ra>
// kernel: _fused_encode.1
= control target key start
LH: loop header
LB: loop body
LE: loop exit
PB: predicated region body
PF: predicated region fallthrough
CT: control target
= control target key end

     0   :  { %v128_v0 = vlaneseq  ;;  %s5322_s6 = smov 2   ;;  %vm178_vm0 = vcmask 523264   ;;  %v5323_v18 = vmov 0.0   ;;  %s5324_s10 = smov 3   ;;  %vm227_vm5 = vcmask 261120   ;;  %s6341_s0 = inlined_call_operand.smem [shape: u32[31], index: -1, kind: input, shape index: {}] }
   0x1   :  { %s1_s5 = sld [smem:[%s6341_s0]]   ;;  %s5325_s14 = smov 4   ;;  %v5327_v38 = vmov 32.0  }
   0x2   :  { %v132_v1 = vshrl.u32 %v128_v0, 7  ;;  %s5366_s9 = sld [smem:[%s6341_s0 + %s5322_s6]]   ;;  %v129_v15 = vand.u32 127, %v128_v0  ;;  %s5326_s18 = smov 5   ;;  %5132 = vrcp.f32 %v5327_v38 }
   0x3   :  { %s4364_s13 = sld [smem:[%s6341_s0 + %s5324_s10]]   ;;  %s5328_s22 = smov 9  }
   0x4   :  { %5085 = vset.pattern.permute.xlu0 %v132_v1  ;;  %5086 = vset.pattern.permute.xlu1 %v132_v1  ;;  %s5389_s17 = sld [smem:[%s6341_s0 + %s5325_s14]]   ;;  %s5329_s26 = smov 6  }
   0x5   :  { %s5395_s21 = sld [smem:[%s6341_s0 + %s5326_s18]]   ;;  %s5330_s30 = smov 7  }
   0x6   :  { %s5426_s25 = sld [smem:[%s6341_s0 + %s5328_s22]]   ;;  %s5331_s4 = smov 8  }
   0x7   :  { %v127_v2 = vld [vmem:[%s1_s5] sm:$0xf]  ;;  %s5431_s29 = sld [smem:[%s6341_s0 + %s5329_s26]]   ;;  %s5332_s8 = smov 10  }
   0x8   :  { %v130_v3 = vperm.slane %v127_v2, 0  ;;  %v151_v4 = vperm.slane %v127_v2, 3  ;;  %v177_v5 = vld [vmem:[%s5366_s9 + $0x38] sm:$0xff]  ;;  %v176_v6 = vld [vmem:[%s5366_s9 + $0x30] sm:$0xff]  ;;  %v175_v7 = vld [vmem:[%s5366_s9 + $0x28] sm:$0xff]  ;;  %v137_v10 = vperm.slane %v127_v2, 1  ;;  %v5133_v39 = vpop.eup %5132  ;;  %s5436_s3 = sld [smem:[%s6341_s0 + %s5330_s30]]  }
   0x9   :  { %199 = vmatpush.msra.mxu0 %v177_v5  ;;  %5044 = vmatpush.msra.mxu3 %v177_v5  ;;  %v174_v8 = vld [vmem:[%s5366_s9 + $0x20] sm:$0xff]  ;;  %v173_v9 = vld [vmem:[%s5366_s9 + $0x18] sm:$0xff]  ;;  %v144_v11 = vperm.slane %v127_v2, 2  ;;  %v172_v12 = vld [vmem:[%s5366_s9 + $0x10] sm:$0xff]  ;;  %v241_v40 = vmul.f32 32.0, %v5133_v39  ;;  %vm245_vm6 = vweird.f32 %v5133_v39  ;;  %s5441_s7 = sld [smem:[%s6341_s0 + %s5331_s4]]   ;;  %s5333_s12 = smov 11  }
   0xa   :  { %v171_v13 = vld [vmem:[%s5366_s9 + $0x8] sm:$0xff]  ;;  %v170_v14 = vld [vmem:[%s5366_s9] sm:$0xff]  ;;  %s5464_s11 = sld [smem:[%s6341_s0 + %s5332_s8]]   ;;  %s5334_s16 = smov 1  }
   0xb   :  { %200 = vmatpush.msra.mxu0 %v176_v6  ;;  %5045 = vmatpush.msra.mxu3 %v176_v6  ;;  %v220_v25 = vld [vmem:[%s4364_s13] sm:$0xff]  ;;  %v242_v41 = vsub.f32 1.0, %v241_v40  ;;  %s5473_s15 = sld [smem:[%s6341_s0 + %s5333_s12]]   ;;  %s5335_s20 = smov 12  }
   0xc   :  { %135 = vperm.xlu0 %5085, %v130_v3   ;;  %156 = vperm.xlu1 %5086, %v151_v4   ;;  %v5088_v38 = vld [vmem:[%s5395_s21] ss:$0 sm:$0xff]  ;;  %s4362_s19 = sld [smem:[%s6341_s0 + %s5334_s16]]   ;;  %s5336_s24 = smov 13  }
   0xd   :  { %201 = vmatpush.msra.mxu0 %v175_v7  ;;  %5046 = vmatpush.msra.mxu3 %v175_v7  ;;  %v243_v42 = vmul.f32 %v5133_v39, %v242_v41  ;;  %v4971_v1 = vld [vmem:[%s5431_s29 + $0x8] sm:$0xff]  ;;  %v4970_v6 = vld [vmem:[%s5431_s29] sm:$0xff]  ;;  %s5612_s23 = sld [smem:[%s6341_s0 + %s5335_s20]]   ;;  %s5337_s30 = smov 14  }
   0xe   :  { %v4973_v2 = vld [vmem:[%s5436_s3 + $0x8] sm:$0xff]  ;;  %384 = vmatpush.bf16.msra.mxu1 %v4971_v1  ;;  %v4972_v7 = vld [vmem:[%s5436_s3] sm:$0xff]  ;;  %s5753_s28 = sld [smem:[%s6341_s0 + %s5336_s24]]   ;;  %s5338_s5 = smov 15  }
   0xf   :  { %202 = vmatpush.msra.mxu0 %v174_v8  ;;  %5047 = vmatpush.msra.mxu3 %v174_v8  ;;  %v244_v43 = vadd.f32 %v5133_v39, %v243_v42  ;;  %v4975_v3 = vld [vmem:[%s5441_s7 + $0x8] sm:$0xff]  ;;  %v4974_v8 = vld [vmem:[%s5441_s7] sm:$0xff]  ;;  %s5770_s4 = sld [smem:[%s6341_s0 + %s5337_s30]]   ;;  %s5339_s10 = smov 16  }
  0x10   :  { %423 = vmatpush.bf16.msra.mxu2 %v4973_v2  ;;  %s5775_s9 = sld [smem:[%s6341_s0 + %s5338_s5]]   ;;  %s5340_s16 = smov 17  }
  0x11   :  { %203 = vmatpush.msra.mxu0 %v173_v9  ;;  %5048 = vmatpush.msra.mxu3 %v173_v9  ;;  %v5397_v44 = vsel %vm245_vm6, %v5133_v39, %v244_v43  ;;  %v5091_v2 = vld [vmem:[%s5473_s15] ss:$0 sm:$0xff]  ;;  %s5800_s14 = sld [smem:[%s6341_s0 + %s5339_s10]]   ;;  %s5341_s20 = smov 18  }
  0x12   :  { %385 = vmatpush.bf16.msra.mxu1 %v4970_v6  ;;  %s5838_s24 = sld [smem:[%s6341_s0 + %s5341_s20]]   ;;  %s5342_s26 = smov 19  }
  0x13   :  { %204 = vmatpush.msra.mxu0 %v172_v12  ;;  %5049 = vmatpush.msra.mxu3 %v172_v12  ;;  %s5862_s1 = sld [smem:[%s6341_s0 + %s5342_s26]]   ;;  %s5343_s2 = smov 20  }
  0x14   :  { %142 = vperm.xlu0 %5085, %v137_v10   ;;  %149 = vperm.xlu1 %5086, %v144_v11   ;;  %s5872_s8 = sld [smem:[%s6341_s0 + %s5343_s2]]   ;;  %s5344_s10 = smov 21  }
  0x15   :  { %205 = vmatpush.msra.mxu0 %v171_v13  ;;  %5050 = vmatpush.msra.mxu3 %v171_v13  ;;  %s5348_s18 = smov 27   ;;  %s5349_s22 = smov 28  }
  0x16   :  { %424 = vmatpush.bf16.msra.mxu2 %v4972_v7  ;;  %v5089_v7 = vld [vmem:[%s5426_s25] ss:$0 sm:$0xff]  ;;  %s4388_s21 = sld [smem:[%s6341_s0 + %s5348_s18]]   ;;  %s5350_s30 = smov 29  }
  0x17   :  { %206 = vmatpush.msra.mxu0 %v170_v14  ;;  %5051 = vmatpush.msra.mxu3 %v170_v14  ;;  %s4389_s27 = sld [smem:[%s6341_s0 + %s5349_s22]]   ;;  %s5351_s6 = smov 24  }
  0x18   :  { %s4390_s5 = sld [smem:[%s6341_s0 + %s5350_s30]]   ;;  %s5352_s13 = smov 25  }
  0x19   :  { %462 = vmatpush.bf16.msrb.mxu3 %v4975_v3  ;;  %s4385_s12 = sld [smem:[%s6341_s0 + %s5351_s6]]  }
  0x1d   :  { %463 = vmatpush.bf16.msrb.mxu3 %v4974_v8 }
  0x7e   :  { %v136_v16 = vpop.permute.xlu0 %135  ;;  %v157_v17 = vpop.permute.xlu1 %156 }
  0x7f   :  { %vm158_vm1 = vcmp.eq.s32.totalorder %v136_v16, %v129_v15  ;;  %vm161_vm2 = vcmp.eq.s32.totalorder %v157_v17, %v129_v15 }
  0x80   :  { %v4392_v19 = vsel %vm158_vm1, 1.0, %v5323_v18  ;;  %v4395_v20 = vsel %vm161_vm2, 1.0, %v5323_v18 }
  0x81   :  { %4396 = vmatmul.msk.f32.vlgmr.msra.gmra.mxu0 %vm178_vm0, %v4392_v19  ;;  %4399 = vmatmul.msk.f32.vlgmr.msra.gmra.mxu3 %vm178_vm0, %v4395_v20 }
  0x86   :  { %v143_v21 = vpop.permute.xlu0 %142  ;;  %v150_v23 = vpop.permute.xlu1 %149 }
  0x87   :  { %vm159_vm3 = vcmp.eq.s32.totalorder %v143_v21, %v129_v15  ;;  %vm160_vm4 = vcmp.eq.s32.totalorder %v150_v23, %v129_v15 }
  0x88   :  { %v4393_v22 = vsel %vm159_vm3, 1.0, %v5323_v18  ;;  %v4394_v24 = vsel %vm160_vm4, 1.0, %v5323_v18  ;;  %vm483_vm3 = vcmask 64512   ;;  %vm635_vm4 = vcmask 1043456  }
  0x89   :  { %4397 = vmatmul.msk.f32.gmra.mxu0 %vm178_vm0, %v4393_v22 }
  0x91   :  { %4398 = vmatmul.msk.f32.gmra.mxu0 %vm178_vm0, %v4394_v24 }
  0xfe   :  { %v208_v26 = vpop.f32.mrf.mxu0 }
  0xff   :  { %v221_v27 = vadd.f32 %v220_v25, %v208_v26 }
 0x101   :  { %v228_v28 = vsel %vm227_vm5, %v221_v27, 0.0 }
 0x102   :  { %229 = vadd.xlane.f32.xlu2 %v228_v28 }
 0x104   :  { %v217_v34 = vpop.f32.mrf.mxu3 }
 0x105   :  { %v224_v36 = vadd.f32 %v220_v25, %v217_v34 }
 0x106   :  { %v211_v29 = vpop.f32.mrf.mxu0 }
 0x107   :  { %v222_v30 = vadd.f32 %v220_v25, %v211_v29  ;;  %v237_v37 = vsel %vm227_vm5, %v224_v36, 0.0 }
 0x109   :  { %v231_v31 = vsel %vm227_vm5, %v222_v30, 0.0 }
 0x10a   :  { %232 = vadd.xlane.f32.xlu2 %v231_v31  ;;  %v5087_v31 = vld [vmem:[%s5389_s17] ss:$0 sm:$0xff] }
 0x10e   :  { %v214_v32 = vpop.f32.mrf.mxu0 }
 0x10f   :  { %v223_v33 = vadd.f32 %v220_v25, %v214_v32 }
 0x111   :  { %v234_v35 = vsel %vm227_vm5, %v223_v33, 0.0 }
 0x112   :  { %235 = vadd.xlane.f32.xlu2 %v234_v35 }
 0x11a   :  { %238 = vadd.xlane.f32.xlu2 %v237_v37 }
 0x175   :  { %v230_v45 = vpop.xlane.xlu2 %229 }
 0x176   :  { %v247_v46 = vmul.f32 %v5397_v44, %v230_v45 }
 0x178   :  { %v5400_v47 = vsub.f32 %v221_v27, %v247_v46 }
 0x17a   :  { %v255_v48 = vmul.f32 %v5400_v47, %v5400_v47 }
 0x17c   :  { %v259_v49 = vsel %vm227_vm5, %v255_v48, 0.0 }
 0x17d   :  { %260 = vadd.xlane.f32.xlu0 %v259_v49  ;;  %v233_v50 = vpop.xlane.xlu2 %232 }
 0x17e   :  { %v248_v51 = vmul.f32 %v5397_v44, %v233_v50 }
 0x180   :  { %v5406_v52 = vsub.f32 %v222_v30, %v248_v51 }
 0x182   :  { %v256_v53 = vmul.f32 %v5406_v52, %v5406_v52 }
 0x184   :  { %v262_v54 = vsel %vm227_vm5, %v256_v53, 0.0 }
 0x185   :  { %263 = vadd.xlane.f32.xlu1 %v262_v54  ;;  %v236_v55 = vpop.xlane.xlu2 %235 }
 0x186   :  { %v249_v56 = vmul.f32 %v5397_v44, %v236_v55 }
 0x188   :  { %v5412_v57 = vsub.f32 %v223_v33, %v249_v56 }
 0x18a   :  { %v257_v58 = vmul.f32 %v5412_v57, %v5412_v57 }
 0x18c   :  { %v265_v59 = vsel %vm227_vm5, %v257_v58, 0.0 }
 0x18d   :  { %266 = vadd.xlane.f32.xlu2 %v265_v59  ;;  %v239_v60 = vpop.xlane.xlu2 %238 }
 0x18e   :  { %v250_v61 = vmul.f32 %v5397_v44, %v239_v60 }
 0x190   :  { %v5418_v62 = vsub.f32 %v224_v36, %v250_v61 }
 0x192   :  { %v258_v63 = vmul.f32 %v5418_v62, %v5418_v62 }
 0x194   :  { %v268_v0 = vsel %vm227_vm5, %v258_v63, 0.0 }
 0x195   :  { %269 = vadd.xlane.f32.xlu2 %v268_v0 }
 0x1f0   :  { %v261_v4 = vpop.xlane.xlu0 %260 }
 0x1f1   :  { %v271_v5 = vmul.f32 %v261_v4, %v5397_v44 }
 0x1f3   :  { %v275_v9 = vadd.f32 1e-05, %v271_v5 }
 0x1f5   :  { %5134 = vrsqrt.f32 %v275_v9  ;;  %vm285_vm8 = vweird.f32 %v275_v9 }
 0x1f8   :  { %v264_v10 = vpop.xlane.xlu1 %263 }
 0x1f9   :  { %v272_v11 = vmul.f32 %v264_v10, %v5397_v44 }
 0x1fb   :  { %v5135_v12 = vpop.eup %5134  ;;  %v276_v13 = vadd.f32 1e-05, %v272_v11 }
 0x1fc   :  { %v280_v14 = vmul.f32 %v5135_v12, %v275_v9  ;;  %vm286_vm7 = vweird.f32 %v5135_v12 }
 0x1fd   :  { %5136 = vrsqrt.f32 %v276_v13  ;;  %vm287_vm9 = vmor %vm285_vm8, %vm286_vm7  ;;  %vm295_vm11 = vweird.f32 %v276_v13 }
 0x1fe   :  { %v281_v15 = vmul.f32 %v5135_v12, %v280_v14 }
 0x200   :  { %v282_v16 = vmul.f32 0.5, %v281_v15  ;;  %v267_v17 = vpop.xlane.xlu2 %266 }
 0x201   :  { %v273_v18 = vmul.f32 %v267_v17, %v5397_v44 }
 0x202   :  { %v283_v19 = vsub.f32 1.5, %v282_v16 }
 0x203   :  { %v5137_v20 = vpop.eup %5136  ;;  %v277_v21 = vadd.f32 1e-05, %v273_v18 }
 0x204   :  { %v284_v22 = vmul.f32 %v5135_v12, %v283_v19  ;;  %v290_v23 = vmul.f32 %v5137_v20, %v276_v13  ;;  %vm296_vm10 = vweird.f32 %v5137_v20 }
 0x205   :  { %5138 = vrsqrt.f32 %v277_v21  ;;  %vm297_vm12 = vmor %vm295_vm11, %vm296_vm10  ;;  %vm305_vm14 = vweird.f32 %v277_v21 }
 0x206   :  { %v291_v24 = vmul.f32 %v5137_v20, %v290_v23  ;;  %v288_v25 = vsel %vm287_vm9, %v5135_v12, %v284_v22 }
 0x207   :  { %v319_v32 = vmul.f32 %v288_v25, %v5400_v47 }
 0x208   :  { %v292_v26 = vmul.f32 0.5, %v291_v24  ;;  %v270_v27 = vpop.xlane.xlu2 %269 }
 0x209   :  { %v274_v28 = vmul.f32 %v270_v27, %v5397_v44  ;;  %v326_v39 = vmul.f32 %v5087_v31, %v319_v32 }
 0x20a   :  { %v293_v29 = vsub.f32 1.5, %v292_v26 }
 0x20b   :  { %v5139_v30 = vpop.eup %5138  ;;  %v278_v33 = vadd.f32 1e-05, %v274_v28  ;;  %v5457_v46 = vadd.f32 %v5088_v38, %v326_v39 }
 0x20c   :  { %v294_v34 = vmul.f32 %v5137_v20, %v293_v29  ;;  %v300_v35 = vmul.f32 %v5139_v30, %v277_v21  ;;  %vm306_vm13 = vweird.f32 %v5139_v30 }
 0x20d   :  { %5140 = vrsqrt.f32 %v278_v33  ;;  %vm307_vm15 = vmor %vm305_vm14, %vm306_vm13  ;;  %vm315_vm1 = vweird.f32 %v278_v33 }
 0x20e   :  { %v298_v36 = vsel %vm297_vm12, %v5137_v20, %v294_v34  ;;  %v301_v37 = vmul.f32 %v5139_v30, %v300_v35 }
 0x20f   :  { %v320_v40 = vmul.f32 %v298_v36, %v5406_v52 }
 0x210   :  { %v302_v41 = vmul.f32 0.5, %v301_v37 }
 0x211   :  { %v327_v42 = vmul.f32 %v5087_v31, %v320_v40 }
 0x212   :  { %v303_v43 = vsub.f32 1.5, %v302_v41 }
 0x213   :  { %v5141_v45 = vpop.eup %5140  ;;  %v5459_v48 = vadd.f32 %v5088_v38, %v327_v42 }
 0x214   :  { %v304_v47 = vmul.f32 %v5139_v30, %v303_v43  ;;  %v310_v49 = vmul.f32 %v5141_v45, %v278_v33  ;;  %vm316_vm0 = vweird.f32 %v5141_v45 }
 0x215   :  { %v5468_v50 = vpack.c.bf16 %v5459_v48, %v5457_v46  ;;  %vm317_vm2 = vmor %vm315_vm1, %vm316_vm0 }
 0x216   :  { %v311_v51 = vmul.f32 %v5141_v45, %v310_v49  ;;  %v308_v52 = vsel %vm307_vm15, %v5139_v30, %v304_v47 }
 0x217   :  { %4408 = vmatmul.msk.bf16.vlgmr.msra.gmra.mxu1 %vm227_vm5, %v5468_v50  ;;  %4418 = vmatmul.msk.bf16.vlgmr.msra.gmra.mxu2 %vm227_vm5, %v5468_v50  ;;  %v321_v55 = vmul.f32 %v308_v52, %v5412_v57  ;;  %v5090_v57 = vld [vmem:[%s5464_s11] ss:$0 sm:$0xff] }
 0x218   :  { %v312_v53 = vmul.f32 0.5, %v311_v51  ;;  %4428 = vmatmul.msk.bf16.vlgmr.msrb.gmra.mxu3 %vm227_vm5, %v5468_v50  ;;  %v337_v52 = vld [vmem:[%s4362_s19] sm:$0xf]  ;;  %s5829_s19 = sld [smem:[%s6341_s0 + %s5340_s16]]  }
 0x219   :  { %v328_v59 = vmul.f32 %v5087_v31, %v321_v55  ;;  %s5877_s16 = sld [smem:[%s6341_s0 + %s5344_s10]]  }
 0x21a   :  { %v313_v54 = vsub.f32 1.5, %v312_v53  ;;  %v338_v53 = vsub.f32 1.0, %v337_v52 }
 0x21b   :  { %v5483_v63 = vadd.f32 %v5088_v38, %v328_v59 }
 0x21c   :  { %v314_v56 = vmul.f32 %v5141_v45, %v313_v54  ;;  %v340_v54 = vrot.slane %v338_v53, 1 }
 0x21e   :  { %v318_v58 = vsel %vm317_vm2, %v5141_v45, %v314_v56  ;;  %v347_v56 = vmul.f32 -1e+09, %v340_v54 }
 0x21f   :  { %v322_v60 = vmul.f32 %v318_v58, %v5418_v62 }
 0x220   :  { %v5515_v58 = vperm.slane %v347_v56, 0 }
 0x221   :  { %v329_v61 = vmul.f32 %v5087_v31, %v322_v60 }
 0x223   :  { %v5485_v0 = vadd.f32 %v5088_v38, %v329_v61  ;;  %v346_v61 = vmul.f32 -1e+09, %v338_v53 }
 0x225   :  { %v5489_v1 = vpack.c.bf16 %v5485_v0, %v5483_v63 }
 0x227   :  { %4409 = vmatmul.msk.bf16.gmra.mxu1 %vm227_vm5, %v5489_v1  ;;  %4419 = vmatmul.msk.bf16.gmra.mxu2 %vm227_vm5, %v5489_v1 }
 0x228   :  { %4429 = vmatmul.msk.bf16.gmra.mxu3 %vm227_vm5, %v5489_v1 }
 0x294   :  { %v387_v62 = vpop.f32.mrf.mxu1 }
 0x295   :  { %v388_v12 = vadd.f32 %v5089_v7, %v387_v62 }
 0x297   :  { %v475_v18 = vpack.c.bf16 %v388_v12, %v388_v12 }
 0x29a   :  { %v426_v3 = vpop.f32.mrf.mxu2 }
 0x29b   :  { %v427_v4 = vadd.f32 %v5090_v57, %v426_v3  ;;  %v465_v5 = vpop.f32.mrf.mxu3  ;;  %v5519_v3 = vperm.slane %v346_v61, 0 }
 0x29c   :  { %v466_v6 = vadd.f32 %v5091_v2, %v465_v5  ;;  %v389_v13 = vpop.f32.mrf.mxu1 }
 0x29d   :  { %v479_v8 = vpack.c.bf16 %v427_v4, %v427_v4  ;;  %v390_v23 = vadd.f32 %v5089_v7, %v389_v13  ;;  %v341_v4 = vrot.slane %v338_v53, 2 }
 0x29e   :  { %v628_v9 = vpack.c.bf16 %v466_v6, %v466_v6 }
 0x29f   :  { %v488_v10 = vsel %vm483_vm3, %v479_v8, 0  ;;  %v476_v29 = vpack.c.bf16 %v390_v23, %v390_v23  ;;  %v348_v8 = vmul.f32 -1e+09, %v341_v4 }
 0x2a0   :  { %v637_v11 = vsel %vm635_vm4, %v628_v9, 0  ;;  %497 = vmatpush.bf16.xpose.msrb.mxu1 %v488_v10 }
 0x2a1   :  { %v5523_v12 = vperm.slane %v348_v8, 0 }
 0x2a2   :  { %v428_v14 = vpop.f32.mrf.mxu2 }
 0x2a3   :  { %v429_v15 = vadd.f32 %v5090_v57, %v428_v14  ;;  %v467_v16 = vpop.f32.mrf.mxu3 }
 0x2a4   :  { %v468_v17 = vadd.f32 %v5091_v2, %v467_v16  ;;  %v392_v27 = vpop.f32.mrf.mxu1 }
 0x2a5   :  { %v480_v19 = vpack.c.bf16 %v429_v15, %v429_v15  ;;  %v393_v34 = vadd.f32 %v5089_v7, %v392_v27 }
 0x2a6   :  { %v629_v20 = vpack.c.bf16 %v468_v17, %v468_v17 }
 0x2a7   :  { %4430 = vmatmul.msk.bf16.vlgmr.msrb.gmra.mxu1 %vm483_vm3, %v475_v18  ;;  %v507_v21 = vsel %vm483_vm3, %v480_v19, 0  ;;  %v477_v39 = vpack.c.bf16 %v393_v34, %v393_v34 }
 0x2a8   :  { %646 = vmatpush.bf16.msra.mxu1 %v637_v11  ;;  %516 = vmatpush.bf16.xpose.msrb.mxu2 %v507_v21  ;;  %v656_v22 = vsel %vm635_vm4, %v629_v20, 0  ;;  %v342_v20 = vrot.slane %v338_v53, 3 }
 0x2aa   :  { %v431_v24 = vpop.f32.mrf.mxu2 }
 0x2ab   :  { %v432_v25 = vadd.f32 %v5090_v57, %v431_v24  ;;  %v470_v26 = vpop.f32.mrf.mxu3 }
 0x2ac   :  { %v471_v28 = vadd.f32 %v5091_v2, %v470_v26  ;;  %v394_v41 = vpop.f32.mrf.mxu1 }
 0x2ad   :  { %v481_v30 = vpack.c.bf16 %v432_v25, %v432_v25  ;;  %v395_v47 = vadd.f32 %v5089_v7, %v394_v41  ;;  %v4976_v41 = vld [vmem:[%s5431_s29 + $0x10] sm:$0xff] }
 0x2ae   :  { %v630_v31 = vpack.c.bf16 %v471_v28, %v471_v28 }
 0x2af   :  { %v526_v32 = vsel %vm483_vm3, %v481_v30, 0  ;;  %4431 = vmatmul.msk.bf16.vlgmr.msrb.gmra.mxu2 %vm483_vm3, %v476_v29  ;;  %v478_v49 = vpack.c.bf16 %v395_v47, %v395_v47 }
 0x2b0   :  { %665 = vmatpush.bf16.msra.mxu2 %v656_v22  ;;  %v675_v33 = vsel %vm635_vm4, %v630_v31, 0  ;;  %535 = vmatpush.bf16.xpose.msra.mxu3 %v526_v32  ;;  %v349_v22 = vmul.f32 -1e+09, %v342_v20 }
 0x2b2   :  { %v433_v35 = vpop.f32.mrf.mxu2  ;;  %v5528_v28 = vperm.slane %v349_v22, 0  ;;  %v5093_v22 = vld [vmem:[%s5426_s25 + $0x1] ss:$0 sm:$0xff] }
 0x2b3   :  { %v434_v36 = vadd.f32 %v5090_v57, %v433_v35  ;;  %v472_v37 = vpop.f32.mrf.mxu3 }
 0x2b4   :  { %v473_v38 = vadd.f32 %v5091_v2, %v472_v37 }
 0x2b5   :  { %v482_v40 = vpack.c.bf16 %v434_v36, %v434_v36 }
 0x2b6   :  { %v631_v42 = vpack.c.bf16 %v473_v38, %v473_v38  ;;  %v4979_v38 = vld [vmem:[%s5436_s3 + $0x18] sm:$0xff] }
 0x2b7   :  { %4432 = vmatmul.msk.bf16.vlgmr.msra.gmra.mxu3 %vm483_vm3, %v477_v39  ;;  %v545_v43 = vsel %vm483_vm3, %v482_v40, 0  ;;  %781 = vmatpush.bf16.msrb.mxu2 %v4979_v38  ;;  %v4978_v39 = vld [vmem:[%s5436_s3 + $0x10] sm:$0xff]  ;;  %v4977_v40 = vld [vmem:[%s5431_s29 + $0x18] sm:$0xff] }
 0x2b8   :  { %684 = vmatpush.bf16.msrb.mxu3 %v675_v33  ;;  %554 = vmatpush.bf16.xpose.msrb.mxu0 %v545_v43  ;;  %v694_v45 = vsel %vm635_vm4, %v631_v42, 0  ;;  %v4981_v43 = vld [vmem:[%s5441_s7 + $0x18] sm:$0xff] }
 0x2b9   :  { %740 = vmatpush.bf16.msrb.mxu1 %v4977_v40 }
 0x2bb   :  { %782 = vmatpush.bf16.msrb.mxu2 %v4978_v39 }
 0x2bc   :  { %822 = vmatpush.bf16.msra.mxu3 %v4981_v43 }
 0x2bd   :  { %741 = vmatpush.bf16.msrb.mxu1 %v4976_v41 }
 0x2bf   :  { %4433 = vmatmul.msk.bf16.vlgmr.msrb.gmra.mxu0 %vm483_vm3, %v478_v49 }
 0x2c0   :  { %703 = vmatpush.bf16.msra.mxu0 %v694_v45  ;;  %v4980_v45 = vld [vmem:[%s5441_s7 + $0x10] sm:$0xff] }
 0x2c1   :  { %823 = vmatpush.bf16.msra.mxu3 %v4980_v45 }
 0x324   :  { %v499_v51 = vpop.f32.mrf.mxu1 }
 0x325   :  { %v560_v62 = vmul.f32 0.35355338, %v499_v51 }
 0x327   :  { %v576_v7 = vadd.f32 %v5519_v3, %v560_v62 }
 0x329   :  { %v580_v11 = vsel %vm483_vm3, %v576_v7, -inf }
 0x32c   :  { %v501_v55 = vpop.f32.mrf.mxu1 }
 0x332   :  { %v518_v59 = vpop.f32.mrf.mxu2 }
 0x333   :  { %v561_v60 = vmul.f32 0.35355338, %v518_v59 }
 0x335   :  { %v577_v57 = vadd.f32 %v5515_v58, %v561_v60 }
 0x337   :  { %v583_v2 = vsel %vm483_vm3, %v577_v57, -inf }
 0x338   :  { %584 = vmax.xlane.f32.xlu2 %v583_v2 }
 0x33a   :  { %v520_v5 = vpop.f32.mrf.mxu2  ;;  %v537_v6 = vpop.f32.mrf.mxu3 }
 0x33b   :  { %v562_v10 = vmul.f32 0.35355338, %v537_v6 }
 0x33c   :  { %v556_v9 = vpop.f32.mrf.mxu0 }
 0x33d   :  { %v578_v14 = vadd.f32 %v5523_v12, %v562_v10  ;;  %v563_v26 = vmul.f32 0.35355338, %v556_v9 }
 0x33f   :  { %v586_v16 = vsel %vm483_vm3, %v578_v14, -inf  ;;  %v579_v30 = vadd.f32 %v5528_v28, %v563_v26 }
 0x340   :  { %581 = vmax.xlane.f32.xlu2 %v580_v11 }
 0x341   :  { %v589_v34 = vsel %vm483_vm3, %v579_v30, -inf }
 0x342   :  { %v539_v13 = vpop.f32.mrf.mxu3 }
 0x344   :  { %v558_v15 = vpop.f32.mrf.mxu0 }
 0x348   :  { %587 = vmax.xlane.f32.xlu2 %v586_v16  ;;  %v5092_v16 = vld [vmem:[%s5464_s11 + $0x1] ss:$0 sm:$0xff] }
 0x3ab   :  { %v585_v17 = vpop.xlane.xlu2 %584 }
 0x3ac   :  { %v593_v18 = vsub.f32 %v577_v57, %v585_v17 }
 0x3ae   :  { %v598_v19 = vmul.f32 1.442695, %v593_v18 }
 0x3b0   :  { %5142 = vpow2.f32 %v598_v19 }
 0x3b3   :  { %v582_v21 = vpop.xlane.xlu2 %581 }
 0x3b4   :  { %v592_v23 = vsub.f32 %v576_v7, %v582_v21 }
 0x3b6   :  { %v5143_v24 = vpop.eup %5142  ;;  %v596_v25 = vmul.f32 1.442695, %v592_v23 }
 0x3b7   :  { %v607_v27 = vsel %vm483_vm3, %v5143_v24, 0.0 }
 0x3b8   :  { %5144 = vpow2.f32 %v596_v25  ;;  %608 = vadd.xlane.f32.xlu0 %v607_v27 }
 0x3bb   :  { %v588_v29 = vpop.xlane.xlu2 %587 }
 0x3bc   :  { %v594_v31 = vsub.f32 %v578_v14, %v588_v29 }
 0x3be   :  { %v5145_v32 = vpop.eup %5144  ;;  %v600_v33 = vmul.f32 1.442695, %v594_v31 }
 0x3bf   :  { %v604_v35 = vsel %vm483_vm3, %v5145_v32, 0.0 }
 0x3c0   :  { %5146 = vpow2.f32 %v600_v33  ;;  %590 = vmax.xlane.f32.xlu0 %v589_v34  ;;  %605 = vadd.xlane.f32.xlu1 %v604_v35  ;;  %v5094_v33 = vld [vmem:[%s5473_s15 + $0x1] ss:$0 sm:$0xff] }
 0x3c6   :  { %v5147_v36 = vpop.eup %5146 }
 0x3c7   :  { %v610_v37 = vsel %vm483_vm3, %v5147_v36, 0.0 }
 0x3c8   :  { %611 = vadd.xlane.f32.xlu1 %v610_v37 }
 0x42b   :  { %v609_v42 = vpop.xlane.xlu0 %608 }
 0x42c   :  { %5148 = vrcp.f32 %v609_v42 }
 0x432   :  { %v5149_v47 = vpop.eup %5148 }
 0x433   :  { %v621_v49 = vmul.f32 %v5149_v47, %v5143_v24  ;;  %v591_v51 = vpop.xlane.xlu0 %590  ;;  %v606_v52 = vpop.xlane.xlu1 %605 }
 0x434   :  { %v595_v53 = vsub.f32 %v579_v30, %v591_v51  ;;  %5150 = vrcp.f32 %v606_v52 }
 0x435   :  { %v625_v54 = vpack.c.bf16 %v621_v49, %v621_v49 }
 0x436   :  { %v602_v55 = vmul.f32 1.442695, %v595_v53 }
 0x437   :  { %4435 = vmatmul.msk.bf16.vlgmr.msra.gmra.mxu2 %vm483_vm3, %v625_v54 }
 0x438   :  { %5152 = vpow2.f32 %v602_v55 }
 0x43a   :  { %v5151_v56 = vpop.eup %5150 }
 0x43b   :  { %v620_v59 = vmul.f32 %v5151_v56, %v5145_v32  ;;  %v612_v60 = vpop.xlane.xlu1 %611 }
 0x43c   :  { %5154 = vrcp.f32 %v612_v60 }
 0x43d   :  { %v624_v61 = vpack.c.bf16 %v620_v59, %v620_v59 }
 0x43e   :  { %v5153_v57 = vpop.eup %5152 }
 0x43f   :  { %4434 = vmatmul.msk.bf16.vlgmr.msra.gmra.mxu1 %vm483_vm3, %v624_v61  ;;  %v613_v62 = vsel %vm483_vm3, %v5153_v57, 0.0 }
 0x440   :  { %614 = vadd.xlane.f32.xlu2 %v613_v62 }
 0x442   :  { %v5155_v2 = vpop.eup %5154 }
 0x443   :  { %v622_v4 = vmul.f32 %v5155_v2, %v5147_v36 }
 0x445   :  { %v626_v5 = vpack.c.bf16 %v622_v4, %v622_v4 }
 0x447   :  { %4436 = vmatmul.msk.bf16.vlgmr.msrb.gmra.mxu3 %vm483_vm3, %v626_v5  ;;  %4466 = vmatmul.msk.bf16.vlgmr.msrb.gmra.mxu2 %vm227_vm5, %v5468_v50 }
 0x44f   :  { %4451 = vmatmul.msk.bf16.vlgmr.msrb.gmra.mxu1 %vm227_vm5, %v5468_v50 }
 0x457   :  { %4467 = vmatmul.msk.bf16.gmra.mxu2 %vm227_vm5, %v5489_v1  ;;  %4481 = vmatmul.msk.bf16.vlgmr.msra.gmra.mxu3 %vm227_vm5, %v5468_v50 }
 0x45f   :  { %4452 = vmatmul.msk.bf16.gmra.mxu1 %vm227_vm5, %v5489_v1 }
 0x467   :  { %4482 = vmatmul.msk.bf16.gmra.mxu3 %vm227_vm5, %v5489_v1 }
 0x4b3   :  { %v615_v6 = vpop.xlane.xlu2 %614 }
 0x4b4   :  { %5156 = vrcp.f32 %v615_v6 }
 0x4ba   :  { %v5157_v7 = vpop.eup %5156  ;;  %v5556_v8 = vpop.f32.mrf.mxu2 }
 0x4bb   :  { %v623_v9 = vmul.f32 %v5157_v7, %v5153_v57 }
 0x4bc   :  { %v5558_v10 = vpop.f32.mrf.mxu1 }
 0x4bd   :  { %v627_v11 = vpack.c.bf16 %v623_v9, %v623_v9  ;;  %v709_v13 = vpack.c.bf16 %v5556_v8, %v5558_v10 }
 0x4bf   :  { %4437 = vmatmul.msk.bf16.vlgmr.msra.gmra.mxu0 %vm483_vm3, %v627_v11 }
 0x4c2   :  { %v669_v14 = vpop.f32.mrf.mxu2 }
 0x4c4   :  { %v650_v15 = vpop.f32.mrf.mxu1 }
 0x4ca   :  { %v5564_v17 = vpop.f32.mrf.mxu3  ;;  %v784_v18 = vpop.f32.mrf.mxu2 }
 0x4cb   :  { %v785_v19 = vadd.f32 %v5092_v16, %v784_v18 }
 0x4cc   :  { %v743_v20 = vpop.f32.mrf.mxu1 }
 0x4cd   :  { %v839_v21 = vpack.c.bf16 %v785_v19, %v785_v19  ;;  %v744_v24 = vadd.f32 %v5093_v22, %v743_v20 }
 0x4cf   :  { %v847_v23 = vsel %vm483_vm3, %v839_v21, 0  ;;  %v835_v30 = vpack.c.bf16 %v744_v24, %v744_v24 }
 0x4d0   :  { %856 = vmatpush.bf16.xpose.msrb.mxu0 %v847_v23 }
 0x4d2   :  { %v688_v25 = vpop.f32.mrf.mxu3  ;;  %v786_v26 = vpop.f32.mrf.mxu2 }
 0x4d3   :  { %v787_v27 = vadd.f32 %v5092_v16, %v786_v26 }
 0x4d4   :  { %v745_v29 = vpop.f32.mrf.mxu1 }
 0x4d5   :  { %v840_v31 = vpack.c.bf16 %v787_v27, %v787_v27  ;;  %v746_v43 = vadd.f32 %v5093_v22, %v745_v29 }
 0x4d7   :  { %4483 = vmatmul.msk.bf16.vlgmr.msrb.gmra.mxu0 %vm483_vm3, %v835_v30  ;;  %v866_v32 = vsel %vm483_vm3, %v840_v31, 0  ;;  %v836_v53 = vpack.c.bf16 %v746_v43, %v746_v43 }
 0x4d8   :  { %875 = vmatpush.bf16.xpose.msra.mxu0 %v866_v32 }
 0x4da   :  { %v789_v34 = vpop.f32.mrf.mxu2  ;;  %v825_v35 = vpop.f32.mrf.mxu3 }
 0x4db   :  { %v790_v36 = vadd.f32 %v5092_v16, %v789_v34  ;;  %v826_v37 = vadd.f32 %v5094_v33, %v825_v35 }
 0x4dc   :  { %v748_v38 = vpop.f32.mrf.mxu1 }
 0x4dd   :  { %v841_v39 = vpack.c.bf16 %v790_v36, %v790_v36  ;;  %v975_v40 = vpack.c.bf16 %v826_v37, %v826_v37  ;;  %v749_v45 = vadd.f32 %v5093_v22, %v748_v38 }
 0x4df   :  { %v885_v41 = vsel %vm483_vm3, %v841_v39, 0  ;;  %v983_v42 = vsel %vm635_vm4, %v975_v40, 0  ;;  %v837_v54 = vpack.c.bf16 %v749_v45, %v749_v45 }
 0x4e0   :  { %894 = vmatpush.bf16.xpose.msra.mxu1 %v885_v41  ;;  %992 = vmatpush.bf16.msrb.mxu3 %v983_v42 }
 0x4e2   :  { %v791_v47 = vpop.f32.mrf.mxu2  ;;  %v827_v49 = vpop.f32.mrf.mxu3 }
 0x4e3   :  { %v792_v51 = vadd.f32 %v5092_v16, %v791_v47  ;;  %v828_v52 = vadd.f32 %v5094_v33, %v827_v49 }
 0x4e4   :  { %v750_v59 = vpop.f32.mrf.mxu1 }
 0x4e5   :  { %v842_v55 = vpack.c.bf16 %v792_v51, %v792_v51  ;;  %v976_v56 = vpack.c.bf16 %v828_v52, %v828_v52  ;;  %v751_v57 = vadd.f32 %v5093_v22, %v750_v59 }
 0x4e7   :  { %4484 = vmatmul.msk.bf16.vlgmr.msra.gmra.mxu0 %vm483_vm3, %v836_v53  ;;  %4485 = vmatmul.msk.bf16.vlgmr.msra.gmra.mxu1 %vm483_vm3, %v837_v54  ;;  %v904_v60 = vsel %vm483_vm3, %v842_v55, 0  ;;  %v1002_v61 = vsel %vm635_vm4, %v976_v56, 0  ;;  %v838_v4 = vpack.c.bf16 %v751_v57, %v751_v57  ;;  %v4985_v57 = vld [vmem:[%s5436_s3 + $0x28] sm:$0xff] }
 0x4e8   :  { %913 = vmatpush.bf16.xpose.msra.mxu2 %v904_v60  ;;  %1011 = vmatpush.bf16.msrb.mxu0 %v1002_v61  ;;  %v4983_v60 = vld [vmem:[%s5431_s29 + $0x28] sm:$0xff]  ;;  %v4982_v61 = vld [vmem:[%s5431_s29 + $0x20] sm:$0xff] }
 0x4ea   :  { %v830_v62 = vpop.f32.mrf.mxu3 }
 0x4eb   :  { %v831_v2 = vadd.f32 %v5094_v33, %v830_v62 }
 0x4ed   :  { %v977_v5 = vpack.c.bf16 %v831_v2, %v831_v2  ;;  %v4984_v2 = vld [vmem:[%s5436_s3 + $0x20] sm:$0xff] }
 0x4ef   :  { %v1021_v6 = vsel %vm635_vm4, %v977_v5, 0  ;;  %4486 = vmatmul.msk.bf16.vlgmr.msra.gmra.mxu2 %vm483_vm3, %v838_v4 }
 0x4f0   :  { %1030 = vmatpush.bf16.msrb.mxu1 %v1021_v6 }
 0x4f2   :  { %v832_v7 = vpop.f32.mrf.mxu3 }
 0x4f3   :  { %v833_v9 = vadd.f32 %v5094_v33, %v832_v7 }
 0x4f4   :  { %1143 = vmatpush.bf16.msra.mxu1 %v4983_v60 }
 0x4f5   :  { %v978_v11 = vpack.c.bf16 %v833_v9, %v833_v9 }
 0x4f7   :  { %v1040_v14 = vsel %vm635_vm4, %v978_v11, 0 }
 0x4f8   :  { %1049 = vmatpush.bf16.msrb.mxu2 %v1040_v14  ;;  %1144 = vmatpush.bf16.msra.mxu1 %v4982_v61 }
 0x4fc   :  { %1184 = vmatpush.bf16.msra.mxu2 %v4985_v57 }
 0x500   :  { %1185 = vmatpush.bf16.msra.mxu2 %v4984_v2 }
 0x53c   :  { %v5580_v15 = vpop.f32.mrf.mxu0 }
 0x53d   :  { %v710_v61 = vpack.c.bf16 %v5580_v15, %v5564_v17 }
 0x544   :  { %v707_v16 = vpop.f32.mrf.mxu0 }
 0x554   :  { %v858_v18 = vpop.f32.mrf.mxu0 }
 0x555   :  { %v919_v24 = vmul.f32 0.35355338, %v858_v18 }
 0x557   :  { %v923_v29 = vadd.f32 %v919_v24, %v5519_v3 }
 0x559   :  { %v927_v30 = vsel %vm483_vm3, %v923_v29, -inf }
 0x55c   :  { %v860_v19 = vpop.f32.mrf.mxu0 }
 0x564   :  { %v877_v20 = vpop.f32.mrf.mxu0  ;;  %v896_v21 = vpop.f32.mrf.mxu1 }
 0x565   :  { %v921_v22 = vmul.f32 0.35355338, %v896_v21  ;;  %v920_v54 = vmul.f32 0.35355338, %v877_v20 }
 0x567   :  { %v925_v23 = vadd.f32 %v921_v22, %v5523_v12  ;;  %v924_v56 = vadd.f32 %v920_v54, %v5515_v58  ;;  %v5095_v54 = vld [vmem:[%s5426_s25 + $0x2] ss:$0 sm:$0xff] }
 0x569   :  { %v933_v25 = vsel %vm483_vm3, %v925_v23, -inf  ;;  %v930_v59 = vsel %vm483_vm3, %v924_v56, -inf }
 0x56a   :  { %934 = vmax.xlane.f32.xlu1 %v933_v25 }
 0x56c   :  { %v879_v26 = vpop.f32.mrf.mxu0  ;;  %v898_v27 = vpop.f32.mrf.mxu1 }
 0x56d   :  { %v711_v27 = vld [vmem:[%s5612_s23] sm:$0xf] }
 0x572   :  { %v915_v31 = vpop.f32.mrf.mxu2  ;;  %928 = vmax.xlane.f32.xlu1 %v927_v30 }
 0x573   :  { %v922_v32 = vmul.f32 0.35355338, %v915_v31 }
 0x575   :  { %v926_v33 = vadd.f32 %v922_v32, %v5528_v28 }
 0x577   :  { %v936_v34 = vsel %vm483_vm3, %v926_v33, -inf }
 0x578   :  { %937 = vmax.xlane.f32.xlu0 %v936_v34 }
 0x57a   :  { %v917_v35 = vpop.f32.mrf.mxu2 }
 0x5dd   :  { %v935_v36 = vpop.xlane.xlu1 %934 }
 0x5de   :  { %v941_v37 = vsub.f32 %v925_v23, %v935_v36 }
 0x5e0   :  { %v947_v38 = vmul.f32 1.442695, %v941_v37 }
 0x5e2   :  { %5158 = vpow2.f32 %v947_v38 }
 0x5e5   :  { %v929_v39 = vpop.xlane.xlu1 %928 }
 0x5e6   :  { %v939_v40 = vsub.f32 %v923_v29, %v929_v39  ;;  %v1094_v29 = vsel %vm635_vm4, %v711_v27, 0 }
 0x5e7   :  { %1103 = vmatpush.bf16.msra.mxu0 %v1094_v29 }
 0x5e8   :  { %v5159_v41 = vpop.eup %5158  ;;  %v943_v42 = vmul.f32 1.442695, %v939_v40  ;;  %v5096_v40 = vld [vmem:[%s5464_s11 + $0x2] ss:$0 sm:$0xff] }
 0x5e9   :  { %v957_v43 = vsel %vm483_vm3, %v5159_v41, 0.0 }
 0x5ea   :  { %5160 = vpow2.f32 %v943_v42  ;;  %958 = vadd.xlane.f32.xlu0 %v957_v43 }
 0x5eb   :  { %v938_v45 = vpop.xlane.xlu0 %937 }
 0x5ec   :  { %v942_v47 = vsub.f32 %v926_v33, %v938_v45 }
 0x5ee   :  { %v949_v49 = vmul.f32 1.442695, %v942_v47 }
 0x5f0   :  { %v5161_v51 = vpop.eup %5160  ;;  %5162 = vpow2.f32 %v949_v49 }
 0x5f1   :  { %v951_v52 = vsel %vm483_vm3, %v5161_v51, 0.0 }
 0x5f2   :  { %952 = vadd.xlane.f32.xlu0 %v951_v52 }
 0x5f6   :  { %v5163_v53 = vpop.eup %5162 }
 0x5f7   :  { %v960_v55 = vsel %vm483_vm3, %v5163_v53, 0.0 }
 0x5f8   :  { %961 = vadd.xlane.f32.xlu2 %v960_v55 }
 0x600   :  { %931 = vmax.xlane.f32.xlu2 %v930_v59 }
 0x65d   :  { %v959_v62 = vpop.xlane.xlu0 %958 }
 0x65e   :  { %5164 = vrcp.f32 %v959_v62 }
 0x664   :  { %v5165_v4 = vpop.eup %5164 }
 0x665   :  { %v969_v5 = vmul.f32 %v5165_v4, %v5159_v41  ;;  %v953_v6 = vpop.xlane.xlu0 %952 }
 0x666   :  { %5166 = vrcp.f32 %v953_v6 }
 0x667   :  { %v973_v7 = vpack.c.bf16 %v969_v5, %v969_v5 }
 0x669   :  { %4489 = vmatmul.msk.bf16.vlgmr.msrb.gmra.mxu1 %vm483_vm3, %v973_v7 }
 0x66b   :  { %v962_v9 = vpop.xlane.xlu2 %961 }
 0x66c   :  { %v5167_v11 = vpop.eup %5166  ;;  %5168 = vrcp.f32 %v962_v9 }
 0x66d   :  { %v967_v14 = vmul.f32 %v5167_v11, %v5161_v51 }
 0x66f   :  { %v971_v16 = vpack.c.bf16 %v967_v14, %v967_v14 }
 0x671   :  { %4487 = vmatmul.msk.bf16.vlgmr.msrb.gmra.mxu3 %vm483_vm3, %v971_v16  ;;  %v4491_v16 = vld [vmem:[%s5612_s23 + $0x4] sm:$0xf] }
 0x672   :  { %v5169_v18 = vpop.eup %5168 }
 0x673   :  { %v970_v19 = vmul.f32 %v5169_v18, %v5163_v53  ;;  %v932_v20 = vpop.xlane.xlu2 %931  ;;  %v1066_v18 = vsel %vm635_vm4, %v4491_v16, 0 }
 0x674   :  { %v940_v21 = vsub.f32 %v924_v56, %v932_v20  ;;  %1075 = vmatpush.bf16.msra.mxu3 %v1066_v18  ;;  %v4986_v20 = vld [vmem:[%s5441_s7 + $0x20] sm:$0xff] }
 0x675   :  { %v974_v22 = vpack.c.bf16 %v970_v19, %v970_v19  ;;  %v4987_v19 = vld [vmem:[%s5441_s7 + $0x28] sm:$0xff] }
 0x676   :  { %v945_v23 = vmul.f32 1.442695, %v940_v21 }
 0x677   :  { %4490 = vmatmul.msk.bf16.vlgmr.msrb.gmra.mxu2 %vm483_vm3, %v974_v22 }
 0x678   :  { %5170 = vpow2.f32 %v945_v23  ;;  %1225 = vmatpush.bf16.msrb.mxu3 %v4987_v19 }
 0x679   :  { %4509 = vmatmul.msk.bf16.vlgmr.msra.gmra.mxu1 %vm227_vm5, %v5468_v50 }
 0x67c   :  { %1226 = vmatpush.bf16.msrb.mxu3 %v4986_v20 }
 0x67e   :  { %v5171_v24 = vpop.eup %5170 }
 0x67f   :  { %v954_v25 = vsel %vm483_vm3, %v5171_v24, 0.0 }
 0x680   :  { %955 = vadd.xlane.f32.xlu1 %v954_v25 }
 0x687   :  { %4524 = vmatmul.msk.bf16.vlgmr.msra.gmra.mxu2 %vm227_vm5, %v5468_v50 }
 0x689   :  { %4510 = vmatmul.msk.bf16.gmra.mxu1 %vm227_vm5, %v5489_v1 }
 0x697   :  { %4525 = vmatmul.msk.bf16.gmra.mxu2 %vm227_vm5, %v5489_v1 }
 0x6e6   :  { %v5614_v26 = vpop.f32.mrf.mxu1 }
 0x6ee   :  { %v1034_v30 = vpop.f32.mrf.mxu1 }
 0x6f3   :  { %v956_v31 = vpop.xlane.xlu1 %955 }
 0x6f4   :  { %5172 = vrcp.f32 %v956_v31  ;;  %v994_v32 = vpop.f32.mrf.mxu3 }
 0x6f6   :  { %v1146_v41 = vpop.f32.mrf.mxu1 }
 0x6f7   :  { %v1147_v15 = vadd.f32 %v5095_v54, %v1146_v41 }
 0x6f9   :  { %v1238_v7 = vpack.c.bf16 %v1147_v15, %v1147_v15 }
 0x6fa   :  { %v5173_v33 = vpop.eup %5172  ;;  %v1051_v34 = vpop.f32.mrf.mxu2 }
 0x6fb   :  { %v968_v35 = vmul.f32 %v5173_v33, %v5171_v24  ;;  %v1056_v36 = vpack.c.bf16 %v1051_v34, %v5614_v26 }
 0x6fc   :  { %v996_v37 = vpop.f32.mrf.mxu3 }
 0x6fd   :  { %v972_v38 = vpack.c.bf16 %v968_v35, %v968_v35 }
 0x6fe   :  { %v1148_v52 = vpop.f32.mrf.mxu1 }
 0x6ff   :  { %4488 = vmatmul.msk.bf16.vlgmr.msrb.gmra.mxu0 %vm483_vm3, %v972_v38  ;;  %v1149_v56 = vadd.f32 %v5095_v54, %v1148_v52 }
 0x701   :  { %v1239_v57 = vpack.c.bf16 %v1149_v56, %v1149_v56 }
 0x702   :  { %v1053_v39 = vpop.f32.mrf.mxu2 }
 0x706   :  { %v1151_v8 = vpop.f32.mrf.mxu1 }
 0x70a   :  { %v1187_v42 = vpop.f32.mrf.mxu2 }
 0x70b   :  { %v1188_v43 = vadd.f32 %v5096_v40, %v1187_v42 }
 0x70d   :  { %v1242_v45 = vpack.c.bf16 %v1188_v43, %v1188_v43 }
 0x70e   :  { %v1153_v9 = vpop.f32.mrf.mxu1 }
 0x70f   :  { %v1250_v47 = vsel %vm483_vm3, %v1242_v45, 0  ;;  %4494 = vmatmul.msk.bf16.vlgmr.msra.gmra.mxu0 %vm483_vm3, %v709_v13  ;;  %v1152_v13 = vadd.f32 %v5095_v54, %v1151_v8  ;;  %v1154_v11 = vadd.f32 %v5095_v54, %v1153_v9 }
 0x710   :  { %1259 = vmatpush.bf16.xpose.msrb.mxu0 %v1250_v47 }
 0x711   :  { %v1240_v5 = vpack.c.bf16 %v1152_v13, %v1152_v13  ;;  %v1241_v14 = vpack.c.bf16 %v1154_v11, %v1154_v11 }
 0x712   :  { %v1189_v49 = vpop.f32.mrf.mxu2 }
 0x713   :  { %v1190_v51 = vadd.f32 %v5096_v40, %v1189_v49 }
 0x715   :  { %v1243_v53 = vpack.c.bf16 %v1190_v51, %v1190_v51 }
 0x717   :  { %v1269_v55 = vsel %vm483_vm3, %v1243_v53, 0 }
 0x718   :  { %1278 = vmatpush.bf16.xpose.msrb.mxu1 %v1269_v55 }
 0x71a   :  { %v1192_v59 = vpop.f32.mrf.mxu2 }
 0x71b   :  { %v1193_v60 = vadd.f32 %v5096_v40, %v1192_v59 }
 0x71d   :  { %v1244_v62 = vpack.c.bf16 %v1193_v60, %v1193_v60 }
 0x71f   :  { %v1288_v10 = vsel %vm483_vm3, %v1244_v62, 0  ;;  %4495 = vmatmul.msk.bf16.gmra.mxu0 %vm483_vm3, %v710_v61  ;;  %4542 = vmatmul.msk.bf16.vlgmr.msrb.gmra.mxu1 %vm483_vm3, %v1239_v57  ;;  %v5097_v57 = vld [vmem:[%s5473_s15 + $0x2] ss:$0 sm:$0xff] }
 0x720   :  { %1297 = vmatpush.bf16.xpose.msrb.mxu2 %v1288_v10 }
 0x722   :  { %v1194_v2 = vpop.f32.mrf.mxu2 }
 0x723   :  { %v1195_v4 = vadd.f32 %v5096_v40, %v1194_v2 }
 0x725   :  { %v1245_v6 = vpack.c.bf16 %v1195_v4, %v1195_v4 }
 0x727   :  { %4543 = vmatmul.msk.bf16.vlgmr.msrb.gmra.mxu2 %vm483_vm3, %v1240_v5  ;;  %v1307_v17 = vsel %vm483_vm3, %v1245_v6, 0 }
 0x728   :  { %1316 = vmatpush.bf16.xpose.msra.mxu0 %v1307_v17 }
 0x72f   :  { %4541 = vmatmul.msk.bf16.vlgmr.msrb.gmra.mxu0 %vm483_vm3, %v1238_v7 }
 0x73f   :  { %4544 = vmatmul.msk.bf16.vlgmr.msra.gmra.mxu0 %vm483_vm3, %v1241_v14 }
 0x77c   :  { %v1013_v21 = vpop.f32.mrf.mxu0 }
 0x77d   :  { %v1055_v22 = vpack.c.bf16 %v1013_v21, %v994_v32 }
 0x77f   :  { %4492 = vmatmul.msk.bf16.vlgmr.msra.gmra.mxu3 %vm483_vm3, %v1055_v22 }
 0x784   :  { %v1015_v23 = vpop.f32.mrf.mxu0 }
 0x78c   :  { %v5642_v24 = vpop.f32.mrf.mxu0 }
 0x78f   :  { %4493 = vmatmul.msk.bf16.gmra.mxu3 %vm483_vm3, %v1056_v36 }
 0x794   :  { %v5645_v25 = vpop.f32.mrf.mxu0 }
 0x79c   :  { %v5647_v26 = vpop.f32.mrf.mxu0  ;;  %v1280_v27 = vpop.f32.mrf.mxu1 }
 0x79d   :  { %v1323_v29 = vmul.f32 0.35355338, %v1280_v27 }
 0x79f   :  { %4539 = vmatmul.msk.bf16.vlgmr.msrb.gmra.mxu3 %vm227_vm5, %v5468_v50  ;;  %v1327_v30 = vadd.f32 %v1323_v29, %v5515_v58 }
 0x7a1   :  { %v1333_v31 = vsel %vm483_vm3, %v1327_v30, -inf }
 0x7a2   :  { %1334 = vmax.xlane.f32.xlu0 %v1333_v31 }
 0x7a4   :  { %v5653_v32 = vpop.f32.mrf.mxu0  ;;  %v1282_v33 = vpop.f32.mrf.mxu1 }
 0x7aa   :  { %v1299_v34 = vpop.f32.mrf.mxu2 }
 0x7ab   :  { %v1324_v35 = vmul.f32 0.35355338, %v1299_v34 }
 0x7ac   :  { %v1261_v36 = vpop.f32.mrf.mxu0 }
 0x7ad   :  { %v1322_v37 = vmul.f32 0.35355338, %v1261_v36  ;;  %v1328_v38 = vadd.f32 %v1324_v35, %v5523_v12 }
 0x7af   :  { %4540 = vmatmul.msk.bf16.gmra.mxu3 %vm227_vm5, %v5489_v1  ;;  %v1336_v39 = vsel %vm483_vm3, %v1328_v38, -inf  ;;  %v1326_v40 = vadd.f32 %v1322_v37, %v5519_v3 }
 0x7b0   :  { %1337 = vmax.xlane.f32.xlu2 %v1336_v39 }
 0x7b1   :  { %v1330_v41 = vsel %vm483_vm3, %v1326_v40, -inf }
 0x7b2   :  { %v1301_v42 = vpop.f32.mrf.mxu2  ;;  %1331 = vmax.xlane.f32.xlu1 %v1330_v41  ;;  %v4989_v41 = vld [vmem:[%s5431_s29 + $0x38] sm:$0xff] }
 0x7b3   :  { %v4988_v42 = vld [vmem:[%s5431_s29 + $0x30] sm:$0xff] }
 0x7b4   :  { %v1263_v43 = vpop.f32.mrf.mxu0 }
 0x7bc   :  { %v1318_v45 = vpop.f32.mrf.mxu0 }
 0x7bd   :  { %v1325_v47 = vmul.f32 0.35355338, %v1318_v45  ;;  %v4991_v45 = vld [vmem:[%s5436_s3 + $0x38] sm:$0xff] }
 0x7bf   :  { %v1329_v49 = vadd.f32 %v1325_v47, %v5528_v28  ;;  %v4990_v47 = vld [vmem:[%s5436_s3 + $0x30] sm:$0xff] }
 0x7c1   :  { %v1339_v51 = vsel %vm483_vm3, %v1329_v49, -inf }
 0x7c2   :  { %1340 = vmax.xlane.f32.xlu2 %v1339_v51 }
 0x7c4   :  { %v1320_v52 = vpop.f32.mrf.mxu0 }
 0x802   :  { %v5663_v53 = vpop.f32.mrf.mxu3 }
 0x80a   :  { %v5665_v54 = vpop.f32.mrf.mxu3 }
 0x812   :  { %v5667_v55 = vpop.f32.mrf.mxu3 }
 0x815   :  { %v1335_v56 = vpop.xlane.xlu0 %1334 }
 0x816   :  { %v1343_v59 = vsub.f32 %v1327_v30, %v1335_v56  ;;  %v4993_v56 = vld [vmem:[%s5441_s7 + $0x38] sm:$0xff] }
 0x818   :  { %v1348_v60 = vmul.f32 1.442695, %v1343_v59 }
 0x81a   :  { %5174 = vpow2.f32 %v1348_v60  ;;  %v5669_v61 = vpop.f32.mrf.mxu3  ;;  %v4992_v60 = vld [vmem:[%s5441_s7 + $0x30] sm:$0xff] }
 0x820   :  { %v5175_v62 = vpop.eup %5174 }
 0x821   :  { %v1357_v8 = vsel %vm483_vm3, %v5175_v62, 0.0 }
 0x822   :  { %v1228_v10 = vpop.f32.mrf.mxu3  ;;  %1358 = vadd.xlane.f32.xlu1 %v1357_v8 }
 0x823   :  { %v1229_v13 = vadd.f32 %v5097_v57, %v1228_v10  ;;  %v1338_v2 = vpop.xlane.xlu2 %1337 }
 0x824   :  { %v1344_v4 = vsub.f32 %v1328_v38, %v1338_v2 }
 0x825   :  { %v1378_v5 = vpack.c.bf16 %v1229_v13, %v1229_v13  ;;  %v1332_v6 = vpop.xlane.xlu1 %1331 }
 0x826   :  { %v1350_v17 = vmul.f32 1.442695, %v1344_v4  ;;  %v1342_v15 = vsub.f32 %v1326_v40, %v1332_v6 }
 0x827   :  { %v1386_v7 = vsel %vm635_vm4, %v1378_v5, 0 }
 0x828   :  { %5176 = vpow2.f32 %v1350_v17  ;;  %v1346_v9 = vmul.f32 1.442695, %v1342_v15  ;;  %1395 = vmatpush.bf16.msra.mxu1 %v1386_v7  ;;  %v4549_v7 = vld [vmem:[%s5612_s23 + $0x8] sm:$0xf] }
 0x82a   :  { %5178 = vpow2.f32 %v1346_v9  ;;  %v1230_v11 = vpop.f32.mrf.mxu3  ;;  %v1469_v9 = vsel %vm635_vm4, %v4549_v7, 0 }
 0x82b   :  { %v1231_v14 = vadd.f32 %v5097_v57, %v1230_v11 }
 0x82c   :  { %1478 = vmatpush.bf16.msrb.mxu1 %v1469_v9 }
 0x82d   :  { %v1379_v16 = vpack.c.bf16 %v1231_v14, %v1231_v14 }
 0x82e   :  { %v5177_v18 = vpop.eup %5176 }
 0x82f   :  { %v1360_v19 = vsel %vm483_vm3, %v5177_v18, 0.0  ;;  %v1405_v20 = vsel %vm635_vm4, %v1379_v16, 0 }
 0x830   :  { %v5179_v21 = vpop.eup %5178  ;;  %1361 = vadd.xlane.f32.xlu0 %v1360_v19  ;;  %1414 = vmatpush.bf16.msra.mxu2 %v1405_v20 }
 0x831   :  { %v1354_v22 = vsel %vm483_vm3, %v5179_v21, 0.0 }
 0x832   :  { %v1233_v23 = vpop.f32.mrf.mxu3  ;;  %1355 = vadd.xlane.f32.xlu2 %v1354_v22 }
 0x833   :  { %v1234_v27 = vadd.f32 %v5097_v57, %v1233_v23  ;;  %v5099_v23 = vld [vmem:[%s5464_s11 + $0x3] ss:$0 sm:$0xff] }
 0x834   :  { %1522 = vmatpush.bf16.msrb.mxu2 %v4989_v41 }
 0x835   :  { %v1380_v29 = vpack.c.bf16 %v1234_v27, %v1234_v27  ;;  %v1341_v30 = vpop.xlane.xlu2 %1340 }
 0x836   :  { %v1345_v31 = vsub.f32 %v1329_v49, %v1341_v30 }
 0x837   :  { %v1424_v33 = vsel %vm635_vm4, %v1380_v29, 0 }
 0x838   :  { %v1352_v34 = vmul.f32 1.442695, %v1345_v31  ;;  %1433 = vmatpush.bf16.msra.mxu3 %v1424_v33  ;;  %1523 = vmatpush.bf16.msrb.mxu2 %v4988_v42  ;;  %v5098_v33 = vld [vmem:[%s5426_s25 + $0x3] ss:$0 sm:$0xff] }
 0x83a   :  { %5180 = vpow2.f32 %v1352_v34  ;;  %v1235_v35 = vpop.f32.mrf.mxu3 }
 0x83b   :  { %v1236_v36 = vadd.f32 %v5097_v57, %v1235_v35 }
 0x83c   :  { %1563 = vmatpush.bf16.msrb.mxu3 %v4991_v45 }
 0x83d   :  { %v1381_v37 = vpack.c.bf16 %v1236_v36, %v1236_v36 }
 0x83f   :  { %v1443_v38 = vsel %vm635_vm4, %v1381_v37, 0 }
 0x840   :  { %v5181_v39 = vpop.eup %5180  ;;  %1452 = vmatpush.bf16.msrb.mxu0 %v1443_v38  ;;  %1564 = vmatpush.bf16.msrb.mxu3 %v4990_v47 }
 0x841   :  { %v1363_v40 = vsel %vm483_vm3, %v5181_v39, 0.0 }
 0x842   :  { %1364 = vadd.xlane.f32.xlu0 %v1363_v40 }
 0x844   :  { %1604 = vmatpush.bf16.msra.mxu0 %v4993_v56 }
 0x848   :  { %1605 = vmatpush.bf16.msra.mxu0 %v4992_v60 }
 0x895   :  { %v1359_v43 = vpop.xlane.xlu1 %1358 }
 0x896   :  { %5182 = vrcp.f32 %v1359_v43 }
 0x89c   :  { %v5183_v49 = vpop.eup %5182 }
 0x89d   :  { %v1371_v51 = vmul.f32 %v5183_v49, %v5175_v62 }
 0x89f   :  { %v1375_v52 = vpack.c.bf16 %v1371_v51, %v1371_v51 }
 0x8a1   :  { %4546 = vmatmul.msk.bf16.vlgmr.msra.gmra.mxu2 %vm483_vm3, %v1375_v52 }
 0x8a3   :  { %v1362_v59 = vpop.xlane.xlu0 %1361 }
 0x8a4   :  { %5184 = vrcp.f32 %v1362_v59 }
 0x8a5   :  { %v1356_v57 = vpop.xlane.xlu2 %1355 }
 0x8a6   :  { %5186 = vrcp.f32 %v1356_v57 }
 0x8aa   :  { %v5185_v8 = vpop.eup %5184 }
 0x8ab   :  { %v1372_v10 = vmul.f32 %v5185_v8, %v5177_v18 }
 0x8ac   :  { %v5187_v13 = vpop.eup %5186 }
 0x8ad   :  { %v1376_v2 = vpack.c.bf16 %v1372_v10, %v1372_v10  ;;  %v1370_v4 = vmul.f32 %v5187_v13, %v5179_v21 }
 0x8af   :  { %v1374_v5 = vpack.c.bf16 %v1370_v4, %v1370_v4  ;;  %4547 = vmatmul.msk.bf16.vlgmr.msra.gmra.mxu3 %vm483_vm3, %v1376_v2 }
 0x8b1   :  { %4545 = vmatmul.msk.bf16.vlgmr.msra.gmra.mxu1 %vm483_vm3, %v1374_v5  ;;  %4565 = vmatmul.msk.bf16.vlgmr.msrb.gmra.mxu2 %vm227_vm5, %v5468_v50 }
 0x8b5   :  { %v1365_v62 = vpop.xlane.xlu0 %1364 }
 0x8b6   :  { %5188 = vrcp.f32 %v1365_v62 }
 0x8bc   :  { %v5189_v6 = vpop.eup %5188 }
 0x8bd   :  { %v1373_v17 = vmul.f32 %v5189_v6, %v5181_v39  ;;  %v5100_v39 = vld [vmem:[%s5473_s15 + $0x3] ss:$0 sm:$0xff] }
 0x8bf   :  { %v1377_v15 = vpack.c.bf16 %v1373_v17, %v1373_v17  ;;  %4580 = vmatmul.msk.bf16.vlgmr.msrb.gmra.mxu3 %vm227_vm5, %v5468_v50 }
 0x8c1   :  { %4548 = vmatmul.msk.bf16.vlgmr.msrb.gmra.mxu0 %vm483_vm3, %v1377_v15  ;;  %4566 = vmatmul.msk.bf16.gmra.mxu2 %vm227_vm5, %v5489_v1 }
 0x8cf   :  { %4581 = vmatmul.msk.bf16.gmra.mxu3 %vm227_vm5, %v5489_v1 }
 0x8d1   :  { %4595 = vmatmul.msk.bf16.vlgmr.msra.gmra.mxu0 %vm227_vm5, %v5468_v50 }
 0x8e1   :  { %4596 = vmatmul.msk.bf16.gmra.mxu0 %vm227_vm5, %v5489_v1 }
 0x924   :  { %v1416_v11 = vpop.f32.mrf.mxu2 }
 0x92c   :  { %v1418_v14 = vpop.f32.mrf.mxu2 }
 0x92e   :  { %v1397_v16 = vpop.f32.mrf.mxu1 }
 0x92f   :  { %v1458_v18 = vpack.c.bf16 %v1416_v11, %v1397_v16 }
 0x931   :  { %4550 = vmatmul.msk.bf16.vlgmr.msrb.gmra.mxu1 %vm483_vm3, %v1458_v18 }
 0x932   :  { %v1435_v19 = vpop.f32.mrf.mxu3 }
 0x934   :  { %v1525_v27 = vpop.f32.mrf.mxu2 }
 0x935   :  { %v1526_v37 = vadd.f32 %v5098_v33, %v1525_v27  ;;  %v1106_v27 = vadd.f32 %v5642_v24, %v5663_v53 }
 0x936   :  { %v1399_v20 = vpop.f32.mrf.mxu1 }
 0x937   :  { %v1617_v42 = vpack.c.bf16 %v1526_v37, %v1526_v37 }
 0x93a   :  { %v1437_v21 = vpop.f32.mrf.mxu3 }
 0x93c   :  { %v1527_v35 = vpop.f32.mrf.mxu2 }
 0x93d   :  { %v1528_v47 = vadd.f32 %v5098_v33, %v1527_v35 }
 0x93e   :  { %v1454_v22 = vpop.f32.mrf.mxu0 }
 0x93f   :  { %v1459_v50 = vpack.c.bf16 %v1454_v22, %v1435_v19  ;;  %v1618_v60 = vpack.c.bf16 %v1528_v47, %v1528_v47 }
 0x941   :  { %4551 = vmatmul.msk.bf16.gmra.mxu1 %vm483_vm3, %v1459_v50 }
 0x942   :  { %v1566_v1 = vpop.f32.mrf.mxu3 }
 0x943   :  { %v1567_v29 = vadd.f32 %v5099_v23, %v1566_v1 }
 0x944   :  { %v1530_v59 = vpop.f32.mrf.mxu2 }
 0x945   :  { %v1621_v30 = vpack.c.bf16 %v1567_v29, %v1567_v29  ;;  %v1531_v2 = vadd.f32 %v5098_v33, %v1530_v59 }
 0x946   :  { %v1456_v31 = vpop.f32.mrf.mxu0 }
 0x947   :  { %v1629_v34 = vsel %vm483_vm3, %v1621_v30, 0  ;;  %v1619_v17 = vpack.c.bf16 %v1531_v2, %v1531_v2  ;;  %v1111_v31 = vadd.f32 %v5647_v26, %v5667_v55 }
 0x948   :  { %1638 = vmatpush.bf16.xpose.msra.mxu1 %v1629_v34 }
 0x94a   :  { %v1568_v36 = vpop.f32.mrf.mxu3 }
 0x94b   :  { %v1569_v38 = vadd.f32 %v5099_v23, %v1568_v36 }
 0x94c   :  { %v1532_v7 = vpop.f32.mrf.mxu2 }
 0x94d   :  { %v1622_v40 = vpack.c.bf16 %v1569_v38, %v1569_v38  ;;  %v1533_v16 = vadd.f32 %v5098_v33, %v1532_v7 }
 0x94e   :  { %v1607_v41 = vpop.f32.mrf.mxu0 }
 0x94f   :  { %v1608_v43 = vadd.f32 %v5100_v39, %v1607_v41  ;;  %v1648_v45 = vsel %vm483_vm3, %v1622_v40, 0  ;;  %v1620_v20 = vpack.c.bf16 %v1533_v16, %v1533_v16 }
 0x950   :  { %1657 = vmatpush.bf16.xpose.msra.mxu2 %v1648_v45 }
 0x951   :  { %v1757_v49 = vpack.c.bf16 %v1608_v43, %v1608_v43  ;;  %4597 = vmatmul.msk.bf16.vlgmr.msra.gmra.mxu1 %vm483_vm3, %v1617_v42 }
 0x952   :  { %v1571_v51 = vpop.f32.mrf.mxu3 }
 0x953   :  { %v1765_v52 = vsel %vm635_vm4, %v1757_v49, 0  ;;  %v1572_v56 = vadd.f32 %v5099_v23, %v1571_v51 }
 0x954   :  { %1774 = vmatpush.bf16.msrb.mxu1 %v1765_v52 }
 0x955   :  { %v1623_v57 = vpack.c.bf16 %v1572_v56, %v1572_v56 }
 0x956   :  { %v1609_v8 = vpop.f32.mrf.mxu0 }
 0x957   :  { %v1667_v10 = vsel %vm483_vm3, %v1623_v57, 0  ;;  %v1610_v13 = vadd.f32 %v5100_v39, %v1609_v8  ;;  %4598 = vmatmul.msk.bf16.vlgmr.msra.gmra.mxu2 %vm483_vm3, %v1618_v60 }
 0x958   :  { %1676 = vmatpush.bf16.xpose.msra.mxu3 %v1667_v10 }
 0x959   :  { %v1758_v4 = vpack.c.bf16 %v1610_v13, %v1610_v13 }
 0x95a   :  { %v1573_v5 = vpop.f32.mrf.mxu3 }
 0x95b   :  { %v1574_v62 = vadd.f32 %v5099_v23, %v1573_v5  ;;  %v1784_v6 = vsel %vm635_vm4, %v1758_v4, 0 }
 0x95c   :  { %1793 = vmatpush.bf16.msrb.mxu2 %v1784_v6 }
 0x95d   :  { %v1624_v15 = vpack.c.bf16 %v1574_v62, %v1574_v62 }
 0x95e   :  { %v1612_v9 = vpop.f32.mrf.mxu0 }
 0x95f   :  { %v1613_v11 = vadd.f32 %v5100_v39, %v1612_v9  ;;  %4599 = vmatmul.msk.bf16.vlgmr.msra.gmra.mxu3 %vm483_vm3, %v1619_v17  ;;  %v1686_v14 = vsel %vm483_vm3, %v1624_v15, 0 }
 0x960   :  { %1695 = vmatpush.bf16.xpose.msrb.mxu0 %v1686_v14 }
 0x961   :  { %v1759_v18 = vpack.c.bf16 %v1613_v11, %v1613_v11 }
 0x963   :  { %v1803_v19 = vsel %vm635_vm4, %v1759_v18, 0 }
 0x964   :  { %1812 = vmatpush.bf16.msrb.mxu3 %v1803_v19 }
 0x966   :  { %v1614_v21 = vpop.f32.mrf.mxu0 }
 0x967   :  { %v1615_v22 = vadd.f32 %v5100_v39, %v1614_v21  ;;  %4600 = vmatmul.msk.bf16.vlgmr.msrb.gmra.mxu0 %vm483_vm3, %v1620_v20 }
 0x969   :  { %v1760_v50 = vpack.c.bf16 %v1615_v22, %v1615_v22 }
 0x96b   :  { %v1822_v23 = vsel %vm635_vm4, %v1760_v50, 0 }
 0x96c   :  { %1831 = vmatpush.bf16.msra.mxu0 %v1822_v23 }
 0x9ae   :  { %v1480_v1 = vpop.f32.mrf.mxu1 }
 0x9af   :  { %v5723_v29 = vadd.f32 %v1480_v1, %v1106_v27 }
 0x9b6   :  { %v5725_v30 = vpop.f32.mrf.mxu1 }
 0x9be   :  { %v1485_v33 = vpop.f32.mrf.mxu1 }
 0x9bf   :  { %v5729_v34 = vadd.f32 %v1485_v33, %v1111_v31 }
 0x9c6   :  { %v5731_v35 = vpop.f32.mrf.mxu1 }
 0x9ce   :  { %v1640_v36 = vpop.f32.mrf.mxu1 }
 0x9cf   :  { %v1701_v37 = vmul.f32 0.35355338, %v1640_v36 }
 0x9d1   :  { %v1705_v38 = vadd.f32 %v1701_v37, %v5519_v3 }
 0x9d3   :  { %v1709_v39 = vsel %vm483_vm3, %v1705_v38, -inf }
 0x9d4   :  { %1710 = vmax.xlane.f32.xlu2 %v1709_v39 }
 0x9d6   :  { %v1642_v24 = vpop.f32.mrf.mxu1 }
 0x9da   :  { %v1659_v53 = vpop.f32.mrf.mxu2 }
 0x9db   :  { %v1702_v40 = vmul.f32 0.35355338, %v1659_v53  ;;  %v4605_v53 = vld [vmem:[%s5612_s23 + $0xc] sm:$0xf] }
 0x9dd   :  { %v1706_v41 = vadd.f32 %v1702_v40, %v5515_v58  ;;  %v1848_v40 = vsel %vm635_vm4, %v4605_v53, 0 }
 0x9de   :  { %1857 = vmatpush.bf16.msra.mxu1 %v1848_v40 }
 0x9df   :  { %v1712_v42 = vsel %vm483_vm3, %v1706_v41, -inf }
 0x9e0   :  { %1713 = vmax.xlane.f32.xlu1 %v1712_v42 }
 0x9e2   :  { %v1661_v26 = vpop.f32.mrf.mxu2  ;;  %v1678_v55 = vpop.f32.mrf.mxu3 }
 0x9e3   :  { %v1703_v43 = vmul.f32 0.35355338, %v1678_v55 }
 0x9e4   :  { %v1697_v45 = vpop.f32.mrf.mxu0 }
 0x9e5   :  { %v1707_v47 = vadd.f32 %v1703_v43, %v5523_v12  ;;  %v1704_v17 = vmul.f32 0.35355338, %v1697_v45 }
 0x9e7   :  { %v1715_v49 = vsel %vm483_vm3, %v1707_v47, -inf  ;;  %v1708_v7 = vadd.f32 %v1704_v17, %v5528_v28 }
 0x9e8   :  { %1716 = vmax.xlane.f32.xlu2 %v1715_v49 }
 0x9e9   :  { %v1718_v14 = vsel %vm483_vm3, %v1708_v7, -inf }
 0x9ea   :  { %v1680_v51 = vpop.f32.mrf.mxu3 }
 0x9ec   :  { %v1699_v52 = vpop.f32.mrf.mxu0 }
 0xa47   :  { %v1711_v56 = vpop.xlane.xlu2 %1710 }
 0xa48   :  { %v1721_v59 = vsub.f32 %v1705_v38, %v1711_v56 }
 0xa4a   :  { %v1725_v60 = vmul.f32 1.442695, %v1721_v59 }
 0xa4c   :  { %5190 = vpow2.f32 %v1725_v60 }
 0xa52   :  { %v5191_v57 = vpop.eup %5190 }
 0xa53   :  { %v1714_v8 = vpop.xlane.xlu1 %1713  ;;  %v1733_v10 = vsel %vm483_vm3, %v5191_v57, 0.0 }
 0xa54   :  { %v1722_v13 = vsub.f32 %v1706_v41, %v1714_v8  ;;  %1734 = vadd.xlane.f32.xlu1 %v1733_v10 }
 0xa56   :  { %v1727_v2 = vmul.f32 1.442695, %v1722_v13 }
 0xa58   :  { %5192 = vpow2.f32 %v1727_v2  ;;  %v1108_v2 = vadd.f32 %v5645_v25, %v5665_v54 }
 0xa5b   :  { %v1717_v4 = vpop.xlane.xlu2 %1716 }
 0xa5c   :  { %v1723_v5 = vsub.f32 %v1707_v47, %v1717_v4 }
 0xa5e   :  { %v5193_v62 = vpop.eup %5192  ;;  %v1729_v6 = vmul.f32 1.442695, %v1723_v5  ;;  %v1491_v5 = vadd.f32 %v5725_v30, %v1108_v2 }
 0xa5f   :  { %v1736_v15 = vsel %vm483_vm3, %v5193_v62, 0.0 }
 0xa60   :  { %5194 = vpow2.f32 %v1729_v6  ;;  %1737 = vadd.xlane.f32.xlu0 %v1736_v15 }
 0xa66   :  { %v5195_v9 = vpop.eup %5194 }
 0xa67   :  { %v1739_v11 = vsel %vm483_vm3, %v5195_v9, 0.0 }
 0xa68   :  { %1740 = vadd.xlane.f32.xlu1 %v1739_v11  ;;  %1719 = vmax.xlane.f32.xlu0 %v1718_v14 }
 0xac7   :  { %v1735_v16 = vpop.xlane.xlu1 %1734 }
 0xac8   :  { %5196 = vrcp.f32 %v1735_v16 }
 0xace   :  { %v5197_v18 = vpop.eup %5196 }
 0xacf   :  { %v1749_v19 = vmul.f32 %v5197_v18, %v5191_v57  ;;  %v5101_v57 = vld [vmem:[%s5753_s28] ss:$0 sm:$0xff] }
 0xad1   :  { %v1753_v20 = vpack.c.bf16 %v1749_v19, %v1749_v19 }
 0xad3   :  { %v1738_v21 = vpop.xlane.xlu0 %1737  ;;  %4601 = vmatmul.msk.bf16.vlgmr.msrb.gmra.mxu1 %vm483_vm3, %v1753_v20 }
 0xad4   :  { %5198 = vrcp.f32 %v1738_v21  ;;  %v1113_v21 = vadd.f32 %v5653_v32, %v5669_v61  ;;  %v4995_v32 = vld [vmem:[%s5800_s14 + $0x8] sm:$0xff] }
 0xad5   :  { %2023 = vmatpush.bf16.msra.mxu2 %v4995_v32 }
 0xada   :  { %v5199_v22 = vpop.eup %5198 }
 0xadb   :  { %v1750_v50 = vmul.f32 %v5199_v22, %v5193_v62  ;;  %v1741_v23 = vpop.xlane.xlu1 %1740  ;;  %v1720_v27 = vpop.xlane.xlu0 %1719 }
 0xadc   :  { %5200 = vrcp.f32 %v1741_v23  ;;  %v1724_v1 = vsub.f32 %v1708_v7, %v1720_v27  ;;  %v1493_v23 = vadd.f32 %v5731_v35, %v1113_v21 }
 0xadd   :  { %v1754_v31 = vpack.c.bf16 %v1750_v50, %v1750_v50 }
 0xade   :  { %v1731_v33 = vmul.f32 1.442695, %v1724_v1 }
 0xadf   :  { %4602 = vmatmul.msk.bf16.vlgmr.msrb.gmra.mxu2 %vm483_vm3, %v1754_v31 }
 0xae0   :  { %5202 = vpow2.f32 %v1731_v33 }
 0xae2   :  { %v5201_v36 = vpop.eup %5200 }
 0xae3   :  { %v1751_v37 = vmul.f32 %v5201_v36, %v5195_v9 }
 0xae5   :  { %v1755_v38 = vpack.c.bf16 %v1751_v37, %v1751_v37 }
 0xae6   :  { %v5203_v39 = vpop.eup %5202 }
 0xae7   :  { %4603 = vmatmul.msk.bf16.vlgmr.msrb.gmra.mxu3 %vm483_vm3, %v1755_v38  ;;  %v1742_v24 = vsel %vm483_vm3, %v5203_v39, 0.0  ;;  %v4994_v38 = vld [vmem:[%s5800_s14] sm:$0xff] }
 0xae8   :  { %1743 = vadd.xlane.f32.xlu2 %v1742_v24  ;;  %2024 = vmatpush.bf16.msra.mxu2 %v4994_v38 }
 0xb50   :  { %v1776_v41 = vpop.f32.mrf.mxu1 }
 0xb58   :  { %v1778_v42 = vpop.f32.mrf.mxu1 }
 0xb5b   :  { %v1744_v26 = vpop.xlane.xlu2 %1743 }
 0xb5c   :  { %5204 = vrcp.f32 %v1744_v26 }
 0xb62   :  { %v5205_v55 = vpop.eup %5204  ;;  %v1795_v43 = vpop.f32.mrf.mxu2 }
 0xb63   :  { %v1752_v45 = vmul.f32 %v5205_v55, %v5203_v39  ;;  %v1837_v47 = vpack.c.bf16 %v1795_v43, %v1776_v41 }
 0xb65   :  { %v1756_v49 = vpack.c.bf16 %v1752_v45, %v1752_v45  ;;  %4606 = vmatmul.msk.bf16.vlgmr.msra.gmra.mxu1 %vm483_vm3, %v1837_v47 }
 0xb67   :  { %4604 = vmatmul.msk.bf16.vlgmr.msra.gmra.mxu0 %vm483_vm3, %v1756_v49 }
 0xb6a   :  { %v1797_v51 = vpop.f32.mrf.mxu2  ;;  %v1814_v52 = vpop.f32.mrf.mxu3 }
 0xb72   :  { %v1816_v56 = vpop.f32.mrf.mxu3 }
 0xbe2   :  { %v1859_v59 = vpop.f32.mrf.mxu1 }
 0xbe3   :  { %v1869_v60 = vadd.f32 %v1859_v59, %v5723_v29 }
 0xbe4   :  { %v1833_v8 = vpop.f32.mrf.mxu0 }
 0xbe5   :  { %v1873_v10 = vadd.f32 %v1869_v60, %v5457_v46  ;;  %v1838_v13 = vpack.c.bf16 %v1833_v8, %v1814_v52 }
 0xbe7   :  { %4607 = vmatmul.msk.bf16.gmra.mxu1 %vm483_vm3, %v1838_v13  ;;  %v1881_v4 = vadd.f32 %v5101_v57, %v1873_v10 }
 0xbe9   :  { %v1887_v62 = vsel %vm227_vm5, %v1881_v4, 0.0 }
 0xbea   :  { %v1861_v6 = vpop.f32.mrf.mxu1  ;;  %1888 = vadd.xlane.f32.xlu0 %v1887_v62  ;;  %v5102_v62 = vld [vmem:[%s5770_s4] ss:$0 sm:$0xff] }
 0xbeb   :  { %v1870_v17 = vadd.f32 %v1861_v6, %v1491_v5 }
 0xbec   :  { %v1835_v15 = vpop.f32.mrf.mxu0 }
 0xbed   :  { %v1874_v29 = vadd.f32 %v1870_v17, %v5459_v48 }
 0xbef   :  { %v1882_v7 = vadd.f32 %v5101_v57, %v1874_v29  ;;  %v5103_v29 = vld [vmem:[%s5775_s9] ss:$0 sm:$0xff] }
 0xbf1   :  { %v1890_v46 = vsel %vm227_vm5, %v1882_v7, 0.0 }
 0xbf2   :  { %1891 = vadd.xlane.f32.xlu1 %v1890_v46 }
 0xc5d   :  { %v1889_v25 = vpop.xlane.xlu0 %1888 }
 0xc5e   :  { %v1899_v54 = vmul.f32 %v1889_v25, %v5397_v44 }
 0xc60   :  { %v5778_v48 = vsub.f32 %v1881_v4, %v1899_v54 }
 0xc62   :  { %v1907_v30 = vmul.f32 %v5778_v48, %v5778_v48 }
 0xc64   :  { %v1864_v9 = vpop.f32.mrf.mxu1  ;;  %v1911_v11 = vsel %vm227_vm5, %v1907_v30, 0.0 }
 0xc65   :  { %v1871_v14 = vadd.f32 %v1864_v9, %v5729_v34  ;;  %v1892_v16 = vpop.xlane.xlu1 %1891  ;;  %1912 = vadd.xlane.f32.xlu2 %v1911_v11 }
 0xc66   :  { %v1900_v18 = vmul.f32 %v1892_v16, %v5397_v44 }
 0xc67   :  { %v1875_v19 = vadd.f32 %v1871_v14, %v5483_v63 }
 0xc68   :  { %v5786_v20 = vsub.f32 %v1882_v7, %v1900_v18 }
 0xc69   :  { %v1883_v22 = vadd.f32 %v5101_v57, %v1875_v19 }
 0xc6a   :  { %v1908_v50 = vmul.f32 %v5786_v20, %v5786_v20 }
 0xc6b   :  { %v1893_v27 = vsel %vm227_vm5, %v1883_v22, 0.0 }
 0xc6c   :  { %v1866_v34 = vpop.f32.mrf.mxu1  ;;  %1894 = vadd.xlane.f32.xlu1 %v1893_v27  ;;  %v1914_v1 = vsel %vm227_vm5, %v1908_v50, 0.0  ;;  %v5002_v27 = vld [vmem:[%s5838_s24 + $0x30] sm:$0xff] }
 0xc6d   :  { %v1872_v31 = vadd.f32 %v1866_v34, %v1493_v23  ;;  %1915 = vadd.xlane.f32.xlu0 %v1914_v1 }
 0xc6f   :  { %v1876_v63 = vadd.f32 %v1872_v31, %v5485_v0 }
 0xc71   :  { %v1884_v33 = vadd.f32 %v5101_v57, %v1876_v63 }
 0xc73   :  { %v1896_v36 = vsel %vm227_vm5, %v1884_v33, 0.0 }
 0xc74   :  { %1897 = vadd.xlane.f32.xlu2 %v1896_v36 }
 0xcd8   :  { %v1913_v61 = vpop.xlane.xlu2 %1912 }
 0xcd9   :  { %v1923_v35 = vmul.f32 %v1913_v61, %v5397_v44 }
 0xcdb   :  { %v1927_v37 = vadd.f32 1e-05, %v1923_v35  ;;  %v5000_v35 = vld [vmem:[%s5838_s24 + $0x20] sm:$0xff] }
 0xcdd   :  { %5206 = vrsqrt.f32 %v1927_v37  ;;  %vm1937_vm7 = vweird.f32 %v1927_v37 }
 0xcdf   :  { %v1895_v0 = vpop.xlane.xlu1 %1894 }
 0xce0   :  { %v1901_v39 = vmul.f32 %v1895_v0, %v5397_v44  ;;  %v1916_v24 = vpop.xlane.xlu0 %1915 }
 0xce1   :  { %v1924_v53 = vmul.f32 %v1916_v24, %v5397_v44 }
 0xce2   :  { %v5807_v40 = vsub.f32 %v1883_v22, %v1901_v39  ;;  %v5003_v22 = vld [vmem:[%s5838_s24 + $0x38] sm:$0xff] }
 0xce3   :  { %v5207_v41 = vpop.eup %5206  ;;  %v1928_v42 = vadd.f32 1e-05, %v1924_v53  ;;  %2142 = vmatpush.bf16.msra.mxu3 %v5003_v22  ;;  %v4999_v39 = vld [vmem:[%s5838_s24 + $0x18] sm:$0xff] }
 0xce4   :  { %v1932_v26 = vmul.f32 %v5207_v41, %v1927_v37  ;;  %v1909_v55 = vmul.f32 %v5807_v40, %v5807_v40  ;;  %vm1938_vm6 = vweird.f32 %v5207_v41 }
 0xce5   :  { %5208 = vrsqrt.f32 %v1928_v42  ;;  %vm1939_vm8 = vmor %vm1937_vm7, %vm1938_vm6  ;;  %vm1947_vm10 = vweird.f32 %v1928_v42 }
 0xce6   :  { %v1933_v43 = vmul.f32 %v5207_v41, %v1932_v26  ;;  %v1917_v45 = vsel %vm227_vm5, %v1909_v55, 0.0 }
 0xce7   :  { %1918 = vadd.xlane.f32.xlu0 %v1917_v45  ;;  %v1898_v47 = vpop.xlane.xlu2 %1897  ;;  %2143 = vmatpush.bf16.msra.mxu3 %v5002_v27  ;;  %v4997_v45 = vld [vmem:[%s5838_s24 + $0x8] sm:$0xff] }
 0xce8   :  { %v1934_v49 = vmul.f32 0.5, %v1933_v43  ;;  %v1902_v51 = vmul.f32 %v1898_v47, %v5397_v44  ;;  %v5104_v47 = vld [vmem:[%s5829_s19] ss:$0 sm:$0xff] }
 0xcea   :  { %v1935_v52 = vsub.f32 1.5, %v1934_v49  ;;  %v5813_v56 = vsub.f32 %v1884_v33, %v1902_v51  ;;  %v5001_v33 = vld [vmem:[%s5838_s24 + $0x28] sm:$0xff]  ;;  %v4996_v51 = vld [vmem:[%s5838_s24] sm:$0xff] }
 0xceb   :  { %v5209_v59 = vpop.eup %5208  ;;  %2144 = vmatpush.bf16.msra.mxu3 %v5001_v33 }
 0xcec   :  { %v1936_v60 = vmul.f32 %v5207_v41, %v1935_v52  ;;  %v1942_v57 = vmul.f32 %v5209_v59, %v1928_v42  ;;  %v1910_v8 = vmul.f32 %v5813_v56, %v5813_v56  ;;  %vm1948_vm9 = vweird.f32 %v5209_v59  ;;  %v4998_v42 = vld [vmem:[%s5838_s24 + $0x10] sm:$0xff] }
 0xced   :  { %vm1949_vm11 = vmor %vm1947_vm10, %vm1948_vm9 }
 0xcee   :  { %v1943_v10 = vmul.f32 %v5209_v59, %v1942_v57  ;;  %v1920_v13 = vsel %vm227_vm5, %v1910_v8, 0.0  ;;  %v1940_v2 = vsel %vm1939_vm8, %v5207_v41, %v1936_v60 }
 0xcef   :  { %1921 = vadd.xlane.f32.xlu1 %v1920_v13  ;;  %v1971_v6 = vmul.f32 %v1940_v2, %v5778_v48  ;;  %2145 = vmatpush.bf16.msra.mxu3 %v5000_v35 }
 0xcf0   :  { %v1944_v4 = vmul.f32 0.5, %v1943_v10 }
 0xcf1   :  { %v1978_v7 = vmul.f32 %v5102_v62, %v1971_v6 }
 0xcf2   :  { %v1945_v5 = vsub.f32 1.5, %v1944_v4 }
 0xcf3   :  { %v5822_v54 = vadd.f32 %v5103_v29, %v1978_v7  ;;  %2146 = vmatpush.bf16.msra.mxu3 %v4999_v39 }
 0xcf4   :  { %v1946_v17 = vmul.f32 %v5209_v59, %v1945_v5 }
 0xcf6   :  { %v1950_v15 = vsel %vm1949_vm11, %v5209_v59, %v1946_v17 }
 0xcf7   :  { %v1972_v46 = vmul.f32 %v1950_v15, %v5786_v20  ;;  %2147 = vmatpush.bf16.msra.mxu3 %v4998_v42 }
 0xcf9   :  { %v1979_v25 = vmul.f32 %v5102_v62, %v1972_v46 }
 0xcfb   :  { %v5824_v30 = vadd.f32 %v5103_v29, %v1979_v25  ;;  %2148 = vmatpush.bf16.msra.mxu3 %v4997_v45 }
 0xcfd   :  { %v1989_v48 = vpack.c.bf16 %v5824_v30, %v5822_v54 }
 0xcff   :  { %4616 = vmatmul.msk.bf16.vlgmr.msra.gmra.mxu2 %vm227_vm5, %v1989_v48  ;;  %2149 = vmatpush.bf16.msra.mxu3 %v4996_v51 }
 0xd5a   :  { %v1919_v9 = vpop.xlane.xlu0 %1918 }
 0xd5b   :  { %v1925_v11 = vmul.f32 %v1919_v9, %v5397_v44 }
 0xd5d   :  { %v1929_v14 = vadd.f32 1e-05, %v1925_v11 }
 0xd5f   :  { %5210 = vrsqrt.f32 %v1929_v14  ;;  %vm1957_vm13 = vweird.f32 %v1929_v14 }
 0xd62   :  { %v1922_v16 = vpop.xlane.xlu1 %1921 }
 0xd63   :  { %v1926_v18 = vmul.f32 %v1922_v16, %v5397_v44 }
 0xd65   :  { %v5211_v19 = vpop.eup %5210  ;;  %v1930_v20 = vadd.f32 1e-05, %v1926_v18 }
 0xd66   :  { %v1952_v21 = vmul.f32 %v5211_v19, %v1929_v14  ;;  %vm1958_vm12 = vweird.f32 %v5211_v19 }
 0xd67   :  { %5212 = vrsqrt.f32 %v1930_v20  ;;  %vm1959_vm14 = vmor %vm1957_vm13, %vm1958_vm12  ;;  %vm1967_vm0 = vweird.f32 %v1930_v20 }
 0xd68   :  { %v1953_v50 = vmul.f32 %v5211_v19, %v1952_v21 }
 0xd6a   :  { %v1954_v23 = vmul.f32 0.5, %v1953_v50 }
 0xd6c   :  { %v1955_v34 = vsub.f32 1.5, %v1954_v23 }
 0xd6d   :  { %v5213_v1 = vpop.eup %5212 }
 0xd6e   :  { %v1956_v31 = vmul.f32 %v5211_v19, %v1955_v34  ;;  %v1962_v63 = vmul.f32 %v5213_v1, %v1930_v20  ;;  %vm1968_vm15 = vweird.f32 %v5213_v1 }
 0xd6f   :  { %vm1969_vm1 = vmor %vm1967_vm0, %vm1968_vm15 }
 0xd70   :  { %v1963_v36 = vmul.f32 %v5213_v1, %v1962_v63  ;;  %v1960_v32 = vsel %vm1959_vm14, %v5211_v19, %v1956_v31 }
 0xd71   :  { %v1973_v38 = vmul.f32 %v1960_v32, %v5807_v40 }
 0xd72   :  { %v1964_v61 = vmul.f32 0.5, %v1963_v36 }
 0xd73   :  { %v1980_v41 = vmul.f32 %v5102_v62, %v1973_v38 }
 0xd74   :  { %v1965_v37 = vsub.f32 1.5, %v1964_v61 }
 0xd75   :  { %v5849_v55 = vadd.f32 %v5103_v29, %v1980_v41 }
 0xd76   :  { %v1966_v0 = vmul.f32 %v5213_v1, %v1965_v37 }
 0xd78   :  { %v1970_v24 = vsel %vm1969_vm1, %v5213_v1, %v1966_v0 }
 0xd79   :  { %v1974_v53 = vmul.f32 %v1970_v24, %v5813_v56  ;;  %v5105_v24 = vld [vmem:[%s5862_s1] ss:$0 sm:$0xff] }
 0xd7b   :  { %v1981_v26 = vmul.f32 %v5102_v62, %v1974_v53 }
 0xd7d   :  { %v5851_v43 = vadd.f32 %v5103_v29, %v1981_v26 }
 0xd7f   :  { %v1990_v40 = vpack.c.bf16 %v5851_v43, %v5849_v55 }
 0xd81   :  { %4617 = vmatmul.msk.bf16.gmra.mxu2 %vm227_vm5, %v1990_v40 }
 0xd82   :  { %v2026_v49 = vpop.f32.mrf.mxu2 }
 0xd83   :  { %v2027_v52 = vadd.f32 %v5104_v47, %v2026_v49 }
 0xd85   :  { %v2036_v56 = vmul.f32 %v2027_v52, %v2027_v52 }
 0xd87   :  { %v2040_v59 = vmul.f32 %v2036_v56, %v2027_v52 }
 0xd89   :  { %v2044_v60 = vmul.f32 0.044715, %v2040_v59 }
 0xd8a   :  { %v2028_v57 = vpop.f32.mrf.mxu2 }
 0xd8b   :  { %v2048_v8 = vadd.f32 %v2044_v60, %v2027_v52  ;;  %v2029_v10 = vadd.f32 %v5104_v47, %v2028_v57 }
 0xd8d   :  { %v2052_v13 = vmul.f32 0.7978846, %v2048_v8  ;;  %v2037_v2 = vmul.f32 %v2029_v10, %v2029_v10 }
 0xd8f   :  { %v2041_v4 = vmul.f32 %v2037_v2, %v2029_v10  ;;  %5214 = vtanh.f32 %v2052_v13 }
 0xd91   :  { %v2045_v5 = vmul.f32 0.044715, %v2041_v4 }
 0xd93   :  { %v2049_v62 = vadd.f32 %v2045_v5, %v2029_v10 }
 0xd95   :  { %v2053_v6 = vmul.f32 0.7978846, %v2049_v62  ;;  %v5215_v17 = vpop.eup %5214 }
 0xd96   :  { %v2060_v15 = vadd.f32 1.0, %v5215_v17 }
 0xd97   :  { %5216 = vtanh.f32 %v2053_v6 }
 0xd98   :  { %v2064_v7 = vmul.f32 0.5, %v2060_v15 }
 0xd9a   :  { %v2068_v48 = vmul.f32 %v2064_v7, %v2027_v52  ;;  %v5009_v7 = vld [vmem:[%s5441_s7 + $0x48] sm:$0xff] }
 0xd9b   :  { %2387 = vmatpush.bf16.msrb.mxu2 %v5009_v7 }
 0xd9d   :  { %v5217_v29 = vpop.eup %5216 }
 0xd9e   :  { %v2061_v46 = vadd.f32 1.0, %v5217_v29  ;;  %v5007_v29 = vld [vmem:[%s5436_s3 + $0x48] sm:$0xff] }
 0xd9f   :  { %2346 = vmatpush.bf16.msrb.mxu1 %v5007_v29 }
 0xda0   :  { %v2065_v25 = vmul.f32 0.5, %v2061_v46 }
 0xda2   :  { %v2069_v9 = vmul.f32 %v2065_v25, %v2029_v10 }
 0xda4   :  { %v2072_v11 = vpack.c.bf16 %v2069_v9, %v2068_v48  ;;  %v5004_v9 = vld [vmem:[%s5431_s29 + $0x40] sm:$0xff] }
 0xda6   :  { %2150 = vmatmul.bf16.vlgmr.msra.gmra.mxu3 %v2072_v11  ;;  %v5006_v11 = vld [vmem:[%s5436_s3 + $0x40] sm:$0xff] }
 0xda7   :  { %2347 = vmatpush.bf16.msrb.mxu1 %v5006_v11 }
 0xe04   :  { %v2031_v14 = vpop.f32.mrf.mxu2 }
 0xe05   :  { %v2032_v16 = vadd.f32 %v5104_v47, %v2031_v14  ;;  %v5008_v14 = vld [vmem:[%s5441_s7 + $0x40] sm:$0xff] }
 0xe06   :  { %2388 = vmatpush.bf16.msrb.mxu2 %v5008_v14 }
 0xe07   :  { %v2038_v18 = vmul.f32 %v2032_v16, %v2032_v16 }
 0xe09   :  { %v2042_v19 = vmul.f32 %v2038_v18, %v2032_v16 }
 0xe0b   :  { %v2046_v20 = vmul.f32 0.044715, %v2042_v19 }
 0xe0c   :  { %v2033_v21 = vpop.f32.mrf.mxu2 }
 0xe0d   :  { %v2050_v22 = vadd.f32 %v2046_v20, %v2032_v16  ;;  %v2034_v50 = vadd.f32 %v5104_v47, %v2033_v21 }
 0xe0f   :  { %v2054_v23 = vmul.f32 0.7978846, %v2050_v22  ;;  %v2039_v27 = vmul.f32 %v2034_v50, %v2034_v50 }
 0xe11   :  { %v2043_v34 = vmul.f32 %v2039_v27, %v2034_v50  ;;  %5218 = vtanh.f32 %v2054_v23 }
 0xe13   :  { %v2047_v1 = vmul.f32 0.044715, %v2043_v34 }
 0xe15   :  { %v2051_v31 = vadd.f32 %v2047_v1, %v2034_v50 }
 0xe17   :  { %v2055_v63 = vmul.f32 0.7978846, %v2051_v31  ;;  %v5219_v33 = vpop.eup %5218 }
 0xe18   :  { %v2062_v36 = vadd.f32 1.0, %v5219_v33 }
 0xe19   :  { %5220 = vtanh.f32 %v2055_v63 }
 0xe1a   :  { %v2066_v35 = vmul.f32 0.5, %v2062_v36 }
 0xe1c   :  { %v2070_v38 = vmul.f32 %v2066_v35, %v2032_v16 }
 0xe1f   :  { %v5221_v32 = vpop.eup %5220 }
 0xe20   :  { %v2063_v61 = vadd.f32 1.0, %v5221_v32 }
 0xe22   :  { %v2067_v37 = vmul.f32 0.5, %v2063_v61 }
 0xe24   :  { %v2071_v0 = vmul.f32 %v2067_v37, %v2034_v50 }
 0xe26   :  { %v2073_v39 = vpack.c.bf16 %v2071_v0, %v2070_v38 }
 0xe28   :  { %2155 = vmatmul.bf16.gmra.mxu3 %v2073_v39 }
 0xe29   :  { %v2151_v53 = vpop.f32.mrf.mxu3 }
 0xe2a   :  { %v2152_v41 = vadd.f32 %v5105_v24, %v2151_v53 }
 0xe2c   :  { %v2161_v42 = vadd.f32 %v2152_v41, %v5822_v54  ;;  %v5106_v41 = vld [vmem:[%s5872_s8] ss:$0 sm:$0xff] }
 0xe2e   :  { %v2167_v26 = vsel %vm227_vm5, %v2161_v42, 0.0 }
 0xe2f   :  { %2168 = vadd.xlane.f32.xlu2 %v2167_v26 }
 0xe31   :  { %v2153_v45 = vpop.f32.mrf.mxu3 }
 0xe32   :  { %v2154_v40 = vadd.f32 %v5105_v24, %v2153_v45 }
 0xe34   :  { %v2162_v47 = vadd.f32 %v2154_v40, %v5824_v30  ;;  %v5107_v40 = vld [vmem:[%s5877_s16] ss:$0 sm:$0xff] }
 0xe36   :  { %v2170_v49 = vsel %vm227_vm5, %v2162_v47, 0.0 }
 0xe37   :  { %2171 = vadd.xlane.f32.xlu0 %v2170_v49 }
 0xea2   :  { %v2169_v54 = vpop.xlane.xlu2 %2168 }
 0xea3   :  { %v2179_v51 = vmul.f32 %v2169_v54, %v5397_v44 }
 0xea5   :  { %v5880_v52 = vsub.f32 %v2161_v42, %v2179_v51 }
 0xea7   :  { %v2187_v30 = vmul.f32 %v5880_v52, %v5880_v52 }
 0xea9   :  { %v2191_v56 = vsel %vm227_vm5, %v2187_v30, 0.0 }
 0xeaa   :  { %2192 = vadd.xlane.f32.xlu1 %v2191_v56  ;;  %v2172_v59 = vpop.xlane.xlu0 %2171 }
 0xeab   :  { %v2180_v60 = vmul.f32 %v2172_v59, %v5397_v44  ;;  %v2156_v57 = vpop.f32.mrf.mxu3 }
 0xeac   :  { %v2157_v8 = vadd.f32 %v5105_v24, %v2156_v57 }
 0xead   :  { %v5886_v10 = vsub.f32 %v2162_v47, %v2180_v60 }
 0xeae   :  { %v2163_v13 = vadd.f32 %v2157_v8, %v5849_v55  ;;  %v5005_v55 = vld [vmem:[%s5431_s29 + $0x48] sm:$0xff] }
 0xeaf   :  { %v2188_v2 = vmul.f32 %v5886_v10, %v5886_v10  ;;  %2305 = vmatpush.bf16.msrb.mxu0 %v5005_v55 }
 0xeb0   :  { %v2173_v4 = vsel %vm227_vm5, %v2163_v13, 0.0 }
 0xeb1   :  { %2174 = vadd.xlane.f32.xlu0 %v2173_v4  ;;  %v2194_v5 = vsel %vm227_vm5, %v2188_v2, 0.0 }
 0xeb2   :  { %2195 = vadd.xlane.f32.xlu2 %v2194_v5 }
 0xeb3   :  { %v2158_v62 = vpop.f32.mrf.mxu3  ;;  %2306 = vmatpush.bf16.msrb.mxu0 %v5004_v9 }
 0xeb4   :  { %v2159_v6 = vadd.f32 %v5105_v24, %v2158_v62 }
 0xeb6   :  { %v2164_v17 = vadd.f32 %v2159_v6, %v5851_v43 }
 0xeb8   :  { %v2176_v15 = vsel %vm227_vm5, %v2164_v17, 0.0 }
 0xeb9   :  { %2177 = vadd.xlane.f32.xlu1 %v2176_v15 }
 0xf1d   :  { %v2193_v46 = vpop.xlane.xlu1 %2192 }
 0xf1e   :  { %v2203_v25 = vmul.f32 %v2193_v46, %v5397_v44 }
 0xf20   :  { %v2207_v48 = vadd.f32 1e-05, %v2203_v25 }
 0xf22   :  { %5222 = vrsqrt.f32 %v2207_v48  ;;  %vm2217_vm6 = vweird.f32 %v2207_v48 }
 0xf24   :  { %v2175_v43 = vpop.xlane.xlu0 %2174 }
 0xf25   :  { %v2181_v16 = vmul.f32 %v2175_v43, %v5397_v44  ;;  %v2196_v18 = vpop.xlane.xlu2 %2195  ;;  %v5109_v43 = vld [vmem:[%s5464_s11 + $0x4] ss:$0 sm:$0xff] }
 0xf26   :  { %v2204_v19 = vmul.f32 %v2196_v18, %v5397_v44 }
 0xf27   :  { %v5904_v20 = vsub.f32 %v2163_v13, %v2181_v16 }
 0xf28   :  { %v5223_v21 = vpop.eup %5222  ;;  %v2208_v22 = vadd.f32 1e-05, %v2204_v19 }
 0xf29   :  { %v2212_v50 = vmul.f32 %v5223_v21, %v2207_v48  ;;  %v2189_v23 = vmul.f32 %v5904_v20, %v5904_v20  ;;  %vm2218_vm2 = vweird.f32 %v5223_v21 }
 0xf2a   :  { %5224 = vrsqrt.f32 %v2208_v22  ;;  %vm2219_vm7 = vmor %vm2217_vm6, %vm2218_vm2  ;;  %vm2227_vm9 = vweird.f32 %v2208_v22 }
 0xf2b   :  { %v2213_v27 = vmul.f32 %v5223_v21, %v2212_v50  ;;  %v2197_v34 = vsel %vm227_vm5, %v2189_v23, 0.0 }
 0xf2c   :  { %v2178_v1 = vpop.xlane.xlu1 %2177  ;;  %2198 = vadd.xlane.f32.xlu2 %v2197_v34 }
 0xf2d   :  { %v2214_v31 = vmul.f32 0.5, %v2213_v27  ;;  %v2182_v63 = vmul.f32 %v2178_v1, %v5397_v44  ;;  %v5110_v27 = vld [vmem:[%s5473_s15 + $0x4] ss:$0 sm:$0xff] }
 0xf2f   :  { %v2215_v33 = vsub.f32 1.5, %v2214_v31  ;;  %v2186_v36 = vsub.f32 %v2164_v17, %v2182_v63 }
 0xf30   :  { %v5225_v32 = vpop.eup %5224 }
 0xf31   :  { %v2216_v61 = vmul.f32 %v5223_v21, %v2215_v33  ;;  %v2222_v35 = vmul.f32 %v5225_v32, %v2208_v22  ;;  %v2190_v37 = vmul.f32 %v2186_v36, %v2186_v36  ;;  %vm2228_vm8 = vweird.f32 %v5225_v32 }
 0xf32   :  { %vm2229_vm10 = vmor %vm2227_vm9, %vm2228_vm8 }
 0xf33   :  { %v2223_v38 = vmul.f32 %v5225_v32, %v2222_v35  ;;  %v2200_v0 = vsel %vm227_vm5, %v2190_v37, 0.0  ;;  %v2220_v39 = vsel %vm2219_vm7, %v5223_v21, %v2216_v61 }
 0xf34   :  { %2201 = vadd.xlane.f32.xlu0 %v2200_v0  ;;  %v2251_v42 = vmul.f32 %v2220_v39, %v5880_v52 }
 0xf35   :  { %v2224_v24 = vmul.f32 0.5, %v2223_v38 }
 0xf36   :  { %v2258_v47 = vmul.f32 %v5106_v41, %v2251_v42 }
 0xf37   :  { %v2225_v53 = vsub.f32 1.5, %v2224_v24 }
 0xf38   :  { %v5915_v51 = vadd.f32 %v5107_v40, %v2258_v47 }
 0xf39   :  { %v2226_v26 = vmul.f32 %v5225_v32, %v2225_v53 }
 0xf3b   :  { %v2230_v45 = vsel %vm2229_vm10, %v5225_v32, %v2226_v26  ;;  %v5108_v32 = vld [vmem:[%s5426_s25 + $0x4] ss:$0 sm:$0xff] }
 0xf3c   :  { %v2252_v49 = vmul.f32 %v2230_v45, %v5886_v10 }
 0xf3e   :  { %v2259_v54 = vmul.f32 %v5106_v41, %v2252_v49 }
 0xf40   :  { %v5917_v30 = vadd.f32 %v5107_v40, %v2259_v54 }
 0xf42   :  { %v5921_v56 = vpack.c.bf16 %v5917_v30, %v5915_v51 }
 0xf44   :  { %4663 = vmatmul.msk.bf16.vlgmr.msrb.gmra.mxu0 %vm227_vm5, %v5921_v56  ;;  %4678 = vmatmul.msk.bf16.vlgmr.msrb.gmra.mxu1 %vm227_vm5, %v5921_v56 }
 0xf45   :  { %4693 = vmatmul.msk.bf16.vlgmr.msrb.gmra.mxu2 %vm227_vm5, %v5921_v56 }
 0xf9f   :  { %v2199_v52 = vpop.xlane.xlu2 %2198 }
 0xfa0   :  { %v2205_v59 = vmul.f32 %v2199_v52, %v5397_v44 }
 0xfa2   :  { %v2209_v60 = vadd.f32 1e-05, %v2205_v59 }
 0xfa4   :  { %5226 = vrsqrt.f32 %v2209_v60  ;;  %vm2237_vm12 = vweird.f32 %v2209_v60 }
 0xfa7   :  { %v2202_v57 = vpop.xlane.xlu0 %2201 }
 0xfa8   :  { %v2206_v8 = vmul.f32 %v2202_v57, %v5397_v44 }
 0xfaa   :  { %v5227_v10 = vpop.eup %5226  ;;  %v2210_v13 = vadd.f32 1e-05, %v2206_v8 }
 0xfab   :  { %v2232_v2 = vmul.f32 %v5227_v10, %v2209_v60  ;;  %vm2238_vm11 = vweird.f32 %v5227_v10 }
 0xfac   :  { %5228 = vrsqrt.f32 %v2210_v13  ;;  %vm2239_vm13 = vmor %vm2237_vm12, %vm2238_vm11  ;;  %vm2247_vm15 = vweird.f32 %v2210_v13 }
 0xfad   :  { %v2233_v4 = vmul.f32 %v5227_v10, %v2232_v2 }
 0xfaf   :  { %v2234_v5 = vmul.f32 0.5, %v2233_v4 }
 0xfb1   :  { %v2235_v62 = vsub.f32 1.5, %v2234_v5 }
 0xfb2   :  { %v5229_v6 = vpop.eup %5228 }
 0xfb3   :  { %v2236_v17 = vmul.f32 %v5227_v10, %v2235_v62  ;;  %v2242_v15 = vmul.f32 %v5229_v6, %v2210_v13  ;;  %vm2248_vm14 = vweird.f32 %v5229_v6 }
 0xfb4   :  { %vm2249_vm0 = vmor %vm2247_vm15, %vm2248_vm14 }
 0xfb5   :  { %v2243_v55 = vmul.f32 %v5229_v6, %v2242_v15  ;;  %v2240_v29 = vsel %vm2239_vm13, %v5227_v10, %v2236_v17 }
 0xfb6   :  { %v2253_v25 = vmul.f32 %v2240_v29, %v5904_v20 }
 0xfb7   :  { %v2244_v7 = vmul.f32 0.5, %v2243_v55 }
 0xfb8   :  { %v2260_v11 = vmul.f32 %v5106_v41, %v2253_v25 }
 0xfb9   :  { %v2245_v46 = vsub.f32 1.5, %v2244_v7 }
 0xfba   :  { %v5933_v19 = vadd.f32 %v5107_v40, %v2260_v11 }
 0xfbb   :  { %v2246_v48 = vmul.f32 %v5229_v6, %v2245_v46 }
 0xfbd   :  { %v2250_v9 = vsel %vm2249_vm0, %v5229_v6, %v2246_v48 }
 0xfbe   :  { %v2254_v14 = vmul.f32 %v2250_v9, %v2186_v36 }
 0xfc0   :  { %v2261_v16 = vmul.f32 %v5106_v41, %v2254_v14 }
 0xfc1   :  { %v2349_v18 = vpop.f32.mrf.mxu1  ;;  %v2308_v20 = vpop.f32.mrf.mxu0 }
 0xfc2   :  { %v5935_v21 = vadd.f32 %v5107_v40, %v2261_v16  ;;  %v2350_v22 = vadd.f32 %v5109_v43, %v2349_v18  ;;  %v2309_v0 = vadd.f32 %v5108_v32, %v2308_v20 }
 0xfc4   :  { %v5939_v50 = vpack.c.bf16 %v5935_v21, %v5933_v19  ;;  %v2404_v23 = vpack.c.bf16 %v2350_v22, %v2350_v22  ;;  %v2400_v42 = vpack.c.bf16 %v2309_v0, %v2309_v0 }
 0xfc6   :  { %v2412_v34 = vsel %vm483_vm3, %v2404_v23, 0  ;;  %4664 = vmatmul.msk.bf16.gmra.mxu0 %vm227_vm5, %v5939_v50  ;;  %4679 = vmatmul.msk.bf16.gmra.mxu1 %vm227_vm5, %v5939_v50 }
 0xfc7   :  { %4694 = vmatmul.msk.bf16.gmra.mxu2 %vm227_vm5, %v5939_v50  ;;  %2421 = vmatpush.bf16.xpose.msra.mxu0 %v2412_v34 }
 0xfc8   :  { %v2390_v1 = vpop.f32.mrf.mxu2 }
 0xfc9   :  { %v2391_v31 = vadd.f32 %v5110_v27, %v2390_v1  ;;  %v2351_v63 = vpop.f32.mrf.mxu1  ;;  %v2310_v37 = vpop.f32.mrf.mxu0 }
 0xfca   :  { %v2352_v33 = vadd.f32 %v5109_v43, %v2351_v63  ;;  %v2311_v24 = vadd.f32 %v5108_v32, %v2310_v37 }
 0xfcb   :  { %v2540_v36 = vpack.c.bf16 %v2391_v31, %v2391_v31 }
 0xfcc   :  { %v2405_v61 = vpack.c.bf16 %v2352_v33, %v2352_v33  ;;  %v2401_v26 = vpack.c.bf16 %v2311_v24, %v2311_v24 }
 0xfcd   :  { %v2548_v35 = vsel %vm635_vm4, %v2540_v36, 0 }
 0xfce   :  { %2557 = vmatpush.bf16.msra.mxu2 %v2548_v35  ;;  %v2431_v38 = vsel %vm483_vm3, %v2405_v61, 0 }
 0xfcf   :  { %2440 = vmatpush.bf16.xpose.msrb.mxu3 %v2431_v38 }
 0xfd0   :  { %v2392_v39 = vpop.f32.mrf.mxu2 }
 0xfd1   :  { %v2393_v53 = vadd.f32 %v5110_v27, %v2392_v39 }
 0xfd3   :  { %v2541_v41 = vpack.c.bf16 %v2393_v53, %v2393_v53 }
 0xfd5   :  { %v2567_v45 = vsel %vm635_vm4, %v2541_v41, 0 }
 0xfd6   :  { %4695 = vmatmul.msk.bf16.vlgmr.msra.gmra.mxu0 %vm483_vm3, %v2400_v42  ;;  %4696 = vmatmul.msk.bf16.vlgmr.msrb.gmra.mxu3 %vm483_vm3, %v2401_v26 }
 0xfd7   :  { %2576 = vmatpush.bf16.msra.mxu3 %v2567_v45  ;;  %v5011_v45 = vld [vmem:[%s5431_s29 + $0x58] sm:$0xff] }
 0xfd8   :  { %2652 = vmatpush.bf16.msrb.mxu2 %v5011_v45 }
0x1043   :  { %v2313_v40 = vpop.f32.mrf.mxu0  ;;  %v2354_v47 = vpop.f32.mrf.mxu1 }
0x1044   :  { %v2355_v49 = vadd.f32 %v5109_v43, %v2354_v47  ;;  %v2314_v60 = vadd.f32 %v5108_v32, %v2313_v40  ;;  %v5013_v40 = vld [vmem:[%s5436_s3 + $0x58] sm:$0xff]  ;;  %v5010_v47 = vld [vmem:[%s5431_s29 + $0x50] sm:$0xff] }
0x1045   :  { %2693 = vmatpush.bf16.msrb.mxu3 %v5013_v40  ;;  %2653 = vmatpush.bf16.msrb.mxu2 %v5010_v47 }
0x1046   :  { %v2406_v54 = vpack.c.bf16 %v2355_v49, %v2355_v49  ;;  %v2402_v5 = vpack.c.bf16 %v2314_v60, %v2314_v60 }
0x1048   :  { %v2450_v52 = vsel %vm483_vm3, %v2406_v54, 0 }
0x1049   :  { %2459 = vmatpush.bf16.xpose.msrb.mxu0 %v2450_v52  ;;  %v5012_v52 = vld [vmem:[%s5436_s3 + $0x50] sm:$0xff] }
0x104a   :  { %v2395_v59 = vpop.f32.mrf.mxu2  ;;  %2694 = vmatpush.bf16.msrb.mxu3 %v5012_v52 }
0x104b   :  { %v2396_v57 = vadd.f32 %v5110_v27, %v2395_v59  ;;  %v2315_v8 = vpop.f32.mrf.mxu0  ;;  %v2356_v10 = vpop.f32.mrf.mxu1 }
0x104c   :  { %v2357_v13 = vadd.f32 %v5109_v43, %v2356_v10  ;;  %v2316_v15 = vadd.f32 %v5108_v32, %v2315_v8 }
0x104d   :  { %v2542_v2 = vpack.c.bf16 %v2396_v57, %v2396_v57 }
0x104e   :  { %v2407_v4 = vpack.c.bf16 %v2357_v13, %v2357_v13  ;;  %v2403_v48 = vpack.c.bf16 %v2316_v15, %v2316_v15 }
0x104f   :  { %v2586_v62 = vsel %vm635_vm4, %v2542_v2, 0 }
0x1050   :  { %v2469_v6 = vsel %vm483_vm3, %v2407_v4, 0  ;;  %4697 = vmatmul.msk.bf16.vlgmr.msrb.gmra.mxu0 %vm483_vm3, %v2402_v5 }
0x1051   :  { %2595 = vmatpush.bf16.msra.mxu0 %v2586_v62  ;;  %2478 = vmatpush.bf16.xpose.msra.mxu1 %v2469_v6 }
0x1052   :  { %v2397_v17 = vpop.f32.mrf.mxu2 }
0x1053   :  { %v2398_v55 = vadd.f32 %v5110_v27, %v2397_v17  ;;  %v2423_v29 = vpop.f32.mrf.mxu0 }
0x1054   :  { %v2484_v7 = vmul.f32 0.35355338, %v2423_v29 }
0x1055   :  { %v2543_v46 = vpack.c.bf16 %v2398_v55, %v2398_v55 }
0x1056   :  { %v2488_v25 = vadd.f32 %v2484_v7, %v5519_v3 }
0x1057   :  { %v2605_v9 = vsel %vm635_vm4, %v2543_v46, 0  ;;  %v5015_v46 = vld [vmem:[%s5441_s7 + $0x58] sm:$0xff] }
0x1058   :  { %v2492_v11 = vsel %vm483_vm3, %v2488_v25, -inf  ;;  %4698 = vmatmul.msk.bf16.vlgmr.msra.gmra.mxu1 %vm483_vm3, %v2403_v48  ;;  %2734 = vmatpush.bf16.msrb.mxu0 %v5015_v46 }
0x1059   :  { %2614 = vmatpush.bf16.msrb.mxu1 %v2605_v9  ;;  %2493 = vmax.xlane.f32.xlu2 %v2492_v11  ;;  %v2442_v14 = vpop.f32.mrf.mxu3 }
0x105a   :  { %v2485_v43 = vmul.f32 0.35355338, %v2442_v14 }
0x105b   :  { %v2425_v16 = vpop.f32.mrf.mxu0 }
0x105c   :  { %v2489_v18 = vadd.f32 %v2485_v43, %v5515_v58 }
0x105e   :  { %v2495_v22 = vsel %vm483_vm3, %v2489_v18, -inf }
0x105f   :  { %2496 = vmax.xlane.f32.xlu1 %v2495_v22 }
0x1061   :  { %v2444_v20 = vpop.f32.mrf.mxu3 }
0x10cc   :  { %v2494_v23 = vpop.xlane.xlu2 %2493 }
0x10cd   :  { %v2504_v27 = vsub.f32 %v2488_v25, %v2494_v23  ;;  %v2461_v34 = vpop.f32.mrf.mxu0  ;;  %v5014_v25 = vld [vmem:[%s5441_s7 + $0x50] sm:$0xff] }
0x10ce   :  { %v2486_v31 = vmul.f32 0.35355338, %v2461_v34  ;;  %2735 = vmatpush.bf16.msrb.mxu0 %v5014_v25 }
0x10cf   :  { %v2508_v1 = vmul.f32 1.442695, %v2504_v27 }
0x10d0   :  { %v2490_v63 = vadd.f32 %v2486_v31, %v5523_v12  ;;  %v5112_v31 = vld [vmem:[%s5464_s11 + $0x5] ss:$0 sm:$0xff] }
0x10d1   :  { %5230 = vpow2.f32 %v2508_v1 }
0x10d2   :  { %v2497_v33 = vpop.xlane.xlu1 %2496  ;;  %v2498_v36 = vsel %vm483_vm3, %v2490_v63, -inf }
0x10d3   :  { %v2505_v32 = vsub.f32 %v2489_v18, %v2497_v33  ;;  %2499 = vmax.xlane.f32.xlu2 %v2498_v36 }
0x10d5   :  { %v2510_v61 = vmul.f32 1.442695, %v2505_v32  ;;  %v2463_v35 = vpop.f32.mrf.mxu0  ;;  %v2480_v37 = vpop.f32.mrf.mxu1  ;;  %v5111_v32 = vld [vmem:[%s5426_s25 + $0x5] ss:$0 sm:$0xff] }
0x10d6   :  { %v2487_v53 = vmul.f32 0.35355338, %v2480_v37 }
0x10d7   :  { %v5231_v38 = vpop.eup %5230  ;;  %5232 = vpow2.f32 %v2510_v61 }
0x10d8   :  { %v2516_v0 = vsel %vm483_vm3, %v5231_v38, 0.0  ;;  %v2491_v42 = vadd.f32 %v2487_v53, %v5528_v28 }
0x10d9   :  { %2517 = vadd.xlane.f32.xlu1 %v2516_v0 }
0x10da   :  { %v2501_v26 = vsel %vm483_vm3, %v2491_v42, -inf }
0x10dd   :  { %v5233_v39 = vpop.eup %5232  ;;  %v2482_v24 = vpop.f32.mrf.mxu1 }
0x10de   :  { %v2519_v41 = vsel %vm483_vm3, %v5233_v39, 0.0 }
0x10df   :  { %2520 = vadd.xlane.f32.xlu0 %v2519_v41 }
0x10e7   :  { %2502 = vmax.xlane.f32.xlu0 %v2501_v26 }
0x1146   :  { %v2500_v49 = vpop.xlane.xlu2 %2499 }
0x1147   :  { %v2506_v54 = vsub.f32 %v2490_v63, %v2500_v49 }
0x1149   :  { %v2512_v59 = vmul.f32 1.442695, %v2506_v54 }
0x114b   :  { %5234 = vpow2.f32 %v2512_v59 }
0x114c   :  { %v2518_v60 = vpop.xlane.xlu1 %2517 }
0x114d   :  { %5236 = vrcp.f32 %v2518_v60 }
0x1151   :  { %v5235_v57 = vpop.eup %5234 }
0x1152   :  { %v2521_v10 = vpop.xlane.xlu0 %2520  ;;  %v2522_v13 = vsel %vm483_vm3, %v5235_v57, 0.0 }
0x1153   :  { %v5237_v8 = vpop.eup %5236  ;;  %5238 = vrcp.f32 %v2521_v10  ;;  %2523 = vadd.xlane.f32.xlu1 %v2522_v13 }
0x1154   :  { %v2532_v2 = vmul.f32 %v5237_v8, %v5231_v38 }
0x1156   :  { %v2536_v4 = vpack.c.bf16 %v2532_v2, %v2532_v2 }
0x1158   :  { %4699 = vmatmul.msk.bf16.vlgmr.msra.gmra.mxu2 %vm483_vm3, %v2536_v4 }
0x1159   :  { %v5239_v5 = vpop.eup %5238 }
0x115a   :  { %v2533_v62 = vmul.f32 %v5239_v5, %v5233_v39  ;;  %v2503_v6 = vpop.xlane.xlu0 %2502 }
0x115b   :  { %v2507_v17 = vsub.f32 %v2491_v42, %v2503_v6  ;;  %v5113_v6 = vld [vmem:[%s5473_s15 + $0x5] ss:$0 sm:$0xff] }
0x115c   :  { %v2537_v15 = vpack.c.bf16 %v2533_v62, %v2533_v62 }
0x115d   :  { %v2514_v55 = vmul.f32 1.442695, %v2507_v17 }
0x115e   :  { %4700 = vmatmul.msk.bf16.vlgmr.msra.gmra.mxu3 %vm483_vm3, %v2537_v15 }
0x115f   :  { %5240 = vpow2.f32 %v2514_v55 }
0x1165   :  { %v5241_v29 = vpop.eup %5240 }
0x1166   :  { %v2525_v7 = vsel %vm483_vm3, %v5241_v29, 0.0 }
0x1167   :  { %2526 = vadd.xlane.f32.xlu2 %v2525_v7 }
0x1168   :  { %4717 = vmatmul.msk.bf16.vlgmr.msrb.gmra.mxu2 %vm227_vm5, %v5921_v56 }
0x116e   :  { %4732 = vmatmul.msk.bf16.vlgmr.msrb.gmra.mxu3 %vm227_vm5, %v5921_v56 }
0x1178   :  { %4718 = vmatmul.msk.bf16.gmra.mxu2 %vm227_vm5, %v5939_v50 }
0x117e   :  { %4733 = vmatmul.msk.bf16.gmra.mxu3 %vm227_vm5, %v5939_v50 }
0x11c6   :  { %v2524_v48 = vpop.xlane.xlu1 %2523 }
0x11c7   :  { %5242 = vrcp.f32 %v2524_v48 }
0x11cd   :  { %v5243_v9 = vpop.eup %5242 }
0x11ce   :  { %v2534_v11 = vmul.f32 %v5243_v9, %v5235_v57 }
0x11d0   :  { %v2538_v14 = vpack.c.bf16 %v2534_v11, %v2534_v11 }
0x11d2   :  { %4701 = vmatmul.msk.bf16.vlgmr.msra.gmra.mxu0 %vm483_vm3, %v2538_v14 }
0x11da   :  { %v2527_v43 = vpop.xlane.xlu2 %2526 }
0x11db   :  { %v5990_v16 = vpop.f32.mrf.mxu2  ;;  %5244 = vrcp.f32 %v2527_v43 }
0x11e1   :  { %v5245_v18 = vpop.eup %5244  ;;  %v5992_v22 = vpop.f32.mrf.mxu3 }
0x11e2   :  { %v2535_v20 = vmul.f32 %v5245_v18, %v5241_v29  ;;  %v2620_v23 = vpack.c.bf16 %v5992_v22, %v5990_v16  ;;  %4747 = vmatmul.msk.bf16.vlgmr.msrb.gmra.mxu0 %vm227_vm5, %v5921_v56 }
0x11e3   :  { %v2561_v27 = vpop.f32.mrf.mxu2 }
0x11e4   :  { %v2539_v34 = vpack.c.bf16 %v2535_v20, %v2535_v20 }
0x11e6   :  { %4702 = vmatmul.msk.bf16.vlgmr.msrb.gmra.mxu1 %vm483_vm3, %v2539_v34 }
0x11e9   :  { %v2580_v1 = vpop.f32.mrf.mxu3 }
0x11eb   :  { %v2655_v63 = vpop.f32.mrf.mxu2 }
0x11ec   :  { %v2656_v37 = vadd.f32 %v5111_v32, %v2655_v63 }
0x11ee   :  { %v2747_v24 = vpack.c.bf16 %v2656_v37, %v2656_v37 }
0x11f1   :  { %v2696_v33 = vpop.f32.mrf.mxu3 }
0x11f2   :  { %v2697_v36 = vadd.f32 %v5112_v31, %v2696_v33  ;;  %4748 = vmatmul.msk.bf16.gmra.mxu0 %vm227_vm5, %v5939_v50 }
0x11f3   :  { %v2657_v38 = vpop.f32.mrf.mxu2 }
0x11f4   :  { %v2751_v61 = vpack.c.bf16 %v2697_v36, %v2697_v36  ;;  %v2658_v49 = vadd.f32 %v5111_v32, %v2657_v38 }
0x11f6   :  { %v2759_v35 = vsel %vm483_vm3, %v2751_v61, 0  ;;  %v2748_v60 = vpack.c.bf16 %v2658_v49, %v2658_v49 }
0x11f7   :  { %2768 = vmatpush.bf16.xpose.msra.mxu1 %v2759_v35 }
0x11f9   :  { %v2698_v0 = vpop.f32.mrf.mxu3 }
0x11fa   :  { %v2699_v39 = vadd.f32 %v5112_v31, %v2698_v0 }
0x11fb   :  { %v2660_v45 = vpop.f32.mrf.mxu2 }
0x11fc   :  { %v2752_v53 = vpack.c.bf16 %v2699_v39, %v2699_v39  ;;  %v2661_v54 = vadd.f32 %v5111_v32, %v2660_v45 }
0x11fe   :  { %4749 = vmatmul.msk.bf16.vlgmr.msra.gmra.mxu1 %vm483_vm3, %v2747_v24  ;;  %v2778_v41 = vsel %vm483_vm3, %v2752_v53, 0  ;;  %v2749_v57 = vpack.c.bf16 %v2661_v54, %v2661_v54 }
0x11ff   :  { %2787 = vmatpush.bf16.xpose.msrb.mxu1 %v2778_v41 }
0x1201   :  { %v2701_v42 = vpop.f32.mrf.mxu3 }
0x1202   :  { %v2702_v26 = vadd.f32 %v5112_v31, %v2701_v42 }
0x1203   :  { %v2662_v10 = vpop.f32.mrf.mxu2 }
0x1204   :  { %v2753_v40 = vpack.c.bf16 %v2702_v26, %v2702_v26  ;;  %v2663_v2 = vadd.f32 %v5111_v32, %v2662_v10 }
0x1206   :  { %v2797_v47 = vsel %vm483_vm3, %v2753_v40, 0  ;;  %v2750_v4 = vpack.c.bf16 %v2663_v2, %v2663_v2 }
0x1207   :  { %2806 = vmatpush.bf16.xpose.msra.mxu2 %v2797_v47 }
0x1209   :  { %v2703_v52 = vpop.f32.mrf.mxu3 }
0x120a   :  { %v2704_v59 = vadd.f32 %v5112_v31, %v2703_v52 }
0x120c   :  { %v2754_v8 = vpack.c.bf16 %v2704_v59, %v2704_v59 }
0x120e   :  { %4750 = vmatmul.msk.bf16.vlgmr.msrb.gmra.mxu1 %vm483_vm3, %v2748_v60  ;;  %4751 = vmatmul.msk.bf16.vlgmr.msra.gmra.mxu2 %vm483_vm3, %v2749_v57  ;;  %v2816_v13 = vsel %vm483_vm3, %v2754_v8, 0 }
0x120f   :  { %2825 = vmatpush.bf16.xpose.msra.mxu3 %v2816_v13 }
0x1216   :  { %4752 = vmatmul.msk.bf16.vlgmr.msra.gmra.mxu3 %vm483_vm3, %v2750_v4 }
0x124f   :  { %v6011_v5 = vpop.f32.mrf.mxu0 }
0x1257   :  { %v2599_v62 = vpop.f32.mrf.mxu0 }
0x125f   :  { %v2737_v17 = vpop.f32.mrf.mxu0 }
0x1260   :  { %v2738_v15 = vadd.f32 %v5113_v6, %v2737_v17 }
0x1262   :  { %v2887_v55 = vpack.c.bf16 %v2738_v15, %v2738_v15 }
0x1263   :  { %v6014_v29 = vpop.f32.mrf.mxu1 }
0x1264   :  { %v2895_v7 = vsel %vm635_vm4, %v2887_v55, 0  ;;  %v2621_v46 = vpack.c.bf16 %v6014_v29, %v6011_v5 }
0x1265   :  { %2904 = vmatpush.bf16.msra.mxu0 %v2895_v7 }
0x1267   :  { %v2739_v25 = vpop.f32.mrf.mxu0 }
0x1268   :  { %v2740_v48 = vadd.f32 %v5113_v6, %v2739_v25 }
0x126a   :  { %v2888_v9 = vpack.c.bf16 %v2740_v48, %v2740_v48  ;;  %v5017_v48 = vld [vmem:[%s5431_s29 + $0x68] sm:$0xff] }
0x126b   :  { %v2618_v11 = vpop.f32.mrf.mxu1 }
0x126c   :  { %v2914_v14 = vsel %vm635_vm4, %v2888_v9, 0  ;;  %v5016_v9 = vld [vmem:[%s5431_s29 + $0x60] sm:$0xff]  ;;  %v5019_v11 = vld [vmem:[%s5436_s3 + $0x68] sm:$0xff] }
0x126d   :  { %2923 = vmatpush.bf16.msra.mxu1 %v2914_v14  ;;  %v5018_v14 = vld [vmem:[%s5436_s3 + $0x60] sm:$0xff] }
0x126f   :  { %v2742_v43 = vpop.f32.mrf.mxu0 }
0x1270   :  { %v2743_v18 = vadd.f32 %v5113_v6, %v2742_v43 }
0x1272   :  { %v2889_v20 = vpack.c.bf16 %v2743_v18, %v2743_v18 }
0x1274   :  { %v2933_v27 = vsel %vm635_vm4, %v2889_v20, 0 }
0x1275   :  { %2942 = vmatpush.bf16.msrb.mxu2 %v2933_v27 }
0x1277   :  { %v2744_v34 = vpop.f32.mrf.mxu0 }
0x1278   :  { %v2745_v1 = vadd.f32 %v5113_v6, %v2744_v34 }
0x1279   :  { %3055 = vmatpush.bf16.msra.mxu2 %v5017_v48 }
0x127a   :  { %v2890_v31 = vpack.c.bf16 %v2745_v1, %v2745_v1 }
0x127b   :  { %v2770_v63 = vpop.f32.mrf.mxu1 }
0x127c   :  { %v2952_v33 = vsel %vm635_vm4, %v2890_v31, 0  ;;  %v2831_v0 = vmul.f32 0.35355338, %v2770_v63 }
0x127d   :  { %2961 = vmatpush.bf16.msrb.mxu3 %v2952_v33  ;;  %3056 = vmatpush.bf16.msra.mxu2 %v5016_v9 }
0x127e   :  { %v2835_v42 = vadd.f32 %v2831_v0, %v5519_v3 }
0x1280   :  { %v2839_v40 = vsel %vm483_vm3, %v2835_v42, -inf }
0x1281   :  { %3096 = vmatpush.bf16.msra.mxu3 %v5019_v11 }
0x1283   :  { %v2772_v36 = vpop.f32.mrf.mxu1 }
0x1285   :  { %3097 = vmatpush.bf16.msra.mxu3 %v5018_v14 }
0x128b   :  { %v2789_v32 = vpop.f32.mrf.mxu1 }
0x128c   :  { %v2832_v15 = vmul.f32 0.35355338, %v2789_v32 }
0x128e   :  { %v2836_v7 = vadd.f32 %v2832_v15, %v5515_v58 }
0x1290   :  { %v2842_v25 = vsel %vm483_vm3, %v2836_v7, -inf }
0x1291   :  { %v2808_v61 = vpop.f32.mrf.mxu2 }
0x1292   :  { %v2833_v35 = vmul.f32 0.35355338, %v2808_v61 }
0x1293   :  { %v2791_v37 = vpop.f32.mrf.mxu1 }
0x1294   :  { %v2837_v38 = vadd.f32 %v2833_v35, %v5523_v12 }
0x1296   :  { %v2845_v39 = vsel %vm483_vm3, %v2837_v38, -inf }
0x1297   :  { %2846 = vmax.xlane.f32.xlu1 %v2845_v39 }
0x1299   :  { %v2810_v24 = vpop.f32.mrf.mxu2  ;;  %v2827_v53 = vpop.f32.mrf.mxu3 }
0x129a   :  { %v2834_v41 = vmul.f32 0.35355338, %v2827_v53  ;;  %v4703_v24 = vld [vmem:[%s5612_s23 + $0x10] sm:$0xf] }
0x129b   :  { %v3006_v53 = vsel %vm635_vm4, %v4703_v24, 0 }
0x129c   :  { %v2838_v26 = vadd.f32 %v2834_v41, %v5528_v28  ;;  %3015 = vmatpush.bf16.msrb.mxu1 %v3006_v53 }
0x129e   :  { %v2848_v45 = vsel %vm483_vm3, %v2838_v26, -inf }
0x129f   :  { %2849 = vmax.xlane.f32.xlu0 %v2848_v45  ;;  %2840 = vmax.xlane.f32.xlu1 %v2839_v40 }
0x12a1   :  { %v2829_v47 = vpop.f32.mrf.mxu3 }
0x130a   :  { %v2847_v49 = vpop.xlane.xlu1 %2846 }
0x130b   :  { %v2853_v54 = vsub.f32 %v2837_v38, %v2847_v49 }
0x130d   :  { %v2859_v52 = vmul.f32 1.442695, %v2853_v54 }
0x130f   :  { %5246 = vpow2.f32 %v2859_v52 }
0x1312   :  { %v2841_v59 = vpop.xlane.xlu1 %2840  ;;  %v2850_v60 = vpop.xlane.xlu0 %2849 }
0x1313   :  { %v2851_v57 = vsub.f32 %v2835_v42, %v2841_v59  ;;  %v2854_v8 = vsub.f32 %v2838_v26, %v2850_v60 }
0x1315   :  { %v5247_v10 = vpop.eup %5246  ;;  %v2855_v13 = vmul.f32 1.442695, %v2851_v57  ;;  %v2861_v2 = vmul.f32 1.442695, %v2854_v8  ;;  %v5115_v57 = vld [vmem:[%s5464_s11 + $0x6] ss:$0 sm:$0xff] }
0x1316   :  { %v2869_v4 = vsel %vm483_vm3, %v5247_v10, 0.0 }
0x1317   :  { %5248 = vpow2.f32 %v2855_v13  ;;  %2870 = vadd.xlane.f32.xlu0 %v2869_v4 }
0x1318   :  { %5250 = vpow2.f32 %v2861_v2 }
0x131d   :  { %v5249_v62 = vpop.eup %5248 }
0x131e   :  { %v5251_v6 = vpop.eup %5250  ;;  %v2863_v17 = vsel %vm483_vm3, %v5249_v62, 0.0 }
0x131f   :  { %2864 = vadd.xlane.f32.xlu0 %v2863_v17  ;;  %v2872_v55 = vsel %vm483_vm3, %v5251_v6, 0.0 }
0x1320   :  { %2873 = vadd.xlane.f32.xlu2 %v2872_v55  ;;  %v5114_v55 = vld [vmem:[%s5426_s25 + $0x6] ss:$0 sm:$0xff] }
0x1328   :  { %2843 = vmax.xlane.f32.xlu2 %v2842_v25 }
0x138a   :  { %v2871_v43 = vpop.xlane.xlu0 %2870 }
0x138b   :  { %5252 = vrcp.f32 %v2871_v43 }
0x1391   :  { %v5253_v18 = vpop.eup %5252 }
0x1392   :  { %v2881_v20 = vmul.f32 %v5253_v18, %v5247_v10  ;;  %v2865_v27 = vpop.xlane.xlu0 %2864 }
0x1393   :  { %v2874_v34 = vpop.xlane.xlu2 %2873  ;;  %5254 = vrcp.f32 %v2865_v27 }
0x1394   :  { %v2885_v1 = vpack.c.bf16 %v2881_v20, %v2881_v20  ;;  %5256 = vrcp.f32 %v2874_v34 }
0x1396   :  { %4755 = vmatmul.msk.bf16.vlgmr.msrb.gmra.mxu2 %vm483_vm3, %v2885_v1 }
0x1399   :  { %v5255_v31 = vpop.eup %5254 }
0x139a   :  { %v5257_v63 = vpop.eup %5256  ;;  %v2879_v33 = vmul.f32 %v5255_v31, %v5249_v62 }
0x139b   :  { %v2882_v36 = vmul.f32 %v5257_v63, %v5251_v6  ;;  %v2844_v32 = vpop.xlane.xlu2 %2843  ;;  %v4757_v63 = vld [vmem:[%s5612_s23 + $0x14] sm:$0xf] }
0x139c   :  { %v2883_v61 = vpack.c.bf16 %v2879_v33, %v2879_v33  ;;  %v2852_v35 = vsub.f32 %v2836_v7, %v2844_v32  ;;  %v2978_v33 = vsel %vm635_vm4, %v4757_v63, 0  ;;  %v5020_v32 = vld [vmem:[%s5441_s7 + $0x60] sm:$0xff] }
0x139d   :  { %v2886_v37 = vpack.c.bf16 %v2882_v36, %v2882_v36  ;;  %2987 = vmatpush.bf16.msrb.mxu0 %v2978_v33  ;;  %v5021_v36 = vld [vmem:[%s5441_s7 + $0x68] sm:$0xff] }
0x139e   :  { %v2857_v38 = vmul.f32 1.442695, %v2852_v35  ;;  %4753 = vmatmul.msk.bf16.vlgmr.msra.gmra.mxu0 %vm483_vm3, %v2883_v61 }
0x139f   :  { %4756 = vmatmul.msk.bf16.vlgmr.msrb.gmra.mxu3 %vm483_vm3, %v2886_v37 }
0x13a0   :  { %5258 = vpow2.f32 %v2857_v38 }
0x13a1   :  { %3137 = vmatpush.bf16.msra.mxu0 %v5021_v36 }
0x13a5   :  { %3138 = vmatpush.bf16.msra.mxu0 %v5020_v32 }
0x13a6   :  { %v5259_v0 = vpop.eup %5258  ;;  %4775 = vmatmul.msk.bf16.vlgmr.msra.gmra.mxu2 %vm227_vm5, %v5921_v56 }
0x13a7   :  { %v2866_v39 = vsel %vm483_vm3, %v5259_v0, 0.0 }
0x13a8   :  { %2867 = vadd.xlane.f32.xlu1 %v2866_v39 }
0x13af   :  { %4790 = vmatmul.msk.bf16.vlgmr.msra.gmra.mxu3 %vm227_vm5, %v5921_v56 }
0x13b6   :  { %4776 = vmatmul.msk.bf16.gmra.mxu2 %vm227_vm5, %v5939_v50 }
0x13bf   :  { %4791 = vmatmul.msk.bf16.gmra.mxu3 %vm227_vm5, %v5939_v50 }
0x1419   :  { %v6051_v41 = vpop.f32.mrf.mxu2 }
0x141b   :  { %v2868_v42 = vpop.xlane.xlu1 %2867  ;;  %v2906_v26 = vpop.f32.mrf.mxu0 }
0x141c   :  { %5260 = vrcp.f32 %v2868_v42 }
0x1421   :  { %v2946_v45 = vpop.f32.mrf.mxu2 }
0x1422   :  { %v5261_v40 = vpop.eup %5260  ;;  %v2963_v47 = vpop.f32.mrf.mxu3 }
0x1423   :  { %v2880_v49 = vmul.f32 %v5261_v40, %v5259_v0  ;;  %v2968_v54 = vpack.c.bf16 %v2963_v47, %v6051_v41  ;;  %v2908_v52 = vpop.f32.mrf.mxu0 }
0x1425   :  { %v2884_v59 = vpack.c.bf16 %v2880_v49, %v2880_v49 }
0x1427   :  { %4754 = vmatmul.msk.bf16.vlgmr.msra.gmra.mxu1 %vm483_vm3, %v2884_v59 }
0x1429   :  { %v3058_v8 = vpop.f32.mrf.mxu2 }
0x142a   :  { %v2965_v60 = vpop.f32.mrf.mxu3  ;;  %v3059_v1 = vadd.f32 %v5114_v55, %v3058_v8 }
0x142c   :  { %v3150_v5 = vpack.c.bf16 %v3059_v1, %v3059_v1 }
0x1431   :  { %v3060_v17 = vpop.f32.mrf.mxu2 }
0x1432   :  { %v3099_v10 = vpop.f32.mrf.mxu3  ;;  %v3061_v25 = vadd.f32 %v5114_v55, %v3060_v17 }
0x1433   :  { %v3100_v13 = vadd.f32 %v5115_v57, %v3099_v10 }
0x1434   :  { %v3151_v11 = vpack.c.bf16 %v3061_v25, %v3061_v25  ;;  %v5116_v25 = vld [vmem:[%s5473_s15 + $0x6] ss:$0 sm:$0xff] }
0x1435   :  { %v3154_v2 = vpack.c.bf16 %v3100_v13, %v3100_v13 }
0x1437   :  { %v3162_v4 = vsel %vm483_vm3, %v3154_v2, 0  ;;  %4760 = vmatmul.msk.bf16.vlgmr.msrb.gmra.mxu1 %vm483_vm3, %v2620_v23 }
0x1438   :  { %3171 = vmatpush.bf16.xpose.msra.mxu1 %v3162_v4 }
0x1439   :  { %v3063_v43 = vpop.f32.mrf.mxu2 }
0x143a   :  { %v3101_v62 = vpop.f32.mrf.mxu3  ;;  %v3064_v16 = vadd.f32 %v5114_v55, %v3063_v43 }
0x143b   :  { %v3102_v6 = vadd.f32 %v5115_v57, %v3101_v62 }
0x143c   :  { %v3152_v20 = vpack.c.bf16 %v3064_v16, %v3064_v16 }
0x143d   :  { %v3155_v15 = vpack.c.bf16 %v3102_v6, %v3102_v6 }
0x143f   :  { %v3181_v7 = vsel %vm483_vm3, %v3155_v15, 0 }
0x1440   :  { %3190 = vmatpush.bf16.xpose.msrb.mxu2 %v3181_v7 }
0x1441   :  { %v3065_v29 = vpop.f32.mrf.mxu2 }
0x1442   :  { %v3104_v48 = vpop.f32.mrf.mxu3 }
0x1443   :  { %v3105_v9 = vadd.f32 %v5115_v57, %v3104_v48 }
0x1445   :  { %v3156_v14 = vpack.c.bf16 %v3105_v9, %v3105_v9 }
0x1447   :  { %v3200_v18 = vsel %vm483_vm3, %v3156_v14, 0  ;;  %4761 = vmatmul.msk.bf16.gmra.mxu1 %vm483_vm3, %v2621_v46  ;;  %4808 = vmatmul.msk.bf16.vlgmr.msrb.gmra.mxu2 %vm483_vm3, %v3151_v11  ;;  %v3066_v46 = vadd.f32 %v5114_v55, %v3065_v29 }
0x1448   :  { %3209 = vmatpush.bf16.xpose.msrb.mxu3 %v3200_v18 }
0x1449   :  { %v3153_v31 = vpack.c.bf16 %v3066_v46, %v3066_v46 }
0x144a   :  { %v3106_v22 = vpop.f32.mrf.mxu3 }
0x144b   :  { %v3107_v23 = vadd.f32 %v5115_v57, %v3106_v22 }
0x144d   :  { %v3157_v27 = vpack.c.bf16 %v3107_v23, %v3107_v23 }
0x144f   :  { %v3219_v34 = vsel %vm483_vm3, %v3157_v27, 0  ;;  %4809 = vmatmul.msk.bf16.vlgmr.msrb.gmra.mxu3 %vm483_vm3, %v3152_v20 }
0x1450   :  { %3228 = vmatpush.bf16.xpose.msrb.mxu1 %v3219_v34 }
0x1457   :  { %4807 = vmatmul.msk.bf16.vlgmr.msra.gmra.mxu1 %vm483_vm3, %v3150_v5 }
0x1467   :  { %4810 = vmatmul.msk.bf16.vlgmr.msrb.gmra.mxu1 %vm483_vm3, %v3153_v31 }
0x14a4   :  { %v2925_v61 = vpop.f32.mrf.mxu1 }
0x14a5   :  { %v2967_v35 = vpack.c.bf16 %v2925_v61, %v2906_v26 }
0x14a7   :  { %4758 = vmatmul.msk.bf16.vlgmr.msrb.gmra.mxu0 %vm483_vm3, %v2967_v35 }
0x14ac   :  { %v2927_v37 = vpop.f32.mrf.mxu1 }
0x14b4   :  { %v6078_v38 = vpop.f32.mrf.mxu1 }
0x14b7   :  { %4759 = vmatmul.msk.bf16.gmra.mxu0 %vm483_vm3, %v2968_v54 }
0x14bc   :  { %v6081_v0 = vpop.f32.mrf.mxu1 }
0x14c4   :  { %v6083_v39 = vpop.f32.mrf.mxu1 }
0x14c7   :  { %4805 = vmatmul.msk.bf16.vlgmr.msra.gmra.mxu0 %vm227_vm5, %v5921_v56 }
0x14ca   :  { %v3192_v24 = vpop.f32.mrf.mxu2 }
0x14cb   :  { %v3235_v53 = vmul.f32 0.35355338, %v3192_v24 }
0x14cc   :  { %v6087_v41 = vpop.f32.mrf.mxu1 }
0x14cd   :  { %v3239_v42 = vadd.f32 %v3235_v53, %v5515_v58 }
0x14cf   :  { %v3245_v26 = vsel %vm483_vm3, %v3239_v42, -inf }
0x14d0   :  { %3246 = vmax.xlane.f32.xlu0 %v3245_v26 }
0x14d2   :  { %v3194_v45 = vpop.f32.mrf.mxu2  ;;  %v3211_v40 = vpop.f32.mrf.mxu3 }
0x14d3   :  { %v3236_v47 = vmul.f32 0.35355338, %v3211_v40 }
0x14d4   :  { %v3173_v49 = vpop.f32.mrf.mxu1 }
0x14d5   :  { %v3234_v54 = vmul.f32 0.35355338, %v3173_v49  ;;  %v3240_v52 = vadd.f32 %v3236_v47, %v5523_v12 }
0x14d7   :  { %4806 = vmatmul.msk.bf16.gmra.mxu0 %vm227_vm5, %v5939_v50  ;;  %v3248_v59 = vsel %vm483_vm3, %v3240_v52, -inf  ;;  %v3238_v60 = vadd.f32 %v3234_v54, %v5519_v3 }
0x14d8   :  { %3249 = vmax.xlane.f32.xlu1 %v3248_v59 }
0x14d9   :  { %v3242_v57 = vsel %vm483_vm3, %v3238_v60, -inf }
0x14da   :  { %v3213_v8 = vpop.f32.mrf.mxu3  ;;  %3243 = vmax.xlane.f32.xlu2 %v3242_v57  ;;  %v5023_v57 = vld [vmem:[%s5431_s29 + $0x78] sm:$0xff] }
0x14db   :  { %v5022_v8 = vld [vmem:[%s5431_s29 + $0x70] sm:$0xff]  ;;  %s4386_s29 = sld [smem:[%s6341_s0 + %s5352_s13]]  }
0x14dc   :  { %v3175_v10 = vpop.f32.mrf.mxu1 }
0x14dd   :  { %v5025_v10 = vld [vmem:[%s5436_s3 + $0x78] sm:$0xff] }
0x14e4   :  { %v3230_v13 = vpop.f32.mrf.mxu1 }
0x14e5   :  { %v3237_v2 = vmul.f32 0.35355338, %v3230_v13  ;;  %v5024_v13 = vld [vmem:[%s5436_s3 + $0x70] sm:$0xff]  ;;  %s5353_s3 = smov 32  }
0x14e7   :  { %v3241_v4 = vadd.f32 %v3237_v2, %v5528_v28 }
0x14e9   :  { %v3251_v62 = vsel %vm483_vm3, %v3241_v4, -inf }
0x14ea   :  { %3252 = vmax.xlane.f32.xlu2 %v3251_v62 }
0x14ec   :  { %v3232_v6 = vpop.f32.mrf.mxu1 }
0x1524   :  { %v6099_v17 = vpop.f32.mrf.mxu0 }
0x152c   :  { %v6101_v15 = vpop.f32.mrf.mxu0 }
0x1534   :  { %v6103_v55 = vpop.f32.mrf.mxu0 }
0x153c   :  { %v6105_v7 = vpop.f32.mrf.mxu0 }
0x1543   :  { %v3247_v48 = vpop.xlane.xlu0 %3246 }
0x1544   :  { %v3255_v9 = vsub.f32 %v3239_v42, %v3247_v48  ;;  %v3140_v11 = vpop.f32.mrf.mxu0 }
0x1545   :  { %v3141_v14 = vadd.f32 %v5116_v25, %v3140_v11  ;;  %v5026_v11 = vld [vmem:[%s5441_s7 + $0x70] sm:$0xff] }
0x1546   :  { %v3260_v43 = vmul.f32 1.442695, %v3255_v9  ;;  %v5027_v9 = vld [vmem:[%s5441_s7 + $0x78] sm:$0xff] }
0x1547   :  { %v3290_v18 = vpack.c.bf16 %v3141_v14, %v3141_v14 }
0x1548   :  { %5262 = vpow2.f32 %v3260_v43 }
0x1549   :  { %v3298_v16 = vsel %vm635_vm4, %v3290_v18, 0 }
0x154a   :  { %3307 = vmatpush.bf16.msra.mxu2 %v3298_v16 }
0x154b   :  { %v3250_v22 = vpop.xlane.xlu1 %3249 }
0x154c   :  { %v3256_v23 = vsub.f32 %v3240_v52, %v3250_v22  ;;  %v3142_v20 = vpop.f32.mrf.mxu0 }
0x154d   :  { %v3143_v27 = vadd.f32 %v5116_v25, %v3142_v20  ;;  %v3244_v34 = vpop.xlane.xlu2 %3243 }
0x154e   :  { %v5263_v1 = vpop.eup %5262  ;;  %v3262_v5 = vmul.f32 1.442695, %v3256_v23  ;;  %v3254_v29 = vsub.f32 %v3238_v60, %v3244_v34 }
0x154f   :  { %v3291_v46 = vpack.c.bf16 %v3143_v27, %v3143_v27  ;;  %v3269_v31 = vsel %vm483_vm3, %v5263_v1, 0.0 }
0x1550   :  { %5264 = vpow2.f32 %v3262_v5  ;;  %v3258_v63 = vmul.f32 1.442695, %v3254_v29  ;;  %3270 = vadd.xlane.f32.xlu1 %v3269_v31  ;;  %v4815_v5 = vld [vmem:[%s5612_s23 + $0x18] sm:$0xf] }
0x1551   :  { %v3317_v33 = vsel %vm635_vm4, %v3291_v46, 0  ;;  %v3381_v29 = vsel %vm635_vm4, %v4815_v5, 0 }
0x1552   :  { %5266 = vpow2.f32 %v3258_v63  ;;  %3326 = vmatpush.bf16.msra.mxu3 %v3317_v33  ;;  %3390 = vmatpush.bf16.msrb.mxu2 %v3381_v29 }
0x1554   :  { %v3145_v36 = vpop.f32.mrf.mxu0 }
0x1555   :  { %v3146_v32 = vadd.f32 %v5116_v25, %v3145_v36 }
0x1556   :  { %v5265_v61 = vpop.eup %5264  ;;  %3434 = vmatpush.bf16.msrb.mxu3 %v5023_v57  ;;  %v5119_v57 = vld [vmem:[%s5473_s15 + $0x7] ss:$0 sm:$0xff] }
0x1557   :  { %v3292_v35 = vpack.c.bf16 %v3146_v32, %v3146_v32  ;;  %v3272_v37 = vsel %vm483_vm3, %v5265_v61, 0.0 }
0x1558   :  { %v5267_v24 = vpop.eup %5266  ;;  %3273 = vadd.xlane.f32.xlu2 %v3272_v37 }
0x1559   :  { %v3336_v53 = vsel %vm635_vm4, %v3292_v35, 0  ;;  %v3266_v42 = vsel %vm483_vm3, %v5267_v24, 0.0 }
0x155a   :  { %3267 = vadd.xlane.f32.xlu0 %v3266_v42  ;;  %3345 = vmatpush.bf16.msrb.mxu0 %v3336_v53 }
0x155b   :  { %3435 = vmatpush.bf16.msrb.mxu3 %v5022_v8 }
0x155c   :  { %v3147_v26 = vpop.f32.mrf.mxu0 }
0x155d   :  { %v3148_v45 = vadd.f32 %v5116_v25, %v3147_v26  ;;  %v3253_v40 = vpop.xlane.xlu2 %3252 }
0x155e   :  { %v3257_v47 = vsub.f32 %v3241_v4, %v3253_v40  ;;  %3475 = vmatpush.bf16.msra.mxu0 %v5025_v10 }
0x155f   :  { %v3293_v49 = vpack.c.bf16 %v3148_v45, %v3148_v45 }
0x1560   :  { %v3264_v54 = vmul.f32 1.442695, %v3257_v47 }
0x1561   :  { %v3355_v52 = vsel %vm635_vm4, %v3293_v49, 0 }
0x1562   :  { %5268 = vpow2.f32 %v3264_v54  ;;  %3364 = vmatpush.bf16.msra.mxu1 %v3355_v52  ;;  %3476 = vmatpush.bf16.msra.mxu0 %v5024_v13  ;;  %v5117_v52 = vld [vmem:[%s5426_s25 + $0x7] ss:$0 sm:$0xff]  ;;  %s5345_s25 = smov 23  }
0x1563   :  { %s6296_s7 = sld [smem:[%s6341_s0 + %s5345_s25]]  }
0x1566   :  { %3516 = vmatpush.bf16.msrb.mxu1 %v5027_v9 }
0x1568   :  { %v5269_v59 = vpop.eup %5268 }
0x1569   :  { %v3275_v60 = vsel %vm483_vm3, %v5269_v59, 0.0 }
0x156a   :  { %3276 = vadd.xlane.f32.xlu0 %v3275_v60  ;;  %3517 = vmatpush.bf16.msrb.mxu1 %v5026_v11 }
0x15c3   :  { %v3271_v2 = vpop.xlane.xlu1 %3270 }
0x15c4   :  { %5270 = vrcp.f32 %v3271_v2 }
0x15ca   :  { %v5271_v4 = vpop.eup %5270 }
0x15cb   :  { %v3283_v62 = vmul.f32 %v5271_v4, %v5263_v1  ;;  %v3274_v6 = vpop.xlane.xlu2 %3273 }
0x15cc   :  { %5272 = vrcp.f32 %v3274_v6 }
0x15cd   :  { %v3287_v25 = vpack.c.bf16 %v3283_v62, %v3283_v62  ;;  %v3268_v48 = vpop.xlane.xlu0 %3267 }
0x15ce   :  { %5274 = vrcp.f32 %v3268_v48 }
0x15cf   :  { %4812 = vmatmul.msk.bf16.vlgmr.msra.gmra.mxu3 %vm483_vm3, %v3287_v25 }
0x15d2   :  { %v5273_v14 = vpop.eup %5272 }
0x15d3   :  { %v3284_v43 = vmul.f32 %v5273_v14, %v5265_v61  ;;  %v5118_v61 = vld [vmem:[%s5464_s11 + $0x7] ss:$0 sm:$0xff]  ;;  %s5346_s11 = smov 22  }
0x15d4   :  { %v5275_v18 = vpop.eup %5274 }
0x15d5   :  { %v3288_v16 = vpack.c.bf16 %v3284_v43, %v3284_v43  ;;  %v3282_v22 = vmul.f32 %v5275_v18, %v5267_v24 }
0x15d7   :  { %v3286_v23 = vpack.c.bf16 %v3282_v22, %v3282_v22  ;;  %4813 = vmatmul.msk.bf16.vlgmr.msrb.gmra.mxu0 %vm483_vm3, %v3288_v16 }
0x15d9   :  { %4811 = vmatmul.msk.bf16.vlgmr.msra.gmra.mxu2 %vm483_vm3, %v3286_v23 }
0x15dd   :  { %v3277_v20 = vpop.xlane.xlu0 %3276 }
0x15de   :  { %5276 = vrcp.f32 %v3277_v20 }
0x15df   :  { %4831 = vmatmul.msk.bf16.vlgmr.msrb.gmra.mxu3 %vm227_vm5, %v5921_v56 }
0x15e4   :  { %v5277_v27 = vpop.eup %5276 }
0x15e5   :  { %v3285_v34 = vmul.f32 %v5277_v27, %v5269_v59 }
0x15e7   :  { %v3289_v1 = vpack.c.bf16 %v3285_v34, %v3285_v34  ;;  %4846 = vmatmul.msk.bf16.vlgmr.msra.gmra.mxu0 %vm227_vm5, %v5921_v56 }
0x15e9   :  { %4814 = vmatmul.msk.bf16.vlgmr.msra.gmra.mxu1 %vm483_vm3, %v3289_v1 }
0x15ef   :  { %4832 = vmatmul.msk.bf16.gmra.mxu3 %vm227_vm5, %v5939_v50 }
0x15f7   :  { %4847 = vmatmul.msk.bf16.gmra.mxu0 %vm227_vm5, %v5939_v50 }
0x15f9   :  { %4861 = vmatmul.msk.bf16.vlgmr.msrb.gmra.mxu1 %vm227_vm5, %v5921_v56 }
0x1609   :  { %4862 = vmatmul.msk.bf16.gmra.mxu1 %vm227_vm5, %v5939_v50 }
0x1652   :  { %v3328_v46 = vpop.f32.mrf.mxu3 }
0x1654   :  { %v3347_v31 = vpop.f32.mrf.mxu0 }
0x165a   :  { %v3330_v63 = vpop.f32.mrf.mxu3 }
0x165c   :  { %v3309_v33 = vpop.f32.mrf.mxu2  ;;  %v3349_v36 = vpop.f32.mrf.mxu0 }
0x165d   :  { %v3370_v32 = vpack.c.bf16 %v3328_v46, %v3309_v33 }
0x165f   :  { %4816 = vmatmul.msk.bf16.vlgmr.msrb.gmra.mxu2 %vm483_vm3, %v3370_v32 }
0x1662   :  { %v3437_v35 = vpop.f32.mrf.mxu3 }
0x1663   :  { %v3438_v25 = vadd.f32 %v5117_v52, %v3437_v35 }
0x1664   :  { %v3311_v37 = vpop.f32.mrf.mxu2  ;;  %v3478_v56 = vpop.f32.mrf.mxu0 }
0x1665   :  { %v3479_v24 = vadd.f32 %v5118_v61, %v3478_v56  ;;  %v3529_v18 = vpack.c.bf16 %v3438_v25, %v3438_v25 }
0x1666   :  { %v3366_v50 = vpop.f32.mrf.mxu1 }
0x1667   :  { %v3533_v53 = vpack.c.bf16 %v3479_v24, %v3479_v24  ;;  %v3371_v40 = vpack.c.bf16 %v3366_v50, %v3347_v31  ;;  %v3018_v24 = vadd.f32 %v6078_v38, %v6099_v17 }
0x1669   :  { %v3541_v42 = vsel %vm483_vm3, %v3533_v53, 0 }
0x166a   :  { %3550 = vmatpush.bf16.xpose.msra.mxu2 %v3541_v42  ;;  %v3439_v26 = vpop.f32.mrf.mxu3  ;;  %v3020_v42 = vadd.f32 %v6081_v0, %v6101_v15 }
0x166b   :  { %v3440_v60 = vadd.f32 %v5117_v52, %v3439_v26 }
0x166c   :  { %v3480_v45 = vpop.f32.mrf.mxu0 }
0x166d   :  { %v3481_v47 = vadd.f32 %v5118_v61, %v3480_v45  ;;  %v3530_v4 = vpack.c.bf16 %v3440_v60, %v3440_v60 }
0x166e   :  { %v3368_v49 = vpop.f32.mrf.mxu1 }
0x166f   :  { %v3534_v54 = vpack.c.bf16 %v3481_v47, %v3481_v47  ;;  %4817 = vmatmul.msk.bf16.gmra.mxu2 %vm483_vm3, %v3371_v40  ;;  %v3023_v40 = vadd.f32 %v6083_v39, %v6103_v55 }
0x1671   :  { %v3560_v59 = vsel %vm483_vm3, %v3534_v54, 0  ;;  %v3025_v54 = vadd.f32 %v6087_v41, %v6105_v7 }
0x1672   :  { %3569 = vmatpush.bf16.xpose.msra.mxu3 %v3560_v59  ;;  %v3442_v13 = vpop.f32.mrf.mxu3 }
0x1673   :  { %v3443_v11 = vadd.f32 %v5117_v52, %v3442_v13 }
0x1674   :  { %v3483_v8 = vpop.f32.mrf.mxu0 }
0x1675   :  { %v3484_v10 = vadd.f32 %v5118_v61, %v3483_v8  ;;  %v3531_v23 = vpack.c.bf16 %v3443_v11, %v3443_v11 }
0x1676   :  { %v3519_v2 = vpop.f32.mrf.mxu1 }
0x1677   :  { %v3535_v62 = vpack.c.bf16 %v3484_v10, %v3484_v10  ;;  %v3520_v6 = vadd.f32 %v5119_v57, %v3519_v2 }
0x1679   :  { %v3579_v48 = vsel %vm483_vm3, %v3535_v62, 0  ;;  %v3669_v9 = vpack.c.bf16 %v3520_v6, %v3520_v6  ;;  %4864 = vmatmul.msk.bf16.vlgmr.msra.gmra.mxu3 %vm483_vm3, %v3530_v4 }
0x167a   :  { %3588 = vmatpush.bf16.xpose.msrb.mxu0 %v3579_v48  ;;  %v3444_v34 = vpop.f32.mrf.mxu3 }
0x167b   :  { %v3677_v14 = vsel %vm635_vm4, %v3669_v9, 0  ;;  %v3445_v29 = vadd.f32 %v5117_v52, %v3444_v34 }
0x167c   :  { %v3485_v43 = vpop.f32.mrf.mxu0  ;;  %3686 = vmatpush.bf16.msrb.mxu2 %v3677_v14 }
0x167d   :  { %v3486_v16 = vadd.f32 %v5118_v61, %v3485_v43  ;;  %v3532_v63 = vpack.c.bf16 %v3445_v29, %v3445_v29 }
0x167e   :  { %v3521_v22 = vpop.f32.mrf.mxu1 }
0x167f   :  { %v3536_v20 = vpack.c.bf16 %v3486_v16, %v3486_v16  ;;  %v3522_v27 = vadd.f32 %v5119_v57, %v3521_v22  ;;  %4863 = vmatmul.msk.bf16.vlgmr.msra.gmra.mxu2 %vm483_vm3, %v3529_v18 }
0x1681   :  { %v3598_v1 = vsel %vm483_vm3, %v3536_v20, 0  ;;  %v3670_v5 = vpack.c.bf16 %v3522_v27, %v3522_v27  ;;  %4865 = vmatmul.msk.bf16.vlgmr.msrb.gmra.mxu0 %vm483_vm3, %v3531_v23 }
0x1682   :  { %3607 = vmatpush.bf16.xpose.msra.mxu1 %v3598_v1 }
0x1683   :  { %v3696_v46 = vsel %vm635_vm4, %v3670_v5, 0 }
0x1684   :  { %3705 = vmatpush.bf16.msrb.mxu3 %v3696_v46 }
0x1686   :  { %v3524_v31 = vpop.f32.mrf.mxu1 }
0x1687   :  { %v3525_v33 = vadd.f32 %v5119_v57, %v3524_v31 }
0x1689   :  { %v3671_v36 = vpack.c.bf16 %v3525_v33, %v3525_v33  ;;  %4866 = vmatmul.msk.bf16.vlgmr.msra.gmra.mxu1 %vm483_vm3, %v3532_v63 }
0x168b   :  { %v3715_v32 = vsel %vm635_vm4, %v3671_v36, 0 }
0x168c   :  { %3724 = vmatpush.bf16.msra.mxu0 %v3715_v32 }
0x168e   :  { %v3526_v61 = vpop.f32.mrf.mxu1 }
0x168f   :  { %v3527_v35 = vadd.f32 %v5119_v57, %v3526_v61 }
0x1691   :  { %v3672_v37 = vpack.c.bf16 %v3527_v35, %v3527_v35 }
0x1693   :  { %v3734_v56 = vsel %vm635_vm4, %v3672_v37, 0 }
0x1694   :  { %3743 = vmatpush.bf16.msrb.mxu1 %v3734_v56 }
0x16e2   :  { %v3392_v50 = vpop.f32.mrf.mxu2 }
0x16e3   :  { %v6159_v53 = vadd.f32 %v3392_v50, %v3018_v24 }
0x16ea   :  { %v3394_v26 = vpop.f32.mrf.mxu2 }
0x16eb   :  { %v6163_v45 = vadd.f32 %v3394_v26, %v3020_v42 }
0x16f2   :  { %v3397_v47 = vpop.f32.mrf.mxu2 }
0x16f3   :  { %v6167_v49 = vadd.f32 %v3397_v47, %v3023_v40 }
0x16fa   :  { %v3399_v52 = vpop.f32.mrf.mxu2 }
0x16fb   :  { %v6171_v38 = vadd.f32 %v3399_v52, %v3025_v54 }
0x16fc   :  { %v3571_v17 = vpop.f32.mrf.mxu3 }
0x16fd   :  { %v3614_v59 = vmul.f32 0.35355338, %v3571_v17 }
0x16fe   :  { %v3590_v60 = vpop.f32.mrf.mxu0 }
0x16ff   :  { %v3615_v57 = vmul.f32 0.35355338, %v3590_v60  ;;  %v3618_v0 = vadd.f32 %v3614_v59, %v5515_v58  ;;  %v4871_v59 = vld [vmem:[%s5612_s23 + $0x1c] sm:$0xf] }
0x1700   :  { %v3760_v60 = vsel %vm635_vm4, %v4871_v59, 0 }
0x1701   :  { %v3624_v15 = vsel %vm483_vm3, %v3618_v0, -inf  ;;  %v3619_v8 = vadd.f32 %v3615_v57, %v5523_v12  ;;  %3769 = vmatpush.bf16.msra.mxu2 %v3760_v60 }
0x1702   :  { %3625 = vmax.xlane.f32.xlu2 %v3624_v15  ;;  %v3552_v39 = vpop.f32.mrf.mxu2 }
0x1703   :  { %v3613_v55 = vmul.f32 0.35355338, %v3552_v39  ;;  %v3627_v10 = vsel %vm483_vm3, %v3619_v8, -inf }
0x1704   :  { %3628 = vmax.xlane.f32.xlu0 %v3627_v10  ;;  %v3573_v41 = vpop.f32.mrf.mxu3 }
0x1705   :  { %v3617_v7 = vadd.f32 %v3613_v55, %v5519_v3 }
0x1706   :  { %v3592_v13 = vpop.f32.mrf.mxu0  ;;  %v3609_v2 = vpop.f32.mrf.mxu1 }
0x1707   :  { %v3616_v4 = vmul.f32 0.35355338, %v3609_v2  ;;  %v3621_v62 = vsel %vm483_vm3, %v3617_v7, -inf }
0x1708   :  { %3622 = vmax.xlane.f32.xlu1 %v3621_v62  ;;  %v5120_v62 = vld [vmem:[%s5753_s28 + $0x1] ss:$0 sm:$0xff]  ;;  %s4383_s28 = sld [smem:[%s6341_s0 + %s5346_s11]]  }
0x1709   :  { %v3620_v6 = vadd.f32 %v3616_v4, %v5528_v28 }
0x170a   :  { %v3554_v58 = vpop.f32.mrf.mxu2 }
0x170b   :  { %v3630_v12 = vsel %vm483_vm3, %v3620_v6, -inf }
0x170e   :  { %v3611_v25 = vpop.f32.mrf.mxu1 }
0x1710   :  { %3631 = vmax.xlane.f32.xlu1 %v3630_v12 }
0x1775   :  { %v3626_v48 = vpop.xlane.xlu2 %3625 }
0x1776   :  { %v3634_v9 = vsub.f32 %v3618_v0, %v3626_v48 }
0x1777   :  { %v3629_v11 = vpop.xlane.xlu0 %3628 }
0x1778   :  { %v3639_v14 = vmul.f32 1.442695, %v3634_v9  ;;  %v3635_v43 = vsub.f32 %v3619_v8, %v3629_v11 }
0x177a   :  { %5278 = vpow2.f32 %v3639_v14  ;;  %v3641_v3 = vmul.f32 1.442695, %v3635_v43 }
0x177b   :  { %v3623_v18 = vpop.xlane.xlu1 %3622 }
0x177c   :  { %5280 = vpow2.f32 %v3641_v3  ;;  %v3633_v16 = vsub.f32 %v3617_v7, %v3623_v18 }
0x177e   :  { %v3637_v22 = vmul.f32 1.442695, %v3633_v16 }
0x1780   :  { %v5279_v23 = vpop.eup %5278  ;;  %5282 = vpow2.f32 %v3637_v22 }
0x1781   :  { %v3648_v20 = vsel %vm483_vm3, %v5279_v23, 0.0 }
0x1782   :  { %v5281_v28 = vpop.eup %5280  ;;  %3649 = vadd.xlane.f32.xlu0 %v3648_v20 }
0x1783   :  { %v3632_v27 = vpop.xlane.xlu1 %3631  ;;  %v3651_v34 = vsel %vm483_vm3, %v5281_v28, 0.0 }
0x1784   :  { %v3636_v1 = vsub.f32 %v3620_v6, %v3632_v27  ;;  %3652 = vadd.xlane.f32.xlu1 %v3651_v34 }
0x1786   :  { %v5283_v5 = vpop.eup %5282  ;;  %v3643_v29 = vmul.f32 1.442695, %v3636_v1 }
0x1787   :  { %v3645_v46 = vsel %vm483_vm3, %v5283_v5, 0.0 }
0x1788   :  { %5284 = vpow2.f32 %v3643_v29  ;;  %3646 = vadd.xlane.f32.xlu2 %v3645_v46 }
0x178e   :  { %v5285_v31 = vpop.eup %5284 }
0x178f   :  { %v3654_v63 = vsel %vm483_vm3, %v5285_v31, 0.0 }
0x1790   :  { %3655 = vadd.xlane.f32.xlu2 %v3654_v63 }
0x17f5   :  { %v3650_v33 = vpop.xlane.xlu0 %3649 }
0x17f6   :  { %5286 = vrcp.f32 %v3650_v33 }
0x17f7   :  { %v3653_v36 = vpop.xlane.xlu1 %3652 }
0x17f8   :  { %5288 = vrcp.f32 %v3653_v36 }
0x17fb   :  { %v3647_v32 = vpop.xlane.xlu2 %3646 }
0x17fc   :  { %v5287_v61 = vpop.eup %5286  ;;  %5290 = vrcp.f32 %v3647_v32 }
0x17fd   :  { %v3662_v35 = vmul.f32 %v5287_v61, %v5279_v23 }
0x17fe   :  { %v5289_v37 = vpop.eup %5288 }
0x17ff   :  { %v3666_v56 = vpack.c.bf16 %v3662_v35, %v3662_v35  ;;  %v3663_v24 = vmul.f32 %v5289_v37, %v5281_v28 }
0x1801   :  { %v3667_v50 = vpack.c.bf16 %v3663_v24, %v3663_v24  ;;  %4868 = vmatmul.msk.bf16.vlgmr.msrb.gmra.mxu3 %vm483_vm3, %v3666_v56  ;;  %v5029_v56 = vld [vmem:[%s5800_s14 + $0x18] sm:$0xff] }
0x1802   :  { %v5291_v42 = vpop.eup %5290  ;;  %3940 = vmatpush.bf16.msra.mxu3 %v5029_v56  ;;  %v5032_v56 = vld [vmem:[%s5838_s24 + $0x50] sm:$0xff] }
0x1803   :  { %v3661_v26 = vmul.f32 %v5291_v42, %v5283_v5  ;;  %v3656_v40 = vpop.xlane.xlu2 %3655  ;;  %4869 = vmatmul.msk.bf16.vlgmr.msra.gmra.mxu0 %vm483_vm3, %v3667_v50  ;;  %v5028_v42 = vld [vmem:[%s5800_s14 + $0x10] sm:$0xff] }
0x1804   :  { %5292 = vrcp.f32 %v3656_v40 }
0x1805   :  { %v3665_v47 = vpack.c.bf16 %v3661_v26, %v3661_v26 }
0x1806   :  { %3941 = vmatpush.bf16.msra.mxu3 %v5028_v42  ;;  %v5030_v42 = vld [vmem:[%s5838_s24 + $0x40] sm:$0xff] }
0x1807   :  { %4867 = vmatmul.msk.bf16.vlgmr.msrb.gmra.mxu2 %vm483_vm3, %v3665_v47 }
0x180a   :  { %v5293_v54 = vpop.eup %5292 }
0x180b   :  { %v3664_v52 = vmul.f32 %v5293_v54, %v5285_v31 }
0x180d   :  { %v3668_v17 = vpack.c.bf16 %v3664_v52, %v3664_v52 }
0x180f   :  { %4870 = vmatmul.msk.bf16.vlgmr.msrb.gmra.mxu1 %vm483_vm3, %v3668_v17 }
0x1880   :  { %v3726_v57 = vpop.f32.mrf.mxu0 }
0x1884   :  { %v3707_v0 = vpop.f32.mrf.mxu3 }
0x1888   :  { %v3728_v15 = vpop.f32.mrf.mxu0 }
0x188a   :  { %v3688_v8 = vpop.f32.mrf.mxu2 }
0x188b   :  { %v3749_v39 = vpack.c.bf16 %v3707_v0, %v3688_v8 }
0x188c   :  { %v3709_v55 = vpop.f32.mrf.mxu3  ;;  %v3745_v10 = vpop.f32.mrf.mxu1 }
0x188d   :  { %4872 = vmatmul.msk.bf16.vlgmr.msra.gmra.mxu2 %vm483_vm3, %v3749_v39  ;;  %v3750_v13 = vpack.c.bf16 %v3745_v10, %v3726_v57 }
0x1892   :  { %v3690_v41 = vpop.f32.mrf.mxu2 }
0x1894   :  { %v3747_v7 = vpop.f32.mrf.mxu1 }
0x189d   :  { %4873 = vmatmul.msk.bf16.gmra.mxu2 %vm483_vm3, %v3750_v13 }
0x1910   :  { %v3771_v2 = vpop.f32.mrf.mxu2 }
0x1911   :  { %v3781_v4 = vadd.f32 %v3771_v2, %v6159_v53 }
0x1913   :  { %v3785_v58 = vadd.f32 %v3781_v4, %v5915_v51 }
0x1915   :  { %v3794_v6 = vadd.f32 %v5120_v62, %v3785_v58 }
0x1917   :  { %v3802_v25 = vsel %vm227_vm5, %v3794_v6, 0.0 }
0x1918   :  { %3803 = vadd.xlane.f32.xlu0 %v3802_v25  ;;  %v3773_v12 = vpop.f32.mrf.mxu2 }
0x1919   :  { %v3782_v48 = vadd.f32 %v3773_v12, %v6163_v45 }
0x191b   :  { %v3786_v9 = vadd.f32 %v3782_v48, %v5917_v30 }
0x191d   :  { %v3795_v11 = vadd.f32 %v5120_v62, %v3786_v9 }
0x191f   :  { %v3805_v14 = vsel %vm227_vm5, %v3795_v11, 0.0 }
0x1920   :  { %3806 = vadd.xlane.f32.xlu1 %v3805_v14  ;;  %v3776_v43 = vpop.f32.mrf.mxu2 }
0x1921   :  { %v3783_v3 = vadd.f32 %v3776_v43, %v6167_v49  ;;  %v5122_v43 = vld [vmem:[%s5775_s9 + $0x1] ss:$0 sm:$0xff] }
0x1923   :  { %v3787_v53 = vadd.f32 %v3783_v3, %v5933_v19 }
0x1925   :  { %v3796_v18 = vadd.f32 %v5120_v62, %v3787_v53 }
0x1927   :  { %v3808_v51 = vsel %vm227_vm5, %v3796_v18, 0.0 }
0x1928   :  { %3809 = vadd.xlane.f32.xlu2 %v3808_v51  ;;  %v3778_v16 = vpop.f32.mrf.mxu2 }
0x1929   :  { %v3784_v22 = vadd.f32 %v3778_v16, %v6171_v38 }
0x192b   :  { %v3788_v45 = vadd.f32 %v3784_v22, %v5935_v21 }
0x192d   :  { %v3797_v23 = vadd.f32 %v5120_v62, %v3788_v45 }
0x192f   :  { %v3811_v30 = vsel %vm227_vm5, %v3797_v23, 0.0 }
0x1930   :  { %3812 = vadd.xlane.f32.xlu0 %v3811_v30 }
0x198b   :  { %v3804_v20 = vpop.xlane.xlu0 %3803 }
0x198c   :  { %v3814_v28 = vmul.f32 %v3804_v20, %v5397_v44 }
0x198e   :  { %v3818_v27 = vsub.f32 %v3794_v6, %v3814_v28  ;;  %v5121_v6 = vld [vmem:[%s5770_s4 + $0x1] ss:$0 sm:$0xff]  ;;  %s5347_s4 = smov 26  }
0x198f   :  { %s4387_s17 = sld [smem:[%s6341_s0 + %s5347_s4]]  }
0x1990   :  { %v3822_v49 = vmul.f32 %v3818_v27, %v3818_v27 }
0x1992   :  { %v3826_v19 = vsel %vm227_vm5, %v3822_v49, 0.0 }
0x1993   :  { %3827 = vadd.xlane.f32.xlu1 %v3826_v19  ;;  %v3807_v34 = vpop.xlane.xlu1 %3806 }
0x1994   :  { %v3815_v1 = vmul.f32 %v3807_v34, %v5397_v44 }
0x1996   :  { %v6209_v5 = vsub.f32 %v3795_v11, %v3815_v1 }
0x1998   :  { %v3823_v21 = vmul.f32 %v6209_v5, %v6209_v5 }
0x199a   :  { %v3829_v38 = vsel %vm227_vm5, %v3823_v21, 0.0 }
0x199b   :  { %3830 = vadd.xlane.f32.xlu2 %v3829_v38  ;;  %v3810_v29 = vpop.xlane.xlu2 %3809 }
0x199c   :  { %v3816_v46 = vmul.f32 %v3810_v29, %v5397_v44 }
0x199e   :  { %v6215_v31 = vsub.f32 %v3796_v18, %v3816_v46 }
0x19a0   :  { %v3824_v63 = vmul.f32 %v6215_v31, %v6215_v31 }
0x19a2   :  { %v3832_v33 = vsel %vm227_vm5, %v3824_v63, 0.0 }
0x19a3   :  { %3833 = vadd.xlane.f32.xlu0 %v3832_v33  ;;  %v3813_v36 = vpop.xlane.xlu0 %3812 }
0x19a4   :  { %v3817_v32 = vmul.f32 %v3813_v36, %v5397_v44  ;;  %v5037_v36 = vld [vmem:[%s5838_s24 + $0x78] sm:$0xff] }
0x19a5   :  { %4061 = vmatpush.bf16.msrb.mxu0 %v5037_v36 }
0x19a6   :  { %v6221_v61 = vsub.f32 %v3797_v23, %v3817_v32  ;;  %v5036_v32 = vld [vmem:[%s5838_s24 + $0x70] sm:$0xff] }
0x19a8   :  { %v3825_v35 = vmul.f32 %v6221_v61, %v6221_v61 }
0x19a9   :  { %4062 = vmatpush.bf16.msrb.mxu0 %v5036_v32 }
0x19aa   :  { %v3835_v37 = vsel %vm227_vm5, %v3825_v35, 0.0  ;;  %v5034_v35 = vld [vmem:[%s5838_s24 + $0x60] sm:$0xff] }
0x19ab   :  { %3836 = vadd.xlane.f32.xlu1 %v3835_v37  ;;  %v5033_v37 = vld [vmem:[%s5838_s24 + $0x58] sm:$0xff] }
0x1a06   :  { %v3828_v24 = vpop.xlane.xlu1 %3827 }
0x1a07   :  { %v3838_v50 = vmul.f32 %v3828_v24, %v5397_v44  ;;  %v5031_v24 = vld [vmem:[%s5838_s24 + $0x48] sm:$0xff] }
0x1a09   :  { %v3842_v26 = vadd.f32 1e-05, %v3838_v50  ;;  %v5123_v50 = vld [vmem:[%s5829_s19 + $0x1] ss:$0 sm:$0xff] }
0x1a0b   :  { %5294 = vrsqrt.f32 %v3842_v26  ;;  %vm3852_vm4 = vweird.f32 %v3842_v26 }
0x1a0e   :  { %v3831_v40 = vpop.xlane.xlu2 %3830 }
0x1a0f   :  { %v3839_v47 = vmul.f32 %v3831_v40, %v5397_v44 }
0x1a11   :  { %v5295_v54 = vpop.eup %5294  ;;  %v3843_v52 = vadd.f32 1e-05, %v3839_v47 }
0x1a12   :  { %v3847_v17 = vmul.f32 %v5295_v54, %v3842_v26  ;;  %vm3853_vm3 = vweird.f32 %v5295_v54 }
0x1a13   :  { %5296 = vrsqrt.f32 %v3843_v52  ;;  %vm3854_vm1 = vmor %vm3852_vm4, %vm3853_vm3  ;;  %vm3862_vm6 = vweird.f32 %v3843_v52 }
0x1a14   :  { %v3848_v59 = vmul.f32 %v5295_v54, %v3847_v17 }
0x1a16   :  { %v3849_v60 = vmul.f32 0.5, %v3848_v59  ;;  %v3834_v57 = vpop.xlane.xlu0 %3833 }
0x1a17   :  { %v3840_v0 = vmul.f32 %v3834_v57, %v5397_v44 }
0x1a18   :  { %v3850_v15 = vsub.f32 1.5, %v3849_v60 }
0x1a19   :  { %v5297_v8 = vpop.eup %5296  ;;  %v3844_v39 = vadd.f32 1e-05, %v3840_v0 }
0x1a1a   :  { %v3851_v55 = vmul.f32 %v5295_v54, %v3850_v15  ;;  %v3857_v10 = vmul.f32 %v5297_v8, %v3843_v52  ;;  %vm3863_vm2 = vweird.f32 %v5297_v8 }
0x1a1b   :  { %5298 = vrsqrt.f32 %v3844_v39  ;;  %vm3864_vm7 = vmor %vm3862_vm6, %vm3863_vm2  ;;  %vm3872_vm9 = vweird.f32 %v3844_v39 }
0x1a1c   :  { %v3858_v41 = vmul.f32 %v5297_v8, %v3857_v10  ;;  %v3855_v7 = vsel %vm3854_vm1, %v5295_v54, %v3851_v55 }
0x1a1d   :  { %v3886_v25 = vmul.f32 %v3855_v7, %v3818_v27 }
0x1a1e   :  { %v3859_v13 = vmul.f32 0.5, %v3858_v41  ;;  %v3837_v2 = vpop.xlane.xlu1 %3836 }
0x1a1f   :  { %v3841_v4 = vmul.f32 %v3837_v2, %v5397_v44  ;;  %v3893_v3 = vmul.f32 %v5121_v6, %v3886_v25 }
0x1a20   :  { %v3860_v62 = vsub.f32 1.5, %v3859_v13 }
0x1a21   :  { %v5299_v58 = vpop.eup %5298  ;;  %v3845_v12 = vadd.f32 1e-05, %v3841_v4  ;;  %v6235_v45 = vadd.f32 %v5122_v43, %v3893_v3 }
0x1a22   :  { %v3861_v48 = vmul.f32 %v5297_v8, %v3860_v62  ;;  %v3867_v9 = vmul.f32 %v5299_v58, %v3844_v39  ;;  %vm3873_vm8 = vweird.f32 %v5299_v58 }
0x1a23   :  { %5300 = vrsqrt.f32 %v3845_v12  ;;  %vm3874_vm10 = vmor %vm3872_vm9, %vm3873_vm8  ;;  %vm3882_vm12 = vweird.f32 %v3845_v12 }
0x1a24   :  { %v3865_v11 = vsel %vm3864_vm7, %v5297_v8, %v3861_v48  ;;  %v3868_v14 = vmul.f32 %v5299_v58, %v3867_v9 }
0x1a25   :  { %v3887_v53 = vmul.f32 %v3865_v11, %v6209_v5 }
0x1a26   :  { %v3869_v18 = vmul.f32 0.5, %v3868_v14 }
0x1a27   :  { %v3894_v51 = vmul.f32 %v5121_v6, %v3887_v53 }
0x1a28   :  { %v3870_v16 = vsub.f32 1.5, %v3869_v18 }
0x1a29   :  { %v5301_v22 = vpop.eup %5300  ;;  %v6237_v23 = vadd.f32 %v5122_v43, %v3894_v51 }
0x1a2a   :  { %v3871_v30 = vmul.f32 %v5299_v58, %v3870_v16  ;;  %v3877_v20 = vmul.f32 %v5301_v22, %v3845_v12  ;;  %vm3883_vm11 = vweird.f32 %v5301_v22 }
0x1a2b   :  { %v3904_v28 = vpack.c.bf16 %v6237_v23, %v6235_v45  ;;  %vm3884_vm13 = vmor %vm3882_vm12, %vm3883_vm11  ;;  %vm4211_vm11 = vcmask 1041409   ;;  %vm4214_vm12 = vcmask 1042434  }
0x1a2c   :  { %v3878_v27 = vmul.f32 %v5301_v22, %v3877_v20  ;;  %v3875_v49 = vsel %vm3874_vm10, %v5299_v58, %v3871_v30 }
0x1a2d   :  { %4890 = vmatmul.msk.bf16.vlgmr.msra.gmra.mxu3 %vm227_vm5, %v3904_v28  ;;  %v3888_v1 = vmul.f32 %v3875_v49, %v6215_v31 }
0x1a2e   :  { %v3879_v19 = vmul.f32 0.5, %v3878_v27 }
0x1a2f   :  { %v3895_v29 = vmul.f32 %v5121_v6, %v3888_v1 }
0x1a30   :  { %v3880_v34 = vsub.f32 1.5, %v3879_v19 }
0x1a31   :  { %v6244_v63 = vadd.f32 %v5122_v43, %v3895_v29 }
0x1a32   :  { %v3881_v5 = vmul.f32 %v5301_v22, %v3880_v34 }
0x1a34   :  { %v3885_v21 = vsel %vm3884_vm13, %v5301_v22, %v3881_v5  ;;  %vm4217_vm13 = vcmask 1043459  }
0x1a35   :  { %v3889_v38 = vmul.f32 %v3885_v21, %v6221_v61  ;;  %v5035_v61 = vld [vmem:[%s5838_s24 + $0x68] sm:$0xff] }
0x1a36   :  { %4063 = vmatpush.bf16.msrb.mxu0 %v5035_v61 }
0x1a37   :  { %v3896_v46 = vmul.f32 %v5121_v6, %v3889_v38  ;;  %v5124_v38 = vld [vmem:[%s5862_s1 + $0x1] ss:$0 sm:$0xff] }
0x1a39   :  { %v6246_v33 = vadd.f32 %v5122_v43, %v3896_v46 }
0x1a3a   :  { %4064 = vmatpush.bf16.msrb.mxu0 %v5034_v35 }
0x1a3b   :  { %v3905_v31 = vpack.c.bf16 %v6246_v33, %v6244_v63 }
0x1a3d   :  { %4891 = vmatmul.msk.bf16.gmra.mxu3 %vm227_vm5, %v3905_v31 }
0x1a3e   :  { %4065 = vmatpush.bf16.msrb.mxu0 %v5033_v37 }
0x1a42   :  { %4066 = vmatpush.bf16.msrb.mxu0 %v5032_v56 }
0x1a46   :  { %4067 = vmatpush.bf16.msrb.mxu0 %v5031_v24 }
0x1a4a   :  { %4068 = vmatpush.bf16.msrb.mxu0 %v5030_v42 }
0x1ab0   :  { %v3943_v26 = vpop.f32.mrf.mxu3 }
0x1ab1   :  { %v3944_v40 = vadd.f32 %v5123_v50, %v3943_v26 }
0x1ab3   :  { %v3953_v47 = vmul.f32 %v3944_v40, %v3944_v40 }
0x1ab5   :  { %v3957_v54 = vmul.f32 %v3953_v47, %v3944_v40 }
0x1ab7   :  { %v3961_v52 = vmul.f32 0.044715, %v3957_v54 }
0x1ab8   :  { %v3945_v17 = vpop.f32.mrf.mxu3 }
0x1ab9   :  { %v3965_v59 = vadd.f32 %v3961_v52, %v3944_v40  ;;  %v3946_v60 = vadd.f32 %v5123_v50, %v3945_v17 }
0x1abb   :  { %v3969_v57 = vmul.f32 0.7978846, %v3965_v59  ;;  %v3954_v0 = vmul.f32 %v3946_v60, %v3946_v60 }
0x1abd   :  { %v3958_v15 = vmul.f32 %v3954_v0, %v3946_v60  ;;  %5302 = vtanh.f32 %v3969_v57 }
0x1abf   :  { %v3962_v8 = vmul.f32 0.044715, %v3958_v15 }
0x1ac0   :  { %v3948_v39 = vpop.f32.mrf.mxu3 }
0x1ac1   :  { %v3966_v55 = vadd.f32 %v3962_v8, %v3946_v60  ;;  %v3949_v10 = vadd.f32 %v5123_v50, %v3948_v39 }
0x1ac3   :  { %v3970_v41 = vmul.f32 0.7978846, %v3966_v55  ;;  %v3955_v7 = vmul.f32 %v3949_v10, %v3949_v10  ;;  %v5303_v13 = vpop.eup %5302 }
0x1ac4   :  { %v3977_v62 = vadd.f32 1.0, %v5303_v13 }
0x1ac5   :  { %5304 = vtanh.f32 %v3970_v41  ;;  %v3959_v2 = vmul.f32 %v3955_v7, %v3949_v10 }
0x1ac6   :  { %v3981_v11 = vmul.f32 0.5, %v3977_v62 }
0x1ac7   :  { %v3963_v4 = vmul.f32 0.044715, %v3959_v2 }
0x1ac8   :  { %v3950_v58 = vpop.f32.mrf.mxu3  ;;  %v3985_v18 = vmul.f32 %v3981_v11, %v3944_v40 }
0x1ac9   :  { %v3967_v6 = vadd.f32 %v3963_v4, %v3949_v10  ;;  %v3951_v25 = vadd.f32 %v5123_v50, %v3950_v58 }
0x1acb   :  { %v5305_v12 = vpop.eup %5304  ;;  %v3971_v48 = vmul.f32 0.7978846, %v3967_v6  ;;  %v3956_v9 = vmul.f32 %v3951_v25, %v3951_v25 }
0x1acc   :  { %v3978_v14 = vadd.f32 1.0, %v5305_v12 }
0x1acd   :  { %v3960_v43 = vmul.f32 %v3956_v9, %v3951_v25  ;;  %5306 = vtanh.f32 %v3971_v48 }
0x1ace   :  { %v3982_v3 = vmul.f32 0.5, %v3978_v14 }
0x1acf   :  { %v3964_v53 = vmul.f32 0.044715, %v3960_v43 }
0x1ad0   :  { %v3986_v51 = vmul.f32 %v3982_v3, %v3946_v60 }
0x1ad1   :  { %v3968_v16 = vadd.f32 %v3964_v53, %v3951_v25 }
0x1ad2   :  { %v3989_v22 = vpack.c.bf16 %v3986_v51, %v3985_v18 }
0x1ad3   :  { %v3972_v30 = vmul.f32 0.7978846, %v3968_v16  ;;  %v5307_v20 = vpop.eup %5306  ;;  %v5039_v16 = vld [vmem:[%s4383_s28 + $0x8] sm:$0xff] }
0x1ad4   :  { %4069 = vmatmul.bf16.vlgmr.msrb.gmra.mxu0 %v3989_v22  ;;  %v3979_v28 = vadd.f32 1.0, %v5307_v20  ;;  %4241 = vmatpush.bf16.msra.mxu1 %v5039_v16 }
0x1ad5   :  { %5308 = vtanh.f32 %v3972_v30 }
0x1ad6   :  { %v3983_v19 = vmul.f32 0.5, %v3979_v28 }
0x1ad8   :  { %v3987_v1 = vmul.f32 %v3983_v19, %v3949_v10 }
0x1adb   :  { %v5309_v27 = vpop.eup %5308 }
0x1adc   :  { %v3980_v49 = vadd.f32 1.0, %v5309_v27 }
0x1ade   :  { %v3984_v34 = vmul.f32 0.5, %v3980_v49  ;;  %v5038_v49 = vld [vmem:[%s4383_s28] sm:$0xff] }
0x1adf   :  { %4242 = vmatpush.bf16.msra.mxu1 %v5038_v49 }
0x1ae0   :  { %v3988_v5 = vmul.f32 %v3984_v34, %v3951_v25 }
0x1ae2   :  { %v3990_v21 = vpack.c.bf16 %v3988_v5, %v3987_v1 }
0x1ae4   :  { %4074 = vmatmul.bf16.gmra.mxu0 %v3990_v21 }
0x1b51   :  { %v4070_v29 = vpop.f32.mrf.mxu0 }
0x1b52   :  { %v4071_v46 = vadd.f32 %v5124_v38, %v4070_v29 }
0x1b54   :  { %v4080_v31 = vadd.f32 %v4071_v46, %v6235_v45 }
0x1b56   :  { %v4088_v36 = vsel %vm227_vm5, %v4080_v31, 0.0 }
0x1b57   :  { %4089 = vadd.xlane.f32.xlu1 %v4088_v36 }
0x1b59   :  { %v4072_v32 = vpop.f32.mrf.mxu0 }
0x1b5a   :  { %v4073_v61 = vadd.f32 %v5124_v38, %v4072_v32 }
0x1b5c   :  { %v4081_v35 = vadd.f32 %v4073_v61, %v6237_v23  ;;  %v5040_v61 = vld [vmem:[%s4387_s17] sm:$0xff] }
0x1b5e   :  { %v4091_v37 = vsel %vm227_vm5, %v4081_v35, 0.0 }
0x1b5f   :  { %4092 = vadd.xlane.f32.xlu2 %v4091_v37 }
0x1b61   :  { %v4075_v56 = vpop.f32.mrf.mxu0 }
0x1b62   :  { %v4076_v24 = vadd.f32 %v5124_v38, %v4075_v56 }
0x1b64   :  { %v4082_v50 = vadd.f32 %v4076_v24, %v6244_v63  ;;  %v5125_v24 = vld [vmem:[%s5872_s8 + $0x1] ss:$0 sm:$0xff] }
0x1b66   :  { %v4094_v42 = vsel %vm227_vm5, %v4082_v50, 0.0 }
0x1b67   :  { %4095 = vadd.xlane.f32.xlu0 %v4094_v42 }
0x1b69   :  { %v4077_v26 = vpop.f32.mrf.mxu0 }
0x1b6a   :  { %v4078_v40 = vadd.f32 %v5124_v38, %v4077_v26 }
0x1b6c   :  { %v4083_v45 = vadd.f32 %v4078_v40, %v6246_v33 }
0x1b6e   :  { %v4097_v47 = vsel %vm227_vm5, %v4083_v45, 0.0 }
0x1b6f   :  { %4098 = vadd.xlane.f32.xlu2 %v4097_v47 }
0x1bca   :  { %v4090_v54 = vpop.xlane.xlu1 %4089 }
0x1bcb   :  { %v4100_v23 = vmul.f32 %v4090_v54, %v5397_v44  ;;  %v5126_v54 = vld [vmem:[%s5877_s16 + $0x1] ss:$0 sm:$0xff] }
0x1bcd   :  { %v6270_v52 = vsub.f32 %v4080_v31, %v4100_v23  ;;  %v5041_v31 = vld [vmem:[%s4387_s17 + $0x8] sm:$0xff] }
0x1bce   :  { %4307 = vmatpush.bf16.msrb.mxu1 %v5041_v31 }
0x1bcf   :  { %v4108_v17 = vmul.f32 %v6270_v52, %v6270_v52 }
0x1bd1   :  { %v4112_v63 = vsel %vm227_vm5, %v4108_v17, 0.0 }
0x1bd2   :  { %v4093_v59 = vpop.xlane.xlu2 %4092  ;;  %4113 = vadd.xlane.f32.xlu2 %v4112_v63  ;;  %4308 = vmatpush.bf16.msrb.mxu1 %v5040_v61 }
0x1bd3   :  { %v4101_v60 = vmul.f32 %v4093_v59, %v5397_v44 }
0x1bd5   :  { %v6276_v57 = vsub.f32 %v4081_v35, %v4101_v60 }
0x1bd7   :  { %v4109_v33 = vmul.f32 %v6276_v57, %v6276_v57 }
0x1bd9   :  { %v4115_v0 = vsel %vm227_vm5, %v4109_v33, 0.0 }
0x1bda   :  { %v4096_v15 = vpop.xlane.xlu0 %4095  ;;  %4116 = vadd.xlane.f32.xlu0 %v4115_v0 }
0x1bdb   :  { %v4102_v8 = vmul.f32 %v4096_v15, %v5397_v44 }
0x1bdd   :  { %v6282_v39 = vsub.f32 %v4082_v50, %v4102_v8 }
0x1bdf   :  { %v4110_v55 = vmul.f32 %v6282_v39, %v6282_v39 }
0x1be1   :  { %v4118_v10 = vsel %vm227_vm5, %v4110_v55, 0.0 }
0x1be2   :  { %v4099_v41 = vpop.xlane.xlu2 %4098  ;;  %4119 = vadd.xlane.f32.xlu1 %v4118_v10 }
0x1be3   :  { %v4103_v7 = vmul.f32 %v4099_v41, %v5397_v44 }
0x1be5   :  { %v6288_v13 = vsub.f32 %v4083_v45, %v4103_v7 }
0x1be7   :  { %v4111_v2 = vmul.f32 %v6288_v13, %v6288_v13 }
0x1be9   :  { %v4121_v4 = vsel %vm227_vm5, %v4111_v2, 0.0 }
0x1bea   :  { %4122 = vadd.xlane.f32.xlu0 %v4121_v4 }
0x1c45   :  { %v4114_v62 = vpop.xlane.xlu2 %4113 }
0x1c46   :  { %v4124_v58 = vmul.f32 %v4114_v62, %v5397_v44 }
0x1c48   :  { %v4128_v6 = vadd.f32 1e-05, %v4124_v58 }
0x1c4a   :  { %5310 = vrsqrt.f32 %v4128_v6  ;;  %vm4138_vm4 = vweird.f32 %v4128_v6 }
0x1c4d   :  { %v4117_v25 = vpop.xlane.xlu0 %4116 }
0x1c4e   :  { %v4125_v12 = vmul.f32 %v4117_v25, %v5397_v44 }
0x1c50   :  { %v4129_v48 = vadd.f32 1e-05, %v4125_v12  ;;  %v5311_v9 = vpop.eup %5310 }
0x1c51   :  { %v4133_v11 = vmul.f32 %v5311_v9, %v4128_v6  ;;  %vm4139_vm3 = vweird.f32 %v5311_v9 }
0x1c52   :  { %5312 = vrsqrt.f32 %v4129_v48  ;;  %vm4148_vm15 = vweird.f32 %v4129_v48  ;;  %vm4140_vm2 = vmor %vm4138_vm4, %vm4139_vm3 }
0x1c53   :  { %v4134_v18 = vmul.f32 %v5311_v9, %v4133_v11 }
0x1c55   :  { %v4120_v14 = vpop.xlane.xlu1 %4119  ;;  %v4135_v30 = vmul.f32 0.5, %v4134_v18  ;;  %v5127_v18 = vld [vmem:[%s6296_s7] ss:$0 sm:$0xff]  ;;  %s5354_s7 = smov 30  }
0x1c56   :  { %v4126_v43 = vmul.f32 %v4120_v14, %v5397_v44  ;;  %s4391_s23 = sld [smem:[%s6341_s0 + %s5354_s7]]  }
0x1c57   :  { %v4136_v5 = vsub.f32 1.5, %v4135_v30 }
0x1c58   :  { %v5313_v3 = vpop.eup %5312  ;;  %v4130_v53 = vadd.f32 1e-05, %v4126_v43 }
0x1c59   :  { %v4143_v51 = vmul.f32 %v5313_v3, %v4129_v48  ;;  %vm4149_vm14 = vweird.f32 %v5313_v3  ;;  %v4137_v36 = vmul.f32 %v5311_v9, %v4136_v5 }
0x1c5a   :  { %5314 = vrsqrt.f32 %v4130_v53  ;;  %vm4150_vm0 = vmor %vm4148_vm15, %vm4149_vm14  ;;  %vm4158_vm6 = vweird.f32 %v4130_v53  ;;  %vm4250_vm14 = vcmask 257024  }
0x1c5b   :  { %v4144_v22 = vmul.f32 %v5313_v3, %v4143_v51  ;;  %v4141_v50 = vsel %vm4140_vm2, %v5311_v9, %v4137_v36 }
0x1c5c   :  { %v4172_v23 = vmul.f32 %v4141_v50, %v6270_v52 }
0x1c5d   :  { %v4145_v20 = vmul.f32 0.5, %v4144_v22  ;;  %v4123_v28 = vpop.xlane.xlu0 %4122 }
0x1c5e   :  { %v4127_v27 = vmul.f32 %v4123_v28, %v5397_v44  ;;  %v4179_v33 = vmul.f32 %v5125_v24, %v4172_v23 }
0x1c5f   :  { %v4146_v19 = vsub.f32 1.5, %v4145_v20  ;;  %v5128_v20 = vld [vmem:[%s4388_s21] ss:$0 sm:$0xff] }
0x1c60   :  { %v5315_v34 = vpop.eup %5314  ;;  %v4131_v1 = vadd.f32 1e-05, %v4127_v27  ;;  %v4186_v41 = vadd.f32 %v5126_v54, %v4179_v33 }
0x1c61   :  { %v4147_v21 = vmul.f32 %v5313_v3, %v4146_v19  ;;  %v4153_v38 = vmul.f32 %v5315_v34, %v4130_v53  ;;  %vm4159_vm1 = vweird.f32 %v5315_v34  ;;  %v5042_v53 = vld [vmem:[%s4389_s27] sm:$0xff] }
0x1c62   :  { %5316 = vrsqrt.f32 %v4131_v1  ;;  %vm4160_vm7 = vmor %vm4158_vm6, %vm4159_vm1  ;;  %vm4168_vm9 = vweird.f32 %v4131_v1 }
0x1c63   :  { %v4151_v29 = vsel %vm4150_vm0, %v5313_v3, %v4147_v21  ;;  %v4154_v46 = vmul.f32 %v5315_v34, %v4153_v38 }
0x1c64   :  { %v4173_v35 = vmul.f32 %v4151_v29, %v6276_v57 }
0x1c65   :  { %v4155_v32 = vmul.f32 0.5, %v4154_v46  ;;  %v5129_v46 = vld [vmem:[%s4390_s5] ss:$0 sm:$0xff] }
0x1c66   :  { %v4180_v40 = vmul.f32 %v5125_v24, %v4173_v35 }
0x1c67   :  { %v4156_v37 = vsub.f32 1.5, %v4155_v32 }
0x1c68   :  { %v5317_v56 = vpop.eup %5316  ;;  %v4187_v59 = vadd.f32 %v5126_v54, %v4180_v40 }
0x1c69   :  { %v4157_v42 = vmul.f32 %v5315_v34, %v4156_v37  ;;  %v4163_v26 = vmul.f32 %v5317_v56, %v4131_v1  ;;  %vm4169_vm8 = vweird.f32 %v5317_v56 }
0x1c6a   :  { %v4191_v8 = vpack.c.bf16 %v4187_v59, %v4187_v59  ;;  %vm4170_vm10 = vmor %vm4168_vm9, %vm4169_vm8 }
0x1c6b   :  { %v4161_v45 = vsel %vm4160_vm7, %v5315_v34, %v4157_v42  ;;  %v4164_v47 = vmul.f32 %v5317_v56, %v4163_v26 }
0x1c6c   :  { %v4174_v17 = vmul.f32 %v4161_v45, %v6282_v39  ;;  %v4207_v2 = vunpack.c.l.b16 %v4191_v8  ;;  %v4190_v39 = vpack.c.bf16 %v4186_v41, %v4186_v41 }
0x1c6d   :  { %v4165_v63 = vmul.f32 0.5, %v4164_v47 }
0x1c6e   :  { %v4181_v60 = vmul.f32 %v5125_v24, %v4174_v17  ;;  %v4210_v58 = vrot.slane %v4207_v2, 7  ;;  %v4206_v12 = vunpack.c.l.b16 %v4190_v39 }
0x1c6f   :  { %v4166_v57 = vsub.f32 1.5, %v4165_v63 }
0x1c70   :  { %v4188_v0 = vadd.f32 %v5126_v54, %v4181_v60  ;;  %v4212_v9 = vsel %vm4211_vm11, %v4210_v58, %v4206_v12 }
0x1c71   :  { %v4167_v15 = vmul.f32 %v5317_v56, %v4166_v57 }
0x1c72   :  { %v4192_v55 = vpack.c.bf16 %v4188_v0, %v4188_v0 }
0x1c73   :  { %v4171_v10 = vsel %vm4170_vm10, %v5317_v56, %v4167_v15 }
0x1c74   :  { %v4175_v7 = vmul.f32 %v4171_v10, %v6288_v13  ;;  %v4208_v4 = vunpack.c.l.b16 %v4192_v55  ;;  %v5043_v13 = vld [vmem:[%s4389_s27 + $0x8] sm:$0xff] }
0x1c75   :  { %4345 = vmatpush.bf16.msrb.mxu2 %v5043_v13 }
0x1c76   :  { %v4182_v52 = vmul.f32 %v5125_v24, %v4175_v7  ;;  %v4213_v25 = vrot.slane %v4208_v4, 6 }
0x1c78   :  { %v4189_v62 = vadd.f32 %v5126_v54, %v4182_v52  ;;  %v4215_v14 = vsel %vm4214_vm12, %v4213_v25, %v4212_v9  ;;  %v5130_v54 = vld [vmem:[%s4385_s12] ss:$0 sm:$0xff] }
0x1c79   :  { %4346 = vmatpush.bf16.msrb.mxu2 %v5042_v53 }
0x1c7a   :  { %v4193_v6 = vpack.c.bf16 %v4189_v62, %v4189_v62 }
0x1c7c   :  { %v4209_v48 = vunpack.c.l.b16 %v4193_v6 }
0x1c7e   :  { %v4216_v11 = vrot.slane %v4209_v48, 5 }
0x1c80   :  { %v4218_v43 = vsel %vm4217_vm13, %v4216_v11, %v4215_v14 }
0x1c81   :  { %v4219_v3 = vpack.c.b16 %v4218_v43, %v4218_v43 }
0x1c83   :  { %4951 = vmatmul.msk.bf16.vlgmr.msra.gmra.mxu1 %vm227_vm5, %v4219_v3 }
0x1c93   :  { %4960 = vmatmul.msk.bf16.vlgmr.msrb.gmra.mxu1 %vm227_vm5, %v4219_v3 }
0x1d00   :  { %v4244_v51 = vpop.f32.mrf.mxu1 }
0x1d01   :  { %v4245_v16 = vadd.f32 %v5127_v18, %v4244_v51 }
0x1d03   :  { %v4251_v22 = vsel %vm4250_vm14, %v4245_v16, 0.0 }
0x1d04   :  { %4252 = vadd.xlane.f32.xlu1 %v4251_v22 }
0x1d08   :  { %v4246_v30 = vpop.f32.mrf.mxu1 }
0x1d10   :  { %v4310_v28 = vpop.f32.mrf.mxu1 }
0x1d11   :  { %v4311_v27 = vadd.f32 %v5128_v20, %v4310_v28 }
0x1d13   :  { %5318 = vtanh.f32 %v4311_v27 }
0x1d18   :  { %v4312_v49 = vpop.f32.mrf.mxu1 }
0x1d19   :  { %v5319_v19 = vpop.eup %5318 }
0x1d1a   :  { %v4315_v34 = vpack.c.bf16 %v5319_v19, %v5319_v19 }
0x1d1c   :  { %4969 = vmatmul.msk.bf16.vlgmr.msrb.gmra.mxu2 %vm227_vm5, %v4315_v34 }
0x1d77   :  { %v4253_v1 = vpop.xlane.xlu1 %4252 }
0x1d78   :  { %v4254_v5 = vmul.f32 %v4253_v1, %v5397_v44 }
0x1d7a   :  { %v4255_v21 = vsub.f32 %v4245_v16, %v4254_v5 }
0x1d7c   :  { %v4256_v38 = vmul.f32 %v4255_v21, %v4255_v21 }
0x1d7e   :  { %v4257_v29 = vsel %vm4250_vm14, %v4256_v38, 0.0 }
0x1d7f   :  { %4258 = vadd.xlane.f32.xlu2 %v4257_v29 }
0x1d9f   :  { %v4348_v31 = vpop.f32.mrf.mxu2 }
0x1da0   :  { %v4349_v36 = vadd.f32 %v5129_v46, %v4348_v31 }
0x1da2   :  { %4353 = vrot.lane.b32.xlu0 %v4349_v36, %s5353_s3 }
0x1da7   :  { %v4350_v32 = vpop.f32.mrf.mxu2 }
0x1df2   :  { %v4259_v61 = vpop.xlane.xlu2 %4258 }
0x1df3   :  { %v4260_v35 = vmul.f32 %v4259_v61, %v5397_v44  ;;  %v5131_v44 = vld [vmem:[%s4386_s29] ss:$0 sm:$0xff] }
0x1df5   :  { %v4261_v37 = vadd.f32 1e-05, %v4260_v35 }
0x1df7   :  { %5320 = vrsqrt.f32 %v4261_v37  ;;  %vm4268_vm0 = vweird.f32 %v4261_v37 }
0x1dfd   :  { %v5321_v56 = vpop.eup %5320 }
0x1dfe   :  { %v4263_v24 = vmul.f32 %v5321_v56, %v4261_v37  ;;  %vm4269_vm15 = vweird.f32 %v5321_v56 }
0x1dff   :  { %vm4270_vm3 = vmor %vm4268_vm0, %vm4269_vm15 }
0x1e00   :  { %v4264_v50 = vmul.f32 %v5321_v56, %v4263_v24 }
0x1e02   :  { %v4265_v42 = vmul.f32 0.5, %v4264_v50 }
0x1e04   :  { %v4266_v26 = vsub.f32 1.5, %v4265_v42 }
0x1e06   :  { %v4267_v40 = vmul.f32 %v5321_v56, %v4266_v26 }
0x1e08   :  { %v4271_v45 = vsel %vm4270_vm3, %v5321_v56, %v4267_v40 }
0x1e09   :  { %v4272_v47 = vmul.f32 %v4271_v45, %v4255_v21 }
0x1e0b   :  { %v4276_v23 = vmul.f32 %v5130_v54, %v4272_v47 }
0x1e0d   :  { %v4280_v17 = vadd.f32 %v5131_v44, %v4276_v23 }
0x1e14   :  { %v4354_v63 = vpop.permute.xlu0 %4353 }
0x1e15   :  { %v4356_v59 = vsel %vm227_vm5, %v4280_v17, %v4354_v63 }
0x1e16   :  { %4357 = vst [vmem:[%s4391_s23] sm:$0xf] %v4356_v59 }

</bundles_post_ra>
